<compile_context>
chip_gen: v5e
topology: v5e:2x2
jax: 0.10.0
libtpu: 0.0.40
codegen_flags: <defaults>
</compile_context>

<pallas_src>
import math

import numpy as np
import jax
import jax.numpy as jnp
from jax.experimental import pallas as pl
from jax.experimental.pallas import tpu as pltpu

_LN_EPS = 1e-5          # torch.nn.LayerNorm default
_LRELU_SLOPE = 0.01     # torch.nn.LeakyReLU default negative_slope


# ----------------------------- math helpers (in-kernel safe) -----------------------------

def _erf(x):
    # Abramowitz & Stegun 7.1.26 rational approximation (|err| ~ 1.5e-7 with exact
    # division).  The divide is routed to the EUP via the approximate reciprocal.
    a1, a2, a3, a4, a5 = 0.254829592, -0.284496736, 1.421413741, -1.453152027, 1.061405429
    p = 0.3275911
    s = jnp.where(x >= 0.0, 1.0, -1.0)
    ax = jnp.abs(x)
    t = pl.reciprocal(1.0 + p * ax, approx=True)
    poly = ((((a5 * t + a4) * t + a3) * t + a2) * t + a1) * t
    return s * (1.0 - poly * jnp.exp(-ax * ax))


def _gelu(x):
    # torch.nn.GELU (erf-based)
    return 0.5 * x * (1.0 + _erf(x * (1.0 / math.sqrt(2.0))))


def _layer_norm(h, gamma, beta):
    mu = jnp.mean(h, axis=-1, keepdims=True)
    var = jnp.mean(jnp.square(h - mu), axis=-1, keepdims=True)
    return (h - mu) * jax.lax.rsqrt(var + _LN_EPS) * gamma + beta


# ----------------------------------- fused Pallas kernel -----------------------------------

def _make_kernel(n_conv):
    """One grid step == one batch element; everything stays in VMEM."""

    def kernel(*refs):
        (x_ref, y_ref,
         w1x_ref, w1y_ref, b1_ref, g1_ref, be1_ref,
         w2d_ref, b2d_ref) = refs[:9]
        conv_refs = [refs[9 + 3 * i: 9 + 3 * i + 3] for i in range(n_conv)]
        idx = 9 + 3 * n_conv
        pt_ref, fcwr_ref, fcb_ref = refs[idx: idx + 3]
        (fw1k_ref, fw1c_ref, fb1_ref, g2_ref, be2_ref,
         fw2_ref, fb2_ref) = refs[idx + 3: idx + 10]
        out_ref = refs[idx + 10]

        x_col = x_ref[0]                       # (N, 1)
        y_b = y_ref[0]                         # (N, D)
        n_pts = x_col.shape[0]
        d_in = y_b.shape[1]
        inv_n = 1.0 / n_pts

        # ---- FullIntegralKernel MLP: Linear(D+1 -> H1) as VPU FMAs (K is tiny) ----
        h = b1_ref[...] + x_col * w1x_ref[...]                       # (N, H1)
        w1y = w1y_ref[...]
        for d in range(d_in):
            h = h + y_b[:, d:d + 1] * w1y[d:d + 1, :]
        h = _layer_norm(h, g1_ref[...], be1_ref[...])
        h = jnp.maximum(h, 0.0)                                      # ReLU

        # ---- y-weighted mean over N commuted past the (linear) 2nd Linear:
        #  xk[d, z] = sum_j mean_n(y_d * h_j) * W2[j, z*D+d] + mean_n(y_d) * b2[z*D+d]
        rows = []                                                    # rows[d] : (1, Z)
        for d in range(d_in):
            yd = y_b[:, d:d + 1]                                     # (N, 1)
            g_d = jnp.sum(yd * h, axis=0, keepdims=True) * inv_n     # (1, H1) sublane reduce
            ybar = jnp.sum(yd, axis=0, keepdims=True) * inv_n        # (1, 1)
            rows.append(jnp.dot(g_d, w2d_ref[d],
                                preferred_element_type=jnp.float32)
                        + ybar * b2d_ref[d])

        # ---- ConvEncoder, channels-first [C, L]: Conv1d(k=3, s=2, p=1) as three
        #      (selection-matmul, weight-matmul) pairs; LeakyReLU after each layer.
        a = jnp.concatenate(rows, axis=0)                            # (D, Z)
        for (skt_ref, wkt_ref, bcol_ref) in conv_refs:
            acc = bcol_ref[...]                                      # (C_out, 1) -> broadcast
            for k in range(3):
                t = jnp.dot(a, skt_ref[k], preferred_element_type=jnp.float32)
                acc = acc + jnp.dot(wkt_ref[k], t, preferred_element_type=jnp.float32)
            a = jnp.where(acc >= 0.0, acc, _LRELU_SLOPE * acc)       # LeakyReLU

        # AdaptiveAvgPool1d(avpool) as a constant averaging matmul.
        pooled = jnp.dot(a, pt_ref[...], preferred_element_type=jnp.float32)   # (C3, avpool)

        # flatten((C3, avpool)) @ fc_w  ==  sum_p <pooled[:, p], fcwr[p]>  (mul + sublane reduce)
        xc = fcb_ref[...]                                            # (1, latent)
        for p in range(pooled.shape[1]):
            xc = xc + jnp.sum(pooled[:, p:p + 1] * fcwr_ref[p], axis=0, keepdims=True)

        # ---- FCBlock on cat([xk.flatten(1), xc]): Linear -> LayerNorm -> GELU -> Linear ----
        h1 = fb1_ref[...] + jnp.dot(xc, fw1c_ref[...], preferred_element_type=jnp.float32)
        for d in range(d_in):
            h1 = h1 + jnp.dot(rows[d], fw1k_ref[d], preferred_element_type=jnp.float32)
        h1 = _layer_norm(h1, g2_ref[...], be2_ref[...])
        h1 = _gelu(h1)
        out = jnp.dot(h1, fw2_ref[...], preferred_element_type=jnp.float32) + fb2_ref[...]
        out_ref[0] = out                                             # (1, latent)

    return kernel


def _const_index_map(ndim):
    zeros = (0,) * ndim
    return lambda b: zeros


def integral_kernel_block_forward(weights, cfg, x, y):
    """Fused forward.  x: [B, N], y: [B, N, D] -> [B, latent_dim]."""
    B, N = x.shape
    D = cfg["in_dim"]
    latent = cfg["latent_dim"]
    n_conv = len(cfg["conv_dims"])

    x3 = x.reshape(B, N, 1)   # column form so the kernel never transposes

    in_specs = [pl.BlockSpec((1, N, 1), lambda b: (b, 0, 0)),
                pl.BlockSpec((1, N, D), lambda b: (b, 0, 0))]
    # weights: full-array blocks, constant index -> fetched once, VMEM-resident.
    in_specs += [pl.BlockSpec(w.shape, _const_index_map(w.ndim)) for w in weights]

    out = pl.pallas_call(
        _make_kernel(n_conv),
        grid=(B,),
        in_specs=in_specs,
        out_specs=pl.BlockSpec((1, 1, latent), lambda b: (b, 0, 0)),
        out_shape=jax.ShapeDtypeStruct((B, 1, latent), jnp.float32),
        compiler_params=pltpu.CompilerParams(
            dimension_semantics=("parallel",),
            vmem_limit_bytes=32 * 1024 * 1024),
    )(x3, y, *weights)
    return out.reshape(B, latent)


# ----------------------------------- parameters -----------------------------------

def _uniform(key, shape, bound):
    return jax.random.uniform(key, shape, jnp.float32, -bound, bound)


def init_torch_params(key, *, z_num, in_dim, kernel_coef, latent_dim, conv_dims, avpool):
    """PyTorch-equivalent parameter set (linear weights stored input-major = W.T)."""
    H1 = z_num * kernel_coef
    H2 = latent_dim * 2
    fc_in = latent_dim + in_dim * z_num
    n_conv = len(conv_dims)
    keys = jax.random.split(key, 5 + n_conv)

    def lin(k, fi, fo):
        kw, kb = jax.random.split(k)
        b = 1.0 / math.sqrt(fi)
        return _uniform(kw, (fi, fo), b), _uniform(kb, (fo,), b)

    k_w1, k_b1 = lin(keys[0], in_dim + 1, H1)
    k_w2, k_b2 = lin(keys[1], H1, z_num * in_dim)

    convs, cin = [], in_dim
    for i, cd in enumerate(conv_dims):
        kw, kb = jax.random.split(keys[2 + i])
        b = 1.0 / math.sqrt(cin * 3)
        convs.append((_uniform(kw, (cd, cin, 3), b), _uniform(kb, (cd,), b)))   # torch (O, I, K)
        cin = cd
    conv_fc_w, conv_fc_b = lin(keys[2 + n_conv], conv_dims[-1] * avpool, latent_dim)

    f_w1, f_b1 = lin(keys[3 + n_conv], fc_in, H2)
    f_w2, f_b2 = lin(keys[4 + n_conv], H2, latent_dim)

    return dict(
        k_w1=k_w1, k_b1=k_b1,
        k_ln_g=jnp.ones((H1,), jnp.float32), k_ln_b=jnp.zeros((H1,), jnp.float32),
        k_w2=k_w2, k_b2=k_b2,
        convs=convs, conv_fc_w=conv_fc_w, conv_fc_b=conv_fc_b,
        f_w1=f_w1, f_b1=f_b1,
        f_ln_g=jnp.ones((H2,), jnp.float32), f_ln_b=jnp.zeros((H2,), jnp.float32),
        f_w2=f_w2, f_b2=f_b2,
    )


def prepare_kernel_params(tp, *, z_num, in_dim, kernel_coef, latent_dim, conv_dims, avpool):
    """One-time repack of torch-layout params into the fused kernel's layout."""
    del kernel_coef
    D, Z = in_dim, z_num
    H2 = tp["f_w1"].shape[1]

    # Integral MLP: split first Linear into x / y parts; split second Linear by d
    # (torch output-feature index f = z*D + d).
    w1x = tp["k_w1"][0:1, :]
    w1y = tp["k_w1"][1:, :]
    b1 = tp["k_b1"][None, :]
    ln1g = tp["k_ln_g"][None, :]
    ln1b = tp["k_ln_b"][None, :]
    w2d = jnp.stack([tp["k_w2"][:, d::D] for d in range(D)], axis=0)            # (D, H1, Z)
    b2d = jnp.stack([tp["k_b2"][d::D] for d in range(D)], axis=0)[:, None, :]   # (D, 1, Z)

    # Conv layers: 0/1 selection matrices (stride-2, pad-1) + per-tap transposed weights.
    conv_pack, L = [], Z
    for (w, b) in tp["convs"]:
        l_out = (L - 1) // 2 + 1
        skt = np.zeros((3, L, l_out), np.float32)
        for k in range(3):
            for l in range(l_out):
                j = 2 * l + k - 1
                if 0 <= j < L:
                    skt[k, j, l] = 1.0
        wkt = jnp.transpose(w, (2, 0, 1))        # (3, C_out, C_in): wkt[k] == w[:, :, k]
        bcol = b[:, None]                        # (C_out, 1)
        conv_pack.append((jnp.asarray(skt), wkt, bcol))
        L = l_out

    # AdaptiveAvgPool1d(avpool) as a constant averaging matrix (divisible case).
    # TODO(synk): general (non-divisible) AdaptiveAvgPool1d windows not implemented.
    assert L >= avpool and L % avpool == 0, (L, avpool)
    win = L // avpool
    pt = np.zeros((L, avpool), np.float32)
    for p in range(avpool):
        pt[p * win:(p + 1) * win, p] = 1.0 / win
    c3 = conv_dims[-1]
    fcwr = tp["conv_fc_w"].reshape(c3, avpool, latent_dim).transpose(1, 0, 2)   # (avpool, C3, latent)
    fcb = tp["conv_fc_b"][None, :]

    # FCBlock: feat = cat([xk.flatten(1) (order d*Z+z), xc]).
    fw1k = tp["f_w1"][:D * Z, :].reshape(D, Z, H2)
    fw1c = tp["f_w1"][D * Z:, :]
    fb1 = tp["f_b1"][None, :]
    ln2g = tp["f_ln_g"][None, :]
    ln2b = tp["f_ln_b"][None, :]
    fw2 = tp["f_w2"]
    fb2 = tp["f_b2"][None, :]

    weights = [w1x, w1y, b1, ln1g, ln1b, w2d, b2d]
    for (skt, wkt, bcol) in conv_pack:
        weights += [skt, wkt, bcol]
    weights += [jnp.asarray(pt), fcwr, fcb, fw1k, fw1c, fb1, ln2g, ln2b, fw2, fb2]
    return tuple(weights)


# ----------------------------------- pure-JAX reference -----------------------------------

def reference_forward(tp, x, y, *, z_num, in_dim, kernel_coef, latent_dim, conv_dims, avpool):
    """Straightforward port of the PyTorch module (for a numerical cross-check).
    TODO(synk): ConvEncoder source is not in the provided module; this follows the
    standard panpe ConvEncoder (stride-2 Conv1d stack + LeakyReLU + AdaptiveAvgPool1d
    + Linear), without batch-norm -- same guess the kernel implements."""
    del kernel_coef, conv_dims, latent_dim
    B, N = x.shape
    D, Z = in_dim, z_num
    hp = jax.lax.Precision.HIGHEST

    inp = jnp.concatenate([x[..., None], y], axis=-1)                       # (B, N, D+1)
    h = jnp.einsum("bni,io->bno", inp, tp["k_w1"], precision=hp) + tp["k_b1"]
    h = _layer_norm(h, tp["k_ln_g"], tp["k_ln_b"])
    h = jnp.maximum(h, 0.0)
    k = jnp.einsum("bnh,ho->bno", h, tp["k_w2"], precision=hp) + tp["k_b2"]
    k = k.reshape(B, N, Z, D).transpose(0, 2, 1, 3)                         # (B, Z, N, D)
    xk = (k * y[:, None, :, :]).mean(-2)                                    # (B, Z, D)
    xk = xk.swapaxes(1, 2)                                                  # (B, D, Z)

    a = xk
    for (w, b) in tp["convs"]:
        a = jax.lax.conv_general_dilated(a, w, window_strides=(2,), padding=((1, 1),),
                                         dimension_numbers=("NCH", "OIH", "NCH"),
                                         precision=hp)
        a = a + b[None, :, None]
        a = jnp.where(a >= 0.0, a, _LRELU_SLOPE * a)
    Bc, C3, L3 = a.shape
    pooled = a.reshape(Bc, C3, avpool, L3 // avpool).mean(-1)
    xc = jnp.dot(pooled.reshape(Bc, C3 * avpool), tp["conv_fc_w"], precision=hp) + tp["conv_fc_b"]

    feat = jnp.concatenate([xk.reshape(B, D * Z), xc], axis=-1)
    h2 = jnp.dot(feat, tp["f_w1"], precision=hp) + tp["f_b1"]
    h2 = _layer_norm(h2, tp["f_ln_g"], tp["f_ln_b"])
    h2 = jax.nn.gelu(h2, approximate=False)
    return jnp.dot(h2, tp["f_w2"], precision=hp) + tp["f_b2"]


# ----------------------------------- main -----------------------------------

if __name__ == "__main__":
    cfg = dict(z_num=64, in_dim=3, kernel_coef=2, latent_dim=32,
               conv_dims=(32, 64, 128), avpool=8)
    B, N = 2, 32

    key = jax.random.PRNGKey(0)
    kp, kx, ky = jax.random.split(key, 3)
    torch_params = init_torch_params(kp, **cfg)
    weights = prepare_kernel_params(torch_params, **cfg)

    x = jax.random.uniform(kx, (B, N), jnp.float32)
    y = jax.random.uniform(ky, (B, N, cfg["in_dim"]), jnp.float32)

    out = integral_kernel_block_forward(weights, cfg, x, y)
    out = jax.block_until_ready(out)
    assert out.shape == (B, cfg["latent_dim"]), out.shape

    ref = reference_forward(torch_params, x, y, **cfg)
    err = float(jnp.max(jnp.abs(out - ref)))
    # Loose tolerance: kernel uses an erf approximation + approximate EUP reciprocal.
    assert err < 5e-2, f"kernel/reference mismatch: max abs err = {err}"

    print("KERNEL_OK")
</pallas_src>

<mosaic_0001>
module attributes {stable_mosaic.version = 11 : i64} {
  func.func @kernel(%arg0: i32, %arg1: memref<1x32x1xf32, #tpu.memory_space<vmem>>, %arg2: memref<1x32x3xf32, #tpu.memory_space<vmem>>, %arg3: memref<1x128xf32, #tpu.memory_space<vmem>>, %arg4: memref<3x128xf32, #tpu.memory_space<vmem>>, %arg5: memref<1x128xf32, #tpu.memory_space<vmem>>, %arg6: memref<1x128xf32, #tpu.memory_space<vmem>>, %arg7: memref<1x128xf32, #tpu.memory_space<vmem>>, %arg8: memref<3x128x64xf32, #tpu.memory_space<vmem>>, %arg9: memref<3x1x64xf32, #tpu.memory_space<vmem>>, %arg10: memref<3x64x32xf32, #tpu.memory_space<vmem>>, %arg11: memref<3x32x3xf32, #tpu.memory_space<vmem>>, %arg12: memref<32x1xf32, #tpu.memory_space<vmem>>, %arg13: memref<3x32x16xf32, #tpu.memory_space<vmem>>, %arg14: memref<3x64x32xf32, #tpu.memory_space<vmem>>, %arg15: memref<64x1xf32, #tpu.memory_space<vmem>>, %arg16: memref<3x16x8xf32, #tpu.memory_space<vmem>>, %arg17: memref<3x128x64xf32, #tpu.memory_space<vmem>>, %arg18: memref<128x1xf32, #tpu.memory_space<vmem>>, %arg19: memref<8x8xf32, #tpu.memory_space<vmem>>, %arg20: memref<8x128x32xf32, #tpu.memory_space<vmem>>, %arg21: memref<1x32xf32, #tpu.memory_space<vmem>>, %arg22: memref<3x64x64xf32, #tpu.memory_space<vmem>>, %arg23: memref<32x64xf32, #tpu.memory_space<vmem>>, %arg24: memref<1x64xf32, #tpu.memory_space<vmem>>, %arg25: memref<1x64xf32, #tpu.memory_space<vmem>>, %arg26: memref<1x64xf32, #tpu.memory_space<vmem>>, %arg27: memref<64x32xf32, #tpu.memory_space<vmem>>, %arg28: memref<1x32xf32, #tpu.memory_space<vmem>>, %arg29: memref<1x1x32xf32, #tpu.memory_space<vmem>>) attributes {dimension_semantics = [#tpu.dimension_semantics<parallel>], iteration_bounds = array<i64: 2>, scalar_prefetch = 0 : i64, scratch_operands = 0 : i64, tpu.core_type = #tpu.core_type<tc>, window_params = [{transform_indices = @transform_0, window_bounds = array<i64: 1, 32, 1>}, {transform_indices = @transform_1, window_bounds = array<i64: 1, 32, 3>}, {pipeline_mode = #tpu.pipeline_mode<synchronous>, transform_indices = @transform_2, window_bounds = array<i64: 1, 128>}, {pipeline_mode = #tpu.pipeline_mode<synchronous>, transform_indices = @transform_3, window_bounds = array<i64: 3, 128>}, {pipeline_mode = #tpu.pipeline_mode<synchronous>, transform_indices = @transform_4, window_bounds = array<i64: 1, 128>}, {pipeline_mode = #tpu.pipeline_mode<synchronous>, transform_indices = @transform_5, window_bounds = array<i64: 1, 128>}, {pipeline_mode = #tpu.pipeline_mode<synchronous>, transform_indices = @transform_6, window_bounds = array<i64: 1, 128>}, {pipeline_mode = #tpu.pipeline_mode<synchronous>, transform_indices = @transform_7, window_bounds = array<i64: 3, 128, 64>}, {pipeline_mode = #tpu.pipeline_mode<synchronous>, transform_indices = @transform_8, window_bounds = array<i64: 3, 1, 64>}, {pipeline_mode = #tpu.pipeline_mode<synchronous>, transform_indices = @transform_9, window_bounds = array<i64: 3, 64, 32>}, {pipeline_mode = #tpu.pipeline_mode<synchronous>, transform_indices = @transform_10, window_bounds = array<i64: 3, 32, 3>}, {pipeline_mode = #tpu.pipeline_mode<synchronous>, transform_indices = @transform_11, window_bounds = array<i64: 32, 1>}, {pipeline_mode = #tpu.pipeline_mode<synchronous>, transform_indices = @transform_12, window_bounds = array<i64: 3, 32, 16>}, {pipeline_mode = #tpu.pipeline_mode<synchronous>, transform_indices = @transform_13, window_bounds = array<i64: 3, 64, 32>}, {pipeline_mode = #tpu.pipeline_mode<synchronous>, transform_indices = @transform_14, window_bounds = array<i64: 64, 1>}, {pipeline_mode = #tpu.pipeline_mode<synchronous>, transform_indices = @transform_15, window_bounds = array<i64: 3, 16, 8>}, {pipeline_mode = #tpu.pipeline_mode<synchronous>, transform_indices = @transform_16, window_bounds = array<i64: 3, 128, 64>}, {pipeline_mode = #tpu.pipeline_mode<synchronous>, transform_indices = @transform_17, window_bounds = array<i64: 128, 1>}, {pipeline_mode = #tpu.pipeline_mode<synchronous>, transform_indices = @transform_18, window_bounds = array<i64: 8, 8>}, {pipeline_mode = #tpu.pipeline_mode<synchronous>, transform_indices = @transform_19, window_bounds = array<i64: 8, 128, 32>}, {pipeline_mode = #tpu.pipeline_mode<synchronous>, transform_indices = @transform_20, window_bounds = array<i64: 1, 32>}, {pipeline_mode = #tpu.pipeline_mode<synchronous>, transform_indices = @transform_21, window_bounds = array<i64: 3, 64, 64>}, {pipeline_mode = #tpu.pipeline_mode<synchronous>, transform_indices = @transform_22, window_bounds = array<i64: 32, 64>}, {pipeline_mode = #tpu.pipeline_mode<synchronous>, transform_indices = @transform_23, window_bounds = array<i64: 1, 64>}, {pipeline_mode = #tpu.pipeline_mode<synchronous>, transform_indices = @transform_24, window_bounds = array<i64: 1, 64>}, {pipeline_mode = #tpu.pipeline_mode<synchronous>, transform_indices = @transform_25, window_bounds = array<i64: 1, 64>}, {pipeline_mode = #tpu.pipeline_mode<synchronous>, transform_indices = @transform_26, window_bounds = array<i64: 64, 32>}, {pipeline_mode = #tpu.pipeline_mode<synchronous>, transform_indices = @transform_27, window_bounds = array<i64: 1, 32>}, {transform_indices = @transform_28, window_bounds = array<i64: 1, 1, 32>}]} {
    %c0 = arith.constant 0 : index
    %c0_0 = arith.constant 0 : index
    %c0_1 = arith.constant 0 : index
    %0 = vector.load %arg1[%c0, %c0_0, %c0_1] : memref<1x32x1xf32, #tpu.memory_space<vmem>>, vector<1x32x1xf32>
    %1 = vector.shape_cast %0 : vector<1x32x1xf32> to vector<32x1xf32>
    %c0_2 = arith.constant 0 : index
    %c0_3 = arith.constant 0 : index
    %c0_4 = arith.constant 0 : index
    %2 = vector.load %arg2[%c0_2, %c0_3, %c0_4] : memref<1x32x3xf32, #tpu.memory_space<vmem>>, vector<1x32x3xf32>
    %3 = vector.shape_cast %2 : vector<1x32x3xf32> to vector<32x3xf32>
    %c0_5 = arith.constant 0 : index
    %c0_6 = arith.constant 0 : index
    %4 = vector.load %arg5[%c0_5, %c0_6] : memref<1x128xf32, #tpu.memory_space<vmem>>, vector<1x128xf32>
    %c0_7 = arith.constant 0 : index
    %c0_8 = arith.constant 0 : index
    %5 = vector.load %arg3[%c0_7, %c0_8] : memref<1x128xf32, #tpu.memory_space<vmem>>, vector<1x128xf32>
    %6 = vector.broadcast %1 : vector<32x1xf32> to vector<32x128xf32>
    %7 = vector.broadcast %5 : vector<1x128xf32> to vector<32x128xf32>
    %8 = arith.mulf %6, %7 : vector<32x128xf32>
    %9 = vector.broadcast %4 : vector<1x128xf32> to vector<32x128xf32>
    %10 = arith.addf %9, %8 : vector<32x128xf32>
    %c0_9 = arith.constant 0 : index
    %c0_10 = arith.constant 0 : index
    %11 = vector.load %arg4[%c0_9, %c0_10] : memref<3x128xf32, #tpu.memory_space<vmem>>, vector<3x128xf32>
    %12 = vector.extract_strided_slice %3 {offsets = [0, 0], sizes = [32, 1], strides = [1, 1]} : vector<32x3xf32> to vector<32x1xf32>
    %13 = vector.extract_strided_slice %11 {offsets = [0, 0], sizes = [1, 128], strides = [1, 1]} : vector<3x128xf32> to vector<1x128xf32>
    %14 = vector.broadcast %12 : vector<32x1xf32> to vector<32x128xf32>
    %15 = vector.broadcast %13 : vector<1x128xf32> to vector<32x128xf32>
    %16 = arith.mulf %14, %15 : vector<32x128xf32>
    %17 = arith.addf %10, %16 : vector<32x128xf32>
    %18 = vector.extract_strided_slice %3 {offsets = [0, 1], sizes = [32, 1], strides = [1, 1]} : vector<32x3xf32> to vector<32x1xf32>
    %19 = vector.extract_strided_slice %11 {offsets = [1, 0], sizes = [1, 128], strides = [1, 1]} : vector<3x128xf32> to vector<1x128xf32>
    %20 = vector.broadcast %18 : vector<32x1xf32> to vector<32x128xf32>
    %21 = vector.broadcast %19 : vector<1x128xf32> to vector<32x128xf32>
    %22 = arith.mulf %20, %21 : vector<32x128xf32>
    %23 = arith.addf %17, %22 : vector<32x128xf32>
    %24 = vector.extract_strided_slice %3 {offsets = [0, 2], sizes = [32, 1], strides = [1, 1]} : vector<32x3xf32> to vector<32x1xf32>
    %25 = vector.extract_strided_slice %11 {offsets = [2, 0], sizes = [1, 128], strides = [1, 1]} : vector<3x128xf32> to vector<1x128xf32>
    %26 = vector.broadcast %24 : vector<32x1xf32> to vector<32x128xf32>
    %27 = vector.broadcast %25 : vector<1x128xf32> to vector<32x128xf32>
    %28 = arith.mulf %26, %27 : vector<32x128xf32>
    %29 = arith.addf %23, %28 : vector<32x128xf32>
    %c0_11 = arith.constant 0 : index
    %c0_12 = arith.constant 0 : index
    %30 = vector.load %arg6[%c0_11, %c0_12] : memref<1x128xf32, #tpu.memory_space<vmem>>, vector<1x128xf32>
    %c0_13 = arith.constant 0 : index
    %c0_14 = arith.constant 0 : index
    %31 = vector.load %arg7[%c0_13, %c0_14] : memref<1x128xf32, #tpu.memory_space<vmem>>, vector<1x128xf32>
    %cst = arith.constant dense<0.000000e+00> : vector<32xf32>
    %32 = vector.multi_reduction <add>, %29, %cst [1] : vector<32x128xf32> to vector<32xf32>
    %33 = vector.shape_cast %32 : vector<32xf32> to vector<32x1xf32>
    %cst_15 = arith.constant 1.280000e+02 : f32
    %34 = vector.broadcast %cst_15 : f32 to vector<32x1xf32>
    %35 = arith.divf %33, %34 : vector<32x1xf32>
    %36 = vector.broadcast %35 : vector<32x1xf32> to vector<32x128xf32>
    %37 = arith.subf %29, %36 : vector<32x128xf32>
    %38 = arith.mulf %37, %37 : vector<32x128xf32>
    %cst_16 = arith.constant dense<0.000000e+00> : vector<32xf32>
    %39 = vector.multi_reduction <add>, %38, %cst_16 [1] : vector<32x128xf32> to vector<32xf32>
    %40 = vector.shape_cast %39 : vector<32xf32> to vector<32x1xf32>
    %cst_17 = arith.constant 1.280000e+02 : f32
    %41 = vector.broadcast %cst_17 : f32 to vector<32x1xf32>
    %42 = arith.divf %40, %41 : vector<32x1xf32>
    %43 = vector.broadcast %35 : vector<32x1xf32> to vector<32x128xf32>
    %44 = arith.subf %29, %43 : vector<32x128xf32>
    %cst_18 = arith.constant 9.99999974E-6 : f32
    %45 = vector.broadcast %cst_18 : f32 to vector<32x1xf32>
    %46 = arith.addf %42, %45 : vector<32x1xf32>
    %47 = math.rsqrt %46 : vector<32x1xf32>
    %48 = vector.broadcast %47 : vector<32x1xf32> to vector<32x128xf32>
    %49 = arith.mulf %44, %48 : vector<32x128xf32>
    %50 = vector.broadcast %30 : vector<1x128xf32> to vector<32x128xf32>
    %51 = arith.mulf %49, %50 : vector<32x128xf32>
    %52 = vector.broadcast %31 : vector<1x128xf32> to vector<32x128xf32>
    %53 = arith.addf %51, %52 : vector<32x128xf32>
    %cst_19 = arith.constant 0.000000e+00 : f32
    %54 = vector.broadcast %cst_19 : f32 to vector<32x128xf32>
    %55 = arith.maximumf %53, %54 : vector<32x128xf32>
    %56 = vector.extract_strided_slice %3 {offsets = [0, 0], sizes = [32, 1], strides = [1, 1]} : vector<32x3xf32> to vector<32x1xf32>
    %57 = vector.broadcast %56 : vector<32x1xf32> to vector<32x128xf32>
    %58 = arith.mulf %57, %55 : vector<32x128xf32>
    %cst_20 = arith.constant dense<0.000000e+00> : vector<128xf32>
    %59 = vector.multi_reduction <add>, %58, %cst_20 [0] : vector<32x128xf32> to vector<128xf32>
    %60 = vector.shape_cast %59 : vector<128xf32> to vector<1x128xf32>
    %cst_21 = arith.constant 3.125000e-02 : f32
    %61 = vector.broadcast %cst_21 : f32 to vector<1x128xf32>
    %62 = arith.mulf %60, %61 : vector<1x128xf32>
    %cst_22 = arith.constant dense<0.000000e+00> : vector<1xf32>
    %63 = vector.multi_reduction <add>, %56, %cst_22 [0] : vector<32x1xf32> to vector<1xf32>
    %64 = vector.shape_cast %63 : vector<1xf32> to vector<1x1xf32>
    %cst_23 = arith.constant 3.125000e-02 : f32
    %65 = vector.broadcast %cst_23 : f32 to vector<1x1xf32>
    %66 = arith.mulf %64, %65 : vector<1x1xf32>
    %c0_24 = arith.constant 0 : index
    %c0_25 = arith.constant 0 : index
    %c0_26 = arith.constant 0 : index
    %67 = vector.load %arg8[%c0_24, %c0_25, %c0_26] : memref<3x128x64xf32, #tpu.memory_space<vmem>>, vector<1x128x64xf32>
    %68 = vector.shape_cast %67 : vector<1x128x64xf32> to vector<128x64xf32>
    %cst_27 = arith.constant dense<0.000000e+00> : vector<1x64xf32>
    %69 = tpu.matmul %62, %68, %cst_27 {dimension_numbers = #tpu.dot_dimension_numbers<[1], [0], [0], [1], [0, 0, 1, 1], [], []>} : vector<1x128xf32>, vector<128x64xf32>, vector<1x64xf32> -> vector<1x64xf32>
    %c0_28 = arith.constant 0 : index
    %c0_29 = arith.constant 0 : index
    %c0_30 = arith.constant 0 : index
    %70 = vector.load %arg9[%c0_28, %c0_29, %c0_30] : memref<3x1x64xf32, #tpu.memory_space<vmem>>, vector<1x1x64xf32>
    %71 = vector.shape_cast %70 : vector<1x1x64xf32> to vector<1x64xf32>
    %72 = vector.broadcast %66 : vector<1x1xf32> to vector<1x64xf32>
    %73 = arith.mulf %72, %71 : vector<1x64xf32>
    %74 = arith.addf %69, %73 : vector<1x64xf32>
    %75 = vector.extract_strided_slice %3 {offsets = [0, 1], sizes = [32, 1], strides = [1, 1]} : vector<32x3xf32> to vector<32x1xf32>
    %76 = vector.broadcast %75 : vector<32x1xf32> to vector<32x128xf32>
    %77 = arith.mulf %76, %55 : vector<32x128xf32>
    %cst_31 = arith.constant dense<0.000000e+00> : vector<128xf32>
    %78 = vector.multi_reduction <add>, %77, %cst_31 [0] : vector<32x128xf32> to vector<128xf32>
    %79 = vector.shape_cast %78 : vector<128xf32> to vector<1x128xf32>
    %cst_32 = arith.constant 3.125000e-02 : f32
    %80 = vector.broadcast %cst_32 : f32 to vector<1x128xf32>
    %81 = arith.mulf %79, %80 : vector<1x128xf32>
    %cst_33 = arith.constant dense<0.000000e+00> : vector<1xf32>
    %82 = vector.multi_reduction <add>, %75, %cst_33 [0] : vector<32x1xf32> to vector<1xf32>
    %83 = vector.shape_cast %82 : vector<1xf32> to vector<1x1xf32>
    %cst_34 = arith.constant 3.125000e-02 : f32
    %84 = vector.broadcast %cst_34 : f32 to vector<1x1xf32>
    %85 = arith.mulf %83, %84 : vector<1x1xf32>
    %c1 = arith.constant 1 : index
    %c0_35 = arith.constant 0 : index
    %c0_36 = arith.constant 0 : index
    %86 = vector.load %arg8[%c1, %c0_35, %c0_36] : memref<3x128x64xf32, #tpu.memory_space<vmem>>, vector<1x128x64xf32>
    %87 = vector.shape_cast %86 : vector<1x128x64xf32> to vector<128x64xf32>
    %cst_37 = arith.constant dense<0.000000e+00> : vector<1x64xf32>
    %88 = tpu.matmul %81, %87, %cst_37 {dimension_numbers = #tpu.dot_dimension_numbers<[1], [0], [0], [1], [0, 0, 1, 1], [], []>} : vector<1x128xf32>, vector<128x64xf32>, vector<1x64xf32> -> vector<1x64xf32>
    %c1_38 = arith.constant 1 : index
    %c0_39 = arith.constant 0 : index
    %c0_40 = arith.constant 0 : index
    %89 = vector.load %arg9[%c1_38, %c0_39, %c0_40] : memref<3x1x64xf32, #tpu.memory_space<vmem>>, vector<1x1x64xf32>
    %90 = vector.shape_cast %89 : vector<1x1x64xf32> to vector<1x64xf32>
    %91 = vector.broadcast %85 : vector<1x1xf32> to vector<1x64xf32>
    %92 = arith.mulf %91, %90 : vector<1x64xf32>
    %93 = arith.addf %88, %92 : vector<1x64xf32>
    %94 = vector.extract_strided_slice %3 {offsets = [0, 2], sizes = [32, 1], strides = [1, 1]} : vector<32x3xf32> to vector<32x1xf32>
    %95 = vector.broadcast %94 : vector<32x1xf32> to vector<32x128xf32>
    %96 = arith.mulf %95, %55 : vector<32x128xf32>
    %cst_41 = arith.constant dense<0.000000e+00> : vector<128xf32>
    %97 = vector.multi_reduction <add>, %96, %cst_41 [0] : vector<32x128xf32> to vector<128xf32>
    %98 = vector.shape_cast %97 : vector<128xf32> to vector<1x128xf32>
    %cst_42 = arith.constant 3.125000e-02 : f32
    %99 = vector.broadcast %cst_42 : f32 to vector<1x128xf32>
    %100 = arith.mulf %98, %99 : vector<1x128xf32>
    %cst_43 = arith.constant dense<0.000000e+00> : vector<1xf32>
    %101 = vector.multi_reduction <add>, %94, %cst_43 [0] : vector<32x1xf32> to vector<1xf32>
    %102 = vector.shape_cast %101 : vector<1xf32> to vector<1x1xf32>
    %cst_44 = arith.constant 3.125000e-02 : f32
    %103 = vector.broadcast %cst_44 : f32 to vector<1x1xf32>
    %104 = arith.mulf %102, %103 : vector<1x1xf32>
    %c2 = arith.constant 2 : index
    %c0_45 = arith.constant 0 : index
    %c0_46 = arith.constant 0 : index
    %105 = vector.load %arg8[%c2, %c0_45, %c0_46] : memref<3x128x64xf32, #tpu.memory_space<vmem>>, vector<1x128x64xf32>
    %106 = vector.shape_cast %105 : vector<1x128x64xf32> to vector<128x64xf32>
    %cst_47 = arith.constant dense<0.000000e+00> : vector<1x64xf32>
    %107 = tpu.matmul %100, %106, %cst_47 {dimension_numbers = #tpu.dot_dimension_numbers<[1], [0], [0], [1], [0, 0, 1, 1], [], []>} : vector<1x128xf32>, vector<128x64xf32>, vector<1x64xf32> -> vector<1x64xf32>
    %c2_48 = arith.constant 2 : index
    %c0_49 = arith.constant 0 : index
    %c0_50 = arith.constant 0 : index
    %108 = vector.load %arg9[%c2_48, %c0_49, %c0_50] : memref<3x1x64xf32, #tpu.memory_space<vmem>>, vector<1x1x64xf32>
    %109 = vector.shape_cast %108 : vector<1x1x64xf32> to vector<1x64xf32>
    %110 = vector.broadcast %104 : vector<1x1xf32> to vector<1x64xf32>
    %111 = arith.mulf %110, %109 : vector<1x64xf32>
    %112 = arith.addf %107, %111 : vector<1x64xf32>
    %113 = tpu.concatenate %74, %93, %112 in 0 : vector<1x64xf32>, vector<1x64xf32>, vector<1x64xf32> -> vector<3x64xf32>
    %c0_51 = arith.constant 0 : index
    %c0_52 = arith.constant 0 : index
    %114 = vector.load %arg12[%c0_51, %c0_52] : memref<32x1xf32, #tpu.memory_space<vmem>>, vector<32x1xf32>
    %c0_53 = arith.constant 0 : index
    %c0_54 = arith.constant 0 : index
    %c0_55 = arith.constant 0 : index
    %115 = vector.load %arg10[%c0_53, %c0_54, %c0_55] : memref<3x64x32xf32, #tpu.memory_space<vmem>>, vector<1x64x32xf32>
    %116 = vector.shape_cast %115 : vector<1x64x32xf32> to vector<64x32xf32>
    %cst_56 = arith.constant dense<0.000000e+00> : vector<3x32xf32>
    %117 = tpu.matmul %113, %116, %cst_56 {dimension_numbers = #tpu.dot_dimension_numbers<[1], [0], [0], [1], [0, 0, 1, 1], [], []>} : vector<3x64xf32>, vector<64x32xf32>, vector<3x32xf32> -> vector<3x32xf32>
    %c0_57 = arith.constant 0 : index
    %c0_58 = arith.constant 0 : index
    %c0_59 = arith.constant 0 : index
    %118 = vector.load %arg11[%c0_57, %c0_58, %c0_59] : memref<3x32x3xf32, #tpu.memory_space<vmem>>, vector<1x32x3xf32>
    %119 = vector.shape_cast %118 : vector<1x32x3xf32> to vector<32x3xf32>
    %cst_60 = arith.constant dense<0.000000e+00> : vector<32x32xf32>
    %120 = tpu.matmul %119, %117, %cst_60 {dimension_numbers = #tpu.dot_dimension_numbers<[1], [0], [0], [1], [0, 0, 1, 1], [], []>} : vector<32x3xf32>, vector<3x32xf32>, vector<32x32xf32> -> vector<32x32xf32>
    %121 = vector.broadcast %114 : vector<32x1xf32> to vector<32x32xf32>
    %122 = arith.addf %121, %120 : vector<32x32xf32>
    %c1_61 = arith.constant 1 : index
    %c0_62 = arith.constant 0 : index
    %c0_63 = arith.constant 0 : index
    %123 = vector.load %arg10[%c1_61, %c0_62, %c0_63] : memref<3x64x32xf32, #tpu.memory_space<vmem>>, vector<1x64x32xf32>
    %124 = vector.shape_cast %123 : vector<1x64x32xf32> to vector<64x32xf32>
    %cst_64 = arith.constant dense<0.000000e+00> : vector<3x32xf32>
    %125 = tpu.matmul %113, %124, %cst_64 {dimension_numbers = #tpu.dot_dimension_numbers<[1], [0], [0], [1], [0, 0, 1, 1], [], []>} : vector<3x64xf32>, vector<64x32xf32>, vector<3x32xf32> -> vector<3x32xf32>
    %c1_65 = arith.constant 1 : index
    %c0_66 = arith.constant 0 : index
    %c0_67 = arith.constant 0 : index
    %126 = vector.load %arg11[%c1_65, %c0_66, %c0_67] : memref<3x32x3xf32, #tpu.memory_space<vmem>>, vector<1x32x3xf32>
    %127 = vector.shape_cast %126 : vector<1x32x3xf32> to vector<32x3xf32>
    %cst_68 = arith.constant dense<0.000000e+00> : vector<32x32xf32>
    %128 = tpu.matmul %127, %125, %cst_68 {dimension_numbers = #tpu.dot_dimension_numbers<[1], [0], [0], [1], [0, 0, 1, 1], [], []>} : vector<32x3xf32>, vector<3x32xf32>, vector<32x32xf32> -> vector<32x32xf32>
    %129 = arith.addf %122, %128 : vector<32x32xf32>
    %c2_69 = arith.constant 2 : index
    %c0_70 = arith.constant 0 : index
    %c0_71 = arith.constant 0 : index
    %130 = vector.load %arg10[%c2_69, %c0_70, %c0_71] : memref<3x64x32xf32, #tpu.memory_space<vmem>>, vector<1x64x32xf32>
    %131 = vector.shape_cast %130 : vector<1x64x32xf32> to vector<64x32xf32>
    %cst_72 = arith.constant dense<0.000000e+00> : vector<3x32xf32>
    %132 = tpu.matmul %113, %131, %cst_72 {dimension_numbers = #tpu.dot_dimension_numbers<[1], [0], [0], [1], [0, 0, 1, 1], [], []>} : vector<3x64xf32>, vector<64x32xf32>, vector<3x32xf32> -> vector<3x32xf32>
    %c2_73 = arith.constant 2 : index
    %c0_74 = arith.constant 0 : index
    %c0_75 = arith.constant 0 : index
    %133 = vector.load %arg11[%c2_73, %c0_74, %c0_75] : memref<3x32x3xf32, #tpu.memory_space<vmem>>, vector<1x32x3xf32>
    %134 = vector.shape_cast %133 : vector<1x32x3xf32> to vector<32x3xf32>
    %cst_76 = arith.constant dense<0.000000e+00> : vector<32x32xf32>
    %135 = tpu.matmul %134, %132, %cst_76 {dimension_numbers = #tpu.dot_dimension_numbers<[1], [0], [0], [1], [0, 0, 1, 1], [], []>} : vector<32x3xf32>, vector<3x32xf32>, vector<32x32xf32> -> vector<32x32xf32>
    %136 = arith.addf %129, %135 : vector<32x32xf32>
    %cst_77 = arith.constant 0.000000e+00 : f32
    %137 = vector.broadcast %cst_77 : f32 to vector<32x32xf32>
    %138 = arith.cmpf oge, %136, %137 : vector<32x32xf32>
    %cst_78 = arith.constant 0.00999999977 : f32
    %139 = vector.broadcast %cst_78 : f32 to vector<32x32xf32>
    %140 = arith.mulf %139, %136 : vector<32x32xf32>
    %141 = arith.select %138, %136, %140 : vector<32x32xi1>, vector<32x32xf32>
    %c0_79 = arith.constant 0 : index
    %c0_80 = arith.constant 0 : index
    %142 = vector.load %arg15[%c0_79, %c0_80] : memref<64x1xf32, #tpu.memory_space<vmem>>, vector<64x1xf32>
    %c0_81 = arith.constant 0 : index
    %c0_82 = arith.constant 0 : index
    %c0_83 = arith.constant 0 : index
    %143 = vector.load %arg13[%c0_81, %c0_82, %c0_83] : memref<3x32x16xf32, #tpu.memory_space<vmem>>, vector<1x32x16xf32>
    %144 = vector.shape_cast %143 : vector<1x32x16xf32> to vector<32x16xf32>
    %cst_84 = arith.constant dense<0.000000e+00> : vector<32x16xf32>
    %145 = tpu.matmul %141, %144, %cst_84 {dimension_numbers = #tpu.dot_dimension_numbers<[1], [0], [0], [1], [0, 0, 1, 1], [], []>} : vector<32x32xf32>, vector<32x16xf32>, vector<32x16xf32> -> vector<32x16xf32>
    %c0_85 = arith.constant 0 : index
    %c0_86 = arith.constant 0 : index
    %c0_87 = arith.constant 0 : index
    %146 = vector.load %arg14[%c0_85, %c0_86, %c0_87] : memref<3x64x32xf32, #tpu.memory_space<vmem>>, vector<1x64x32xf32>
    %147 = vector.shape_cast %146 : vector<1x64x32xf32> to vector<64x32xf32>
    %cst_88 = arith.constant dense<0.000000e+00> : vector<64x16xf32>
    %148 = tpu.matmul %147, %145, %cst_88 {dimension_numbers = #tpu.dot_dimension_numbers<[1], [0], [0], [1], [0, 0, 1, 1], [], []>} : vector<64x32xf32>, vector<32x16xf32>, vector<64x16xf32> -> vector<64x16xf32>
    %149 = vector.broadcast %142 : vector<64x1xf32> to vector<64x16xf32>
    %150 = arith.addf %149, %148 : vector<64x16xf32>
    %c1_89 = arith.constant 1 : index
    %c0_90 = arith.constant 0 : index
    %c0_91 = arith.constant 0 : index
    %151 = vector.load %arg13[%c1_89, %c0_90, %c0_91] : memref<3x32x16xf32, #tpu.memory_space<vmem>>, vector<1x32x16xf32>
    %152 = vector.shape_cast %151 : vector<1x32x16xf32> to vector<32x16xf32>
    %cst_92 = arith.constant dense<0.000000e+00> : vector<32x16xf32>
    %153 = tpu.matmul %141, %152, %cst_92 {dimension_numbers = #tpu.dot_dimension_numbers<[1], [0], [0], [1], [0, 0, 1, 1], [], []>} : vector<32x32xf32>, vector<32x16xf32>, vector<32x16xf32> -> vector<32x16xf32>
    %c1_93 = arith.constant 1 : index
    %c0_94 = arith.constant 0 : index
    %c0_95 = arith.constant 0 : index
    %154 = vector.load %arg14[%c1_93, %c0_94, %c0_95] : memref<3x64x32xf32, #tpu.memory_space<vmem>>, vector<1x64x32xf32>
    %155 = vector.shape_cast %154 : vector<1x64x32xf32> to vector<64x32xf32>
    %cst_96 = arith.constant dense<0.000000e+00> : vector<64x16xf32>
    %156 = tpu.matmul %155, %153, %cst_96 {dimension_numbers = #tpu.dot_dimension_numbers<[1], [0], [0], [1], [0, 0, 1, 1], [], []>} : vector<64x32xf32>, vector<32x16xf32>, vector<64x16xf32> -> vector<64x16xf32>
    %157 = arith.addf %150, %156 : vector<64x16xf32>
    %c2_97 = arith.constant 2 : index
    %c0_98 = arith.constant 0 : index
    %c0_99 = arith.constant 0 : index
    %158 = vector.load %arg13[%c2_97, %c0_98, %c0_99] : memref<3x32x16xf32, #tpu.memory_space<vmem>>, vector<1x32x16xf32>
    %159 = vector.shape_cast %158 : vector<1x32x16xf32> to vector<32x16xf32>
    %cst_100 = arith.constant dense<0.000000e+00> : vector<32x16xf32>
    %160 = tpu.matmul %141, %159, %cst_100 {dimension_numbers = #tpu.dot_dimension_numbers<[1], [0], [0], [1], [0, 0, 1, 1], [], []>} : vector<32x32xf32>, vector<32x16xf32>, vector<32x16xf32> -> vector<32x16xf32>
    %c2_101 = arith.constant 2 : index
    %c0_102 = arith.constant 0 : index
    %c0_103 = arith.constant 0 : index
    %161 = vector.load %arg14[%c2_101, %c0_102, %c0_103] : memref<3x64x32xf32, #tpu.memory_space<vmem>>, vector<1x64x32xf32>
    %162 = vector.shape_cast %161 : vector<1x64x32xf32> to vector<64x32xf32>
    %cst_104 = arith.constant dense<0.000000e+00> : vector<64x16xf32>
    %163 = tpu.matmul %162, %160, %cst_104 {dimension_numbers = #tpu.dot_dimension_numbers<[1], [0], [0], [1], [0, 0, 1, 1], [], []>} : vector<64x32xf32>, vector<32x16xf32>, vector<64x16xf32> -> vector<64x16xf32>
    %164 = arith.addf %157, %163 : vector<64x16xf32>
    %cst_105 = arith.constant 0.000000e+00 : f32
    %165 = vector.broadcast %cst_105 : f32 to vector<64x16xf32>
    %166 = arith.cmpf oge, %164, %165 : vector<64x16xf32>
    %cst_106 = arith.constant 0.00999999977 : f32
    %167 = vector.broadcast %cst_106 : f32 to vector<64x16xf32>
    %168 = arith.mulf %167, %164 : vector<64x16xf32>
    %169 = arith.select %166, %164, %168 : vector<64x16xi1>, vector<64x16xf32>
    %c0_107 = arith.constant 0 : index
    %c0_108 = arith.constant 0 : index
    %170 = vector.load %arg18[%c0_107, %c0_108] : memref<128x1xf32, #tpu.memory_space<vmem>>, vector<128x1xf32>
    %c0_109 = arith.constant 0 : index
    %c0_110 = arith.constant 0 : index
    %c0_111 = arith.constant 0 : index
    %171 = vector.load %arg16[%c0_109, %c0_110, %c0_111] : memref<3x16x8xf32, #tpu.memory_space<vmem>>, vector<1x16x8xf32>
    %172 = vector.shape_cast %171 : vector<1x16x8xf32> to vector<16x8xf32>
    %cst_112 = arith.constant dense<0.000000e+00> : vector<64x8xf32>
    %173 = tpu.matmul %169, %172, %cst_112 {dimension_numbers = #tpu.dot_dimension_numbers<[1], [0], [0], [1], [0, 0, 1, 1], [], []>} : vector<64x16xf32>, vector<16x8xf32>, vector<64x8xf32> -> vector<64x8xf32>
    %c0_113 = arith.constant 0 : index
    %c0_114 = arith.constant 0 : index
    %c0_115 = arith.constant 0 : index
    %174 = vector.load %arg17[%c0_113, %c0_114, %c0_115] : memref<3x128x64xf32, #tpu.memory_space<vmem>>, vector<1x128x64xf32>
    %175 = vector.shape_cast %174 : vector<1x128x64xf32> to vector<128x64xf32>
    %cst_116 = arith.constant dense<0.000000e+00> : vector<128x8xf32>
    %176 = tpu.matmul %175, %173, %cst_116 {dimension_numbers = #tpu.dot_dimension_numbers<[1], [0], [0], [1], [0, 0, 1, 1], [], []>} : vector<128x64xf32>, vector<64x8xf32>, vector<128x8xf32> -> vector<128x8xf32>
    %177 = vector.broadcast %170 : vector<128x1xf32> to vector<128x8xf32>
    %178 = arith.addf %177, %176 : vector<128x8xf32>
    %c1_117 = arith.constant 1 : index
    %c0_118 = arith.constant 0 : index
    %c0_119 = arith.constant 0 : index
    %179 = vector.load %arg16[%c1_117, %c0_118, %c0_119] : memref<3x16x8xf32, #tpu.memory_space<vmem>>, vector<1x16x8xf32>
    %180 = vector.shape_cast %179 : vector<1x16x8xf32> to vector<16x8xf32>
    %cst_120 = arith.constant dense<0.000000e+00> : vector<64x8xf32>
    %181 = tpu.matmul %169, %180, %cst_120 {dimension_numbers = #tpu.dot_dimension_numbers<[1], [0], [0], [1], [0, 0, 1, 1], [], []>} : vector<64x16xf32>, vector<16x8xf32>, vector<64x8xf32> -> vector<64x8xf32>
    %c1_121 = arith.constant 1 : index
    %c0_122 = arith.constant 0 : index
    %c0_123 = arith.constant 0 : index
    %182 = vector.load %arg17[%c1_121, %c0_122, %c0_123] : memref<3x128x64xf32, #tpu.memory_space<vmem>>, vector<1x128x64xf32>
    %183 = vector.shape_cast %182 : vector<1x128x64xf32> to vector<128x64xf32>
    %cst_124 = arith.constant dense<0.000000e+00> : vector<128x8xf32>
    %184 = tpu.matmul %183, %181, %cst_124 {dimension_numbers = #tpu.dot_dimension_numbers<[1], [0], [0], [1], [0, 0, 1, 1], [], []>} : vector<128x64xf32>, vector<64x8xf32>, vector<128x8xf32> -> vector<128x8xf32>
    %185 = arith.addf %178, %184 : vector<128x8xf32>
    %c2_125 = arith.constant 2 : index
    %c0_126 = arith.constant 0 : index
    %c0_127 = arith.constant 0 : index
    %186 = vector.load %arg16[%c2_125, %c0_126, %c0_127] : memref<3x16x8xf32, #tpu.memory_space<vmem>>, vector<1x16x8xf32>
    %187 = vector.shape_cast %186 : vector<1x16x8xf32> to vector<16x8xf32>
    %cst_128 = arith.constant dense<0.000000e+00> : vector<64x8xf32>
    %188 = tpu.matmul %169, %187, %cst_128 {dimension_numbers = #tpu.dot_dimension_numbers<[1], [0], [0], [1], [0, 0, 1, 1], [], []>} : vector<64x16xf32>, vector<16x8xf32>, vector<64x8xf32> -> vector<64x8xf32>
    %c2_129 = arith.constant 2 : index
    %c0_130 = arith.constant 0 : index
    %c0_131 = arith.constant 0 : index
    %189 = vector.load %arg17[%c2_129, %c0_130, %c0_131] : memref<3x128x64xf32, #tpu.memory_space<vmem>>, vector<1x128x64xf32>
    %190 = vector.shape_cast %189 : vector<1x128x64xf32> to vector<128x64xf32>
    %cst_132 = arith.constant dense<0.000000e+00> : vector<128x8xf32>
    %191 = tpu.matmul %190, %188, %cst_132 {dimension_numbers = #tpu.dot_dimension_numbers<[1], [0], [0], [1], [0, 0, 1, 1], [], []>} : vector<128x64xf32>, vector<64x8xf32>, vector<128x8xf32> -> vector<128x8xf32>
    %192 = arith.addf %185, %191 : vector<128x8xf32>
    %cst_133 = arith.constant 0.000000e+00 : f32
    %193 = vector.broadcast %cst_133 : f32 to vector<128x8xf32>
    %194 = arith.cmpf oge, %192, %193 : vector<128x8xf32>
    %cst_134 = arith.constant 0.00999999977 : f32
    %195 = vector.broadcast %cst_134 : f32 to vector<128x8xf32>
    %196 = arith.mulf %195, %192 : vector<128x8xf32>
    %197 = arith.select %194, %192, %196 : vector<128x8xi1>, vector<128x8xf32>
    %c0_135 = arith.constant 0 : index
    %c0_136 = arith.constant 0 : index
    %198 = vector.load %arg19[%c0_135, %c0_136] : memref<8x8xf32, #tpu.memory_space<vmem>>, vector<8x8xf32>
    %cst_137 = arith.constant dense<0.000000e+00> : vector<128x8xf32>
    %199 = tpu.matmul %197, %198, %cst_137 {dimension_numbers = #tpu.dot_dimension_numbers<[1], [0], [0], [1], [0, 0, 1, 1], [], []>} : vector<128x8xf32>, vector<8x8xf32>, vector<128x8xf32> -> vector<128x8xf32>
    %c0_138 = arith.constant 0 : index
    %c0_139 = arith.constant 0 : index
    %200 = vector.load %arg21[%c0_138, %c0_139] : memref<1x32xf32, #tpu.memory_space<vmem>>, vector<1x32xf32>
    %201 = vector.extract_strided_slice %199 {offsets = [0, 0], sizes = [128, 1], strides = [1, 1]} : vector<128x8xf32> to vector<128x1xf32>
    %c0_140 = arith.constant 0 : index
    %c0_141 = arith.constant 0 : index
    %c0_142 = arith.constant 0 : index
    %202 = vector.load %arg20[%c0_140, %c0_141, %c0_142] : memref<8x128x32xf32, #tpu.memory_space<vmem>>, vector<1x128x32xf32>
    %203 = vector.shape_cast %202 : vector<1x128x32xf32> to vector<128x32xf32>
    %204 = vector.broadcast %201 : vector<128x1xf32> to vector<128x32xf32>
    %205 = arith.mulf %204, %203 : vector<128x32xf32>
    %cst_143 = arith.constant dense<0.000000e+00> : vector<32xf32>
    %206 = vector.multi_reduction <add>, %205, %cst_143 [0] : vector<128x32xf32> to vector<32xf32>
    %207 = vector.shape_cast %206 : vector<32xf32> to vector<1x32xf32>
    %208 = arith.addf %200, %207 : vector<1x32xf32>
    %209 = vector.extract_strided_slice %199 {offsets = [0, 1], sizes = [128, 1], strides = [1, 1]} : vector<128x8xf32> to vector<128x1xf32>
    %c1_144 = arith.constant 1 : index
    %c0_145 = arith.constant 0 : index
    %c0_146 = arith.constant 0 : index
    %210 = vector.load %arg20[%c1_144, %c0_145, %c0_146] : memref<8x128x32xf32, #tpu.memory_space<vmem>>, vector<1x128x32xf32>
    %211 = vector.shape_cast %210 : vector<1x128x32xf32> to vector<128x32xf32>
    %212 = vector.broadcast %209 : vector<128x1xf32> to vector<128x32xf32>
    %213 = arith.mulf %212, %211 : vector<128x32xf32>
    %cst_147 = arith.constant dense<0.000000e+00> : vector<32xf32>
    %214 = vector.multi_reduction <add>, %213, %cst_147 [0] : vector<128x32xf32> to vector<32xf32>
    %215 = vector.shape_cast %214 : vector<32xf32> to vector<1x32xf32>
    %216 = arith.addf %208, %215 : vector<1x32xf32>
    %217 = vector.extract_strided_slice %199 {offsets = [0, 2], sizes = [128, 1], strides = [1, 1]} : vector<128x8xf32> to vector<128x1xf32>
    %c2_148 = arith.constant 2 : index
    %c0_149 = arith.constant 0 : index
    %c0_150 = arith.constant 0 : index
    %218 = vector.load %arg20[%c2_148, %c0_149, %c0_150] : memref<8x128x32xf32, #tpu.memory_space<vmem>>, vector<1x128x32xf32>
    %219 = vector.shape_cast %218 : vector<1x128x32xf32> to vector<128x32xf32>
    %220 = vector.broadcast %217 : vector<128x1xf32> to vector<128x32xf32>
    %221 = arith.mulf %220, %219 : vector<128x32xf32>
    %cst_151 = arith.constant dense<0.000000e+00> : vector<32xf32>
    %222 = vector.multi_reduction <add>, %221, %cst_151 [0] : vector<128x32xf32> to vector<32xf32>
    %223 = vector.shape_cast %222 : vector<32xf32> to vector<1x32xf32>
    %224 = arith.addf %216, %223 : vector<1x32xf32>
    %225 = vector.extract_strided_slice %199 {offsets = [0, 3], sizes = [128, 1], strides = [1, 1]} : vector<128x8xf32> to vector<128x1xf32>
    %c3 = arith.constant 3 : index
    %c0_152 = arith.constant 0 : index
    %c0_153 = arith.constant 0 : index
    %226 = vector.load %arg20[%c3, %c0_152, %c0_153] : memref<8x128x32xf32, #tpu.memory_space<vmem>>, vector<1x128x32xf32>
    %227 = vector.shape_cast %226 : vector<1x128x32xf32> to vector<128x32xf32>
    %228 = vector.broadcast %225 : vector<128x1xf32> to vector<128x32xf32>
    %229 = arith.mulf %228, %227 : vector<128x32xf32>
    %cst_154 = arith.constant dense<0.000000e+00> : vector<32xf32>
    %230 = vector.multi_reduction <add>, %229, %cst_154 [0] : vector<128x32xf32> to vector<32xf32>
    %231 = vector.shape_cast %230 : vector<32xf32> to vector<1x32xf32>
    %232 = arith.addf %224, %231 : vector<1x32xf32>
    %233 = vector.extract_strided_slice %199 {offsets = [0, 4], sizes = [128, 1], strides = [1, 1]} : vector<128x8xf32> to vector<128x1xf32>
    %c4 = arith.constant 4 : index
    %c0_155 = arith.constant 0 : index
    %c0_156 = arith.constant 0 : index
    %234 = vector.load %arg20[%c4, %c0_155, %c0_156] : memref<8x128x32xf32, #tpu.memory_space<vmem>>, vector<1x128x32xf32>
    %235 = vector.shape_cast %234 : vector<1x128x32xf32> to vector<128x32xf32>
    %236 = vector.broadcast %233 : vector<128x1xf32> to vector<128x32xf32>
    %237 = arith.mulf %236, %235 : vector<128x32xf32>
    %cst_157 = arith.constant dense<0.000000e+00> : vector<32xf32>
    %238 = vector.multi_reduction <add>, %237, %cst_157 [0] : vector<128x32xf32> to vector<32xf32>
    %239 = vector.shape_cast %238 : vector<32xf32> to vector<1x32xf32>
    %240 = arith.addf %232, %239 : vector<1x32xf32>
    %241 = vector.extract_strided_slice %199 {offsets = [0, 5], sizes = [128, 1], strides = [1, 1]} : vector<128x8xf32> to vector<128x1xf32>
    %c5 = arith.constant 5 : index
    %c0_158 = arith.constant 0 : index
    %c0_159 = arith.constant 0 : index
    %242 = vector.load %arg20[%c5, %c0_158, %c0_159] : memref<8x128x32xf32, #tpu.memory_space<vmem>>, vector<1x128x32xf32>
    %243 = vector.shape_cast %242 : vector<1x128x32xf32> to vector<128x32xf32>
    %244 = vector.broadcast %241 : vector<128x1xf32> to vector<128x32xf32>
    %245 = arith.mulf %244, %243 : vector<128x32xf32>
    %cst_160 = arith.constant dense<0.000000e+00> : vector<32xf32>
    %246 = vector.multi_reduction <add>, %245, %cst_160 [0] : vector<128x32xf32> to vector<32xf32>
    %247 = vector.shape_cast %246 : vector<32xf32> to vector<1x32xf32>
    %248 = arith.addf %240, %247 : vector<1x32xf32>
    %249 = vector.extract_strided_slice %199 {offsets = [0, 6], sizes = [128, 1], strides = [1, 1]} : vector<128x8xf32> to vector<128x1xf32>
    %c6 = arith.constant 6 : index
    %c0_161 = arith.constant 0 : index
    %c0_162 = arith.constant 0 : index
    %250 = vector.load %arg20[%c6, %c0_161, %c0_162] : memref<8x128x32xf32, #tpu.memory_space<vmem>>, vector<1x128x32xf32>
    %251 = vector.shape_cast %250 : vector<1x128x32xf32> to vector<128x32xf32>
    %252 = vector.broadcast %249 : vector<128x1xf32> to vector<128x32xf32>
    %253 = arith.mulf %252, %251 : vector<128x32xf32>
    %cst_163 = arith.constant dense<0.000000e+00> : vector<32xf32>
    %254 = vector.multi_reduction <add>, %253, %cst_163 [0] : vector<128x32xf32> to vector<32xf32>
    %255 = vector.shape_cast %254 : vector<32xf32> to vector<1x32xf32>
    %256 = arith.addf %248, %255 : vector<1x32xf32>
    %257 = vector.extract_strided_slice %199 {offsets = [0, 7], sizes = [128, 1], strides = [1, 1]} : vector<128x8xf32> to vector<128x1xf32>
    %c7 = arith.constant 7 : index
    %c0_164 = arith.constant 0 : index
    %c0_165 = arith.constant 0 : index
    %258 = vector.load %arg20[%c7, %c0_164, %c0_165] : memref<8x128x32xf32, #tpu.memory_space<vmem>>, vector<1x128x32xf32>
    %259 = vector.shape_cast %258 : vector<1x128x32xf32> to vector<128x32xf32>
    %260 = vector.broadcast %257 : vector<128x1xf32> to vector<128x32xf32>
    %261 = arith.mulf %260, %259 : vector<128x32xf32>
    %cst_166 = arith.constant dense<0.000000e+00> : vector<32xf32>
    %262 = vector.multi_reduction <add>, %261, %cst_166 [0] : vector<128x32xf32> to vector<32xf32>
    %263 = vector.shape_cast %262 : vector<32xf32> to vector<1x32xf32>
    %264 = arith.addf %256, %263 : vector<1x32xf32>
    %c0_167 = arith.constant 0 : index
    %c0_168 = arith.constant 0 : index
    %265 = vector.load %arg24[%c0_167, %c0_168] : memref<1x64xf32, #tpu.memory_space<vmem>>, vector<1x64xf32>
    %c0_169 = arith.constant 0 : index
    %c0_170 = arith.constant 0 : index
    %266 = vector.load %arg23[%c0_169, %c0_170] : memref<32x64xf32, #tpu.memory_space<vmem>>, vector<32x64xf32>
    %cst_171 = arith.constant dense<0.000000e+00> : vector<1x64xf32>
    %267 = tpu.matmul %264, %266, %cst_171 {dimension_numbers = #tpu.dot_dimension_numbers<[1], [0], [0], [1], [0, 0, 1, 1], [], []>} : vector<1x32xf32>, vector<32x64xf32>, vector<1x64xf32> -> vector<1x64xf32>
    %268 = arith.addf %265, %267 : vector<1x64xf32>
    %c0_172 = arith.constant 0 : index
    %c0_173 = arith.constant 0 : index
    %c0_174 = arith.constant 0 : index
    %269 = vector.load %arg22[%c0_172, %c0_173, %c0_174] : memref<3x64x64xf32, #tpu.memory_space<vmem>>, vector<1x64x64xf32>
    %270 = vector.shape_cast %269 : vector<1x64x64xf32> to vector<64x64xf32>
    %cst_175 = arith.constant dense<0.000000e+00> : vector<1x64xf32>
    %271 = tpu.matmul %74, %270, %cst_175 {dimension_numbers = #tpu.dot_dimension_numbers<[1], [0], [0], [1], [0, 0, 1, 1], [], []>} : vector<1x64xf32>, vector<64x64xf32>, vector<1x64xf32> -> vector<1x64xf32>
    %272 = arith.addf %268, %271 : vector<1x64xf32>
    %c1_176 = arith.constant 1 : index
    %c0_177 = arith.constant 0 : index
    %c0_178 = arith.constant 0 : index
    %273 = vector.load %arg22[%c1_176, %c0_177, %c0_178] : memref<3x64x64xf32, #tpu.memory_space<vmem>>, vector<1x64x64xf32>
    %274 = vector.shape_cast %273 : vector<1x64x64xf32> to vector<64x64xf32>
    %cst_179 = arith.constant dense<0.000000e+00> : vector<1x64xf32>
    %275 = tpu.matmul %93, %274, %cst_179 {dimension_numbers = #tpu.dot_dimension_numbers<[1], [0], [0], [1], [0, 0, 1, 1], [], []>} : vector<1x64xf32>, vector<64x64xf32>, vector<1x64xf32> -> vector<1x64xf32>
    %276 = arith.addf %272, %275 : vector<1x64xf32>
    %c2_180 = arith.constant 2 : index
    %c0_181 = arith.constant 0 : index
    %c0_182 = arith.constant 0 : index
    %277 = vector.load %arg22[%c2_180, %c0_181, %c0_182] : memref<3x64x64xf32, #tpu.memory_space<vmem>>, vector<1x64x64xf32>
    %278 = vector.shape_cast %277 : vector<1x64x64xf32> to vector<64x64xf32>
    %cst_183 = arith.constant dense<0.000000e+00> : vector<1x64xf32>
    %279 = tpu.matmul %112, %278, %cst_183 {dimension_numbers = #tpu.dot_dimension_numbers<[1], [0], [0], [1], [0, 0, 1, 1], [], []>} : vector<1x64xf32>, vector<64x64xf32>, vector<1x64xf32> -> vector<1x64xf32>
    %280 = arith.addf %276, %279 : vector<1x64xf32>
    %c0_184 = arith.constant 0 : index
    %c0_185 = arith.constant 0 : index
    %281 = vector.load %arg25[%c0_184, %c0_185] : memref<1x64xf32, #tpu.memory_space<vmem>>, vector<1x64xf32>
    %c0_186 = arith.constant 0 : index
    %c0_187 = arith.constant 0 : index
    %282 = vector.load %arg26[%c0_186, %c0_187] : memref<1x64xf32, #tpu.memory_space<vmem>>, vector<1x64xf32>
    %cst_188 = arith.constant dense<0.000000e+00> : vector<1xf32>
    %283 = vector.multi_reduction <add>, %280, %cst_188 [1] : vector<1x64xf32> to vector<1xf32>
    %284 = vector.shape_cast %283 : vector<1xf32> to vector<1x1xf32>
    %cst_189 = arith.constant 6.400000e+01 : f32
    %285 = vector.broadcast %cst_189 : f32 to vector<1x1xf32>
    %286 = arith.divf %284, %285 : vector<1x1xf32>
    %287 = vector.broadcast %286 : vector<1x1xf32> to vector<1x64xf32>
    %288 = arith.subf %280, %287 : vector<1x64xf32>
    %289 = arith.mulf %288, %288 : vector<1x64xf32>
    %cst_190 = arith.constant dense<0.000000e+00> : vector<1xf32>
    %290 = vector.multi_reduction <add>, %289, %cst_190 [1] : vector<1x64xf32> to vector<1xf32>
    %291 = vector.shape_cast %290 : vector<1xf32> to vector<1x1xf32>
    %cst_191 = arith.constant 6.400000e+01 : f32
    %292 = vector.broadcast %cst_191 : f32 to vector<1x1xf32>
    %293 = arith.divf %291, %292 : vector<1x1xf32>
    %294 = vector.broadcast %286 : vector<1x1xf32> to vector<1x64xf32>
    %295 = arith.subf %280, %294 : vector<1x64xf32>
    %cst_192 = arith.constant 9.99999974E-6 : f32
    %296 = vector.broadcast %cst_192 : f32 to vector<1x1xf32>
    %297 = arith.addf %293, %296 : vector<1x1xf32>
    %298 = math.rsqrt %297 : vector<1x1xf32>
    %299 = vector.broadcast %298 : vector<1x1xf32> to vector<1x64xf32>
    %300 = arith.mulf %295, %299 : vector<1x64xf32>
    %301 = arith.mulf %300, %281 : vector<1x64xf32>
    %302 = arith.addf %301, %282 : vector<1x64xf32>
    %cst_193 = arith.constant 5.000000e-01 : f32
    %303 = vector.broadcast %cst_193 : f32 to vector<1x64xf32>
    %304 = arith.mulf %303, %302 : vector<1x64xf32>
    %cst_194 = arith.constant 0.707106769 : f32
    %305 = vector.broadcast %cst_194 : f32 to vector<1x64xf32>
    %306 = arith.mulf %302, %305 : vector<1x64xf32>
    %cst_195 = arith.constant 0.000000e+00 : f32
    %307 = vector.broadcast %cst_195 : f32 to vector<1x64xf32>
    %308 = arith.cmpf oge, %306, %307 : vector<1x64xf32>
    %cst_196 = arith.constant 1.000000e+00 : f32
    %cst_197 = arith.constant -1.000000e+00 : f32
    %309 = vector.broadcast %cst_196 : f32 to vector<1x64xf32>
    %310 = vector.broadcast %cst_197 : f32 to vector<1x64xf32>
    %311 = arith.select %308, %309, %310 : vector<1x64xi1>, vector<1x64xf32>
    %312 = math.absf %306 : vector<1x64xf32>
    %cst_198 = arith.constant 0.327591091 : f32
    %313 = vector.broadcast %cst_198 : f32 to vector<1x64xf32>
    %314 = arith.mulf %313, %312 : vector<1x64xf32>
    %cst_199 = arith.constant 1.000000e+00 : f32
    %315 = vector.broadcast %cst_199 : f32 to vector<1x64xf32>
    %316 = arith.addf %315, %314 : vector<1x64xf32>
    %317 = tpu.reciprocal %316 {approx = true} : vector<1x64xf32> -> vector<1x64xf32>
    %cst_200 = arith.constant 1.06140542 : f32
    %318 = vector.broadcast %cst_200 : f32 to vector<1x64xf32>
    %319 = arith.mulf %318, %317 : vector<1x64xf32>
    %cst_201 = arith.constant -1.45315206 : f32
    %320 = vector.broadcast %cst_201 : f32 to vector<1x64xf32>
    %321 = arith.addf %319, %320 : vector<1x64xf32>
    %322 = arith.mulf %321, %317 : vector<1x64xf32>
    %cst_202 = arith.constant 1.42141378 : f32
    %323 = vector.broadcast %cst_202 : f32 to vector<1x64xf32>
    %324 = arith.addf %322, %323 : vector<1x64xf32>
    %325 = arith.mulf %324, %317 : vector<1x64xf32>
    %cst_203 = arith.constant -0.284496725 : f32
    %326 = vector.broadcast %cst_203 : f32 to vector<1x64xf32>
    %327 = arith.addf %325, %326 : vector<1x64xf32>
    %328 = arith.mulf %327, %317 : vector<1x64xf32>
    %cst_204 = arith.constant 0.254829586 : f32
    %329 = vector.broadcast %cst_204 : f32 to vector<1x64xf32>
    %330 = arith.addf %328, %329 : vector<1x64xf32>
    %331 = arith.mulf %330, %317 : vector<1x64xf32>
    %cst_205 = arith.constant 0.000000e+00 : f32
    %332 = vector.broadcast %cst_205 : f32 to vector<1x64xf32>
    %333 = arith.subf %332, %312 : vector<1x64xf32>
    %334 = arith.mulf %333, %312 : vector<1x64xf32>
    %335 = math.exp %334 : vector<1x64xf32>
    %336 = arith.mulf %331, %335 : vector<1x64xf32>
    %cst_206 = arith.constant 1.000000e+00 : f32
    %337 = vector.broadcast %cst_206 : f32 to vector<1x64xf32>
    %338 = arith.subf %337, %336 : vector<1x64xf32>
    %339 = arith.mulf %311, %338 : vector<1x64xf32>
    %cst_207 = arith.constant 1.000000e+00 : f32
    %340 = vector.broadcast %cst_207 : f32 to vector<1x64xf32>
    %341 = arith.addf %340, %339 : vector<1x64xf32>
    %342 = arith.mulf %304, %341 : vector<1x64xf32>
    %c0_208 = arith.constant 0 : index
    %c0_209 = arith.constant 0 : index
    %343 = vector.load %arg27[%c0_208, %c0_209] : memref<64x32xf32, #tpu.memory_space<vmem>>, vector<64x32xf32>
    %cst_210 = arith.constant dense<0.000000e+00> : vector<1x32xf32>
    %344 = tpu.matmul %342, %343, %cst_210 {dimension_numbers = #tpu.dot_dimension_numbers<[1], [0], [0], [1], [0, 0, 1, 1], [], []>} : vector<1x64xf32>, vector<64x32xf32>, vector<1x32xf32> -> vector<1x32xf32>
    %c0_211 = arith.constant 0 : index
    %c0_212 = arith.constant 0 : index
    %345 = vector.load %arg28[%c0_211, %c0_212] : memref<1x32xf32, #tpu.memory_space<vmem>>, vector<1x32xf32>
    %346 = arith.addf %344, %345 : vector<1x32xf32>
    %c0_213 = arith.constant 0 : index
    %c0_214 = arith.constant 0 : index
    %c0_215 = arith.constant 0 : index
    %347 = vector.load %arg29[%c0_213, %c0_214, %c0_215] : memref<1x1x32xf32, #tpu.memory_space<vmem>>, vector<1x1x32xf32>
    %348 = vector.shape_cast %347 : vector<1x1x32xf32> to vector<1x32xf32>
    %349 = vector.shape_cast %346 : vector<1x32xf32> to vector<1x1x32xf32>
    tpu.vector_store %arg29[%c0_213, %c0_214, %c0_215], %349 {strides = array<i32>} : memref<1x1x32xf32, #tpu.memory_space<vmem>>, vector<1x1x32xf32>,
    return
  }
  func.func @transform_0(%arg0: i32) -> (i32, i32, i32) {
    %c0_i32 = arith.constant 0 : i32
    %c0_i32_0 = arith.constant 0 : i32
    %c0_i32_1 = arith.constant 0 : i32
    return %arg0, %c0_i32, %c0_i32_0 : i32, i32, i32
  }
  func.func @transform_1(%arg0: i32) -> (i32, i32, i32) {
    %c0_i32 = arith.constant 0 : i32
    %c0_i32_0 = arith.constant 0 : i32
    %c0_i32_1 = arith.constant 0 : i32
    return %arg0, %c0_i32, %c0_i32_0 : i32, i32, i32
  }
  func.func @transform_2(%arg0: i32) -> (i32, i32) {
    %c0_i32 = arith.constant 0 : i32
    %c0_i32_0 = arith.constant 0 : i32
    %c0_i32_1 = arith.constant 0 : i32
    return %c0_i32, %c0_i32_0 : i32, i32
  }
  func.func @transform_3(%arg0: i32) -> (i32, i32) {
    %c0_i32 = arith.constant 0 : i32
    %c0_i32_0 = arith.constant 0 : i32
    %c0_i32_1 = arith.constant 0 : i32
    return %c0_i32, %c0_i32_0 : i32, i32
  }
  func.func @transform_4(%arg0: i32) -> (i32, i32) {
    %c0_i32 = arith.constant 0 : i32
    %c0_i32_0 = arith.constant 0 : i32
    %c0_i32_1 = arith.constant 0 : i32
    return %c0_i32, %c0_i32_0 : i32, i32
  }
  func.func @transform_5(%arg0: i32) -> (i32, i32) {
    %c0_i32 = arith.constant 0 : i32
    %c0_i32_0 = arith.constant 0 : i32
    %c0_i32_1 = arith.constant 0 : i32
    return %c0_i32, %c0_i32_0 : i32, i32
  }
  func.func @transform_6(%arg0: i32) -> (i32, i32) {
    %c0_i32 = arith.constant 0 : i32
    %c0_i32_0 = arith.constant 0 : i32
    %c0_i32_1 = arith.constant 0 : i32
    return %c0_i32, %c0_i32_0 : i32, i32
  }
  func.func @transform_7(%arg0: i32) -> (i32, i32, i32) {
    %c0_i32 = arith.constant 0 : i32
    %c0_i32_0 = arith.constant 0 : i32
    %c0_i32_1 = arith.constant 0 : i32
    %c0_i32_2 = arith.constant 0 : i32
    return %c0_i32, %c0_i32_0, %c0_i32_1 : i32, i32, i32
  }
  func.func @transform_8(%arg0: i32) -> (i32, i32, i32) {
    %c0_i32 = arith.constant 0 : i32
    %c0_i32_0 = arith.constant 0 : i32
    %c0_i32_1 = arith.constant 0 : i32
    %c0_i32_2 = arith.constant 0 : i32
    return %c0_i32, %c0_i32_0, %c0_i32_1 : i32, i32, i32
  }
  func.func @transform_9(%arg0: i32) -> (i32, i32, i32) {
    %c0_i32 = arith.constant 0 : i32
    %c0_i32_0 = arith.constant 0 : i32
    %c0_i32_1 = arith.constant 0 : i32
    %c0_i32_2 = arith.constant 0 : i32
    return %c0_i32, %c0_i32_0, %c0_i32_1 : i32, i32, i32
  }
  func.func @transform_10(%arg0: i32) -> (i32, i32, i32) {
    %c0_i32 = arith.constant 0 : i32
    %c0_i32_0 = arith.constant 0 : i32
    %c0_i32_1 = arith.constant 0 : i32
    %c0_i32_2 = arith.constant 0 : i32
    return %c0_i32, %c0_i32_0, %c0_i32_1 : i32, i32, i32
  }
  func.func @transform_11(%arg0: i32) -> (i32, i32) {
    %c0_i32 = arith.constant 0 : i32
    %c0_i32_0 = arith.constant 0 : i32
    %c0_i32_1 = arith.constant 0 : i32
    return %c0_i32, %c0_i32_0 : i32, i32
  }
  func.func @transform_12(%arg0: i32) -> (i32, i32, i32) {
    %c0_i32 = arith.constant 0 : i32
    %c0_i32_0 = arith.constant 0 : i32
    %c0_i32_1 = arith.constant 0 : i32
    %c0_i32_2 = arith.constant 0 : i32
    return %c0_i32, %c0_i32_0, %c0_i32_1 : i32, i32, i32
  }
  func.func @transform_13(%arg0: i32) -> (i32, i32, i32) {
    %c0_i32 = arith.constant 0 : i32
    %c0_i32_0 = arith.constant 0 : i32
    %c0_i32_1 = arith.constant 0 : i32
    %c0_i32_2 = arith.constant 0 : i32
    return %c0_i32, %c0_i32_0, %c0_i32_1 : i32, i32, i32
  }
  func.func @transform_14(%arg0: i32) -> (i32, i32) {
    %c0_i32 = arith.constant 0 : i32
    %c0_i32_0 = arith.constant 0 : i32
    %c0_i32_1 = arith.constant 0 : i32
    return %c0_i32, %c0_i32_0 : i32, i32
  }
  func.func @transform_15(%arg0: i32) -> (i32, i32, i32) {
    %c0_i32 = arith.constant 0 : i32
    %c0_i32_0 = arith.constant 0 : i32
    %c0_i32_1 = arith.constant 0 : i32
    %c0_i32_2 = arith.constant 0 : i32
    return %c0_i32, %c0_i32_0, %c0_i32_1 : i32, i32, i32
  }
  func.func @transform_16(%arg0: i32) -> (i32, i32, i32) {
    %c0_i32 = arith.constant 0 : i32
    %c0_i32_0 = arith.constant 0 : i32
    %c0_i32_1 = arith.constant 0 : i32
    %c0_i32_2 = arith.constant 0 : i32
    return %c0_i32, %c0_i32_0, %c0_i32_1 : i32, i32, i32
  }
  func.func @transform_17(%arg0: i32) -> (i32, i32) {
    %c0_i32 = arith.constant 0 : i32
    %c0_i32_0 = arith.constant 0 : i32
    %c0_i32_1 = arith.constant 0 : i32
    return %c0_i32, %c0_i32_0 : i32, i32
  }
  func.func @transform_18(%arg0: i32) -> (i32, i32) {
    %c0_i32 = arith.constant 0 : i32
    %c0_i32_0 = arith.constant 0 : i32
    %c0_i32_1 = arith.constant 0 : i32
    return %c0_i32, %c0_i32_0 : i32, i32
  }
  func.func @transform_19(%arg0: i32) -> (i32, i32, i32) {
    %c0_i32 = arith.constant 0 : i32
    %c0_i32_0 = arith.constant 0 : i32
    %c0_i32_1 = arith.constant 0 : i32
    %c0_i32_2 = arith.constant 0 : i32
    return %c0_i32, %c0_i32_0, %c0_i32_1 : i32, i32, i32
  }
  func.func @transform_20(%arg0: i32) -> (i32, i32) {
    %c0_i32 = arith.constant 0 : i32
    %c0_i32_0 = arith.constant 0 : i32
    %c0_i32_1 = arith.constant 0 : i32
    return %c0_i32, %c0_i32_0 : i32, i32
  }
  func.func @transform_21(%arg0: i32) -> (i32, i32, i32) {
    %c0_i32 = arith.constant 0 : i32
    %c0_i32_0 = arith.constant 0 : i32
    %c0_i32_1 = arith.constant 0 : i32
    %c0_i32_2 = arith.constant 0 : i32
    return %c0_i32, %c0_i32_0, %c0_i32_1 : i32, i32, i32
  }
  func.func @transform_22(%arg0: i32) -> (i32, i32) {
    %c0_i32 = arith.constant 0 : i32
    %c0_i32_0 = arith.constant 0 : i32
    %c0_i32_1 = arith.constant 0 : i32
    return %c0_i32, %c0_i32_0 : i32, i32
  }
  func.func @transform_23(%arg0: i32) -> (i32, i32) {
    %c0_i32 = arith.constant 0 : i32
    %c0_i32_0 = arith.constant 0 : i32
    %c0_i32_1 = arith.constant 0 : i32
    return %c0_i32, %c0_i32_0 : i32, i32
  }
  func.func @transform_24(%arg0: i32) -> (i32, i32) {
    %c0_i32 = arith.constant 0 : i32
    %c0_i32_0 = arith.constant 0 : i32
    %c0_i32_1 = arith.constant 0 : i32
    return %c0_i32, %c0_i32_0 : i32, i32
  }
  func.func @transform_25(%arg0: i32) -> (i32, i32) {
    %c0_i32 = arith.constant 0 : i32
    %c0_i32_0 = arith.constant 0 : i32
    %c0_i32_1 = arith.constant 0 : i32
    return %c0_i32, %c0_i32_0 : i32, i32
  }
  func.func @transform_26(%arg0: i32) -> (i32, i32) {
    %c0_i32 = arith.constant 0 : i32
    %c0_i32_0 = arith.constant 0 : i32
    %c0_i32_1 = arith.constant 0 : i32
    return %c0_i32, %c0_i32_0 : i32, i32
  }
  func.func @transform_27(%arg0: i32) -> (i32, i32) {
    %c0_i32 = arith.constant 0 : i32
    %c0_i32_0 = arith.constant 0 : i32
    %c0_i32_1 = arith.constant 0 : i32
    return %c0_i32, %c0_i32_0 : i32, i32
  }
  func.func @transform_28(%arg0: i32) -> (i32, i32, i32) {
    %c0_i32 = arith.constant 0 : i32
    %c0_i32_0 = arith.constant 0 : i32
    %c0_i32_1 = arith.constant 0 : i32
    return %arg0, %c0_i32, %c0_i32_0 : i32, i32, i32
  }
}

</mosaic_0001>

<bundles_post_ra>
// kernel: tpu_custom_call.1
= control target key start
LH: loop header
LB: loop body
LE: loop exit
PB: predicated region body
PF: predicated region fallthrough
CT: control target
= control target key end

     0   :  { %s7256_s0 = inlined_call_operand.vmem [shape: f32[2,32,1], index: 0, kind: input, shape index: {}]   ;;  %s7257_s1 = inlined_call_operand.vmem [shape: f32[2,32,3], index: 1, kind: input, shape index: {}]   ;;  %s7258_s2 = inlined_call_operand.vmem [shape: f32[1,128], index: 2, kind: input, shape index: {}]   ;;  %s7259_s3 = inlined_call_operand.vmem [shape: f32[3,128], index: 3, kind: input, shape index: {}]   ;;  %s7260_s4 = inlined_call_operand.vmem [shape: f32[1,128], index: 4, kind: input, shape index: {}]   ;;  %s7261_s5 = inlined_call_operand.vmem [shape: f32[1,128], index: 5, kind: input, shape index: {}]   ;;  %s7262_s6 = inlined_call_operand.vmem [shape: f32[1,128], index: 6, kind: input, shape index: {}]   ;;  %s7263_s7 = inlined_call_operand.vmem [shape: f32[3,128,64], index: 7, kind: input, shape index: {}]   ;;  %s7264_s8 = inlined_call_operand.vmem [shape: f32[3,1,64], index: 8, kind: input, shape index: {}]   ;;  %s7265_s9 = inlined_call_operand.vmem [shape: f32[3,64,32], index: 9, kind: input, shape index: {}]   ;;  %s7266_s10 = inlined_call_operand.vmem [shape: f32[3,32,3], index: 10, kind: input, shape index: {}]   ;;  %s7267_s11 = inlined_call_operand.vmem [shape: f32[32,1], index: 11, kind: input, shape index: {}]   ;;  %s7268_s12 = inlined_call_operand.vmem [shape: f32[3,32,16], index: 12, kind: input, shape index: {}]   ;;  %s7269_s13 = inlined_call_operand.vmem [shape: f32[3,64,32], index: 13, kind: input, shape index: {}]   ;;  %s7270_s14 = inlined_call_operand.vmem [shape: f32[64,1], index: 14, kind: input, shape index: {}]   ;;  %s7271_s15 = inlined_call_operand.vmem [shape: f32[3,16,8], index: 15, kind: input, shape index: {}]   ;;  %s7272_s16 = inlined_call_operand.vmem [shape: f32[3,128,64], index: 16, kind: input, shape index: {}]   ;;  %s7273_s17 = inlined_call_operand.vmem [shape: f32[128,1], index: 17, kind: input, shape index: {}]   ;;  %s7274_s18 = inlined_call_operand.vmem [shape: f32[8,8], index: 18, kind: input, shape index: {}]   ;;  %s7275_s19 = inlined_call_operand.vmem [shape: f32[8,128,32], index: 19, kind: input, shape index: {}]   ;;  %s7276_s20 = inlined_call_operand.vmem [shape: f32[1,32], index: 20, kind: input, shape index: {}]   ;;  %s7277_s21 = inlined_call_operand.vmem [shape: f32[3,64,64], index: 21, kind: input, shape index: {}]   ;;  %s7278_s22 = inlined_call_operand.vmem [shape: f32[32,64], index: 22, kind: input, shape index: {}]   ;;  %s7279_s23 = inlined_call_operand.vmem [shape: f32[1,64], index: 23, kind: input, shape index: {}]   ;;  %s7280_s24 = inlined_call_operand.vmem [shape: f32[1,64], index: 24, kind: input, shape index: {}]   ;;  %s7281_s25 = inlined_call_operand.vmem [shape: f32[1,64], index: 25, kind: input, shape index: {}]   ;;  %s7282_s26 = inlined_call_operand.vmem [shape: f32[64,32], index: 26, kind: input, shape index: {}]   ;;  %s7283_s27 = inlined_call_operand.vmem [shape: f32[1,32], index: 27, kind: input, shape index: {}]   ;;  %s7284_s28 = inlined_call_operand.hbm [shape: f32[2,1,32], index: 28, kind: output, shape index: {}]  }
   0x1   :  { %7304 = sst [smem:[#allocation12_spill]] %s7256_s0 }
   0x2   :  { %7305 = sst [smem:[#allocation13_spill]] %s7257_s1 }
   0x3   :  { %7306 = sst [smem:[#allocation14_spill]] %s7258_s2 }
   0x4   :  { %7307 = sst [smem:[#allocation15_spill]] %s7259_s3 }
   0x5   :  { %7308 = sst [smem:[#allocation16_spill]] %s7260_s4 }
   0x6   :  { %7309 = sst [smem:[#allocation17_spill]] %s7261_s5 }
   0x7   :  { %7310 = sst [smem:[#allocation18_spill]] %s7262_s6 }
   0x8   :  { %7311 = sst [smem:[#allocation19_spill]] %s7263_s7 }
   0x9   :  { %7312 = sst [smem:[#allocation20_spill]] %s7264_s8 }
   0xa   :  { %7313 = sst [smem:[#allocation21_spill]] %s7265_s9 }
   0xb   :  { %7314 = sst [smem:[#allocation22_spill]] %s7266_s10 }
   0xc   :  { %7315 = sst [smem:[#allocation23_spill]] %s7267_s11 }
   0xd   :  { %7316 = sst [smem:[#allocation24_spill]] %s7268_s12 }
   0xe   :  { %7317 = sst [smem:[#allocation25_spill]] %s7269_s13 }
   0xf   :  { %7318 = sst [smem:[#allocation26_spill]] %s7270_s14 }
  0x10   :  { %33 = vsyncpa [#allocation3], 0 }
  0x11   :  { %35 = vsyncpa [#allocation3 + $0x1], 0  ;;  %s5124_s8 = smov 0   ;;  %s5126_s5 = smov 0  }
  0x12   :  { %s5128_s9 = smov 0   ;;  %s5130_s30 = smov 0  }
  0x13 LB: > { %7319 = sst [smem:[#allocation5_spill]] %s4954_s8  ;;  %s5145_s3 = sadd.s32 4294967295, %s4966_s30   ;;  %s4966_s30 = sphi %s5130_s30, %s7352_s30   ;;  %s4962_s9 = sphi %s5128_s9, %s7354_s9   ;;  %s4958_s5 = sphi %s5126_s5, %s7356_s5   ;;  %s4954_s8 = sphi %s5124_s8, %s7355_s8  }
  0x14   : > { %7320 = sst [smem:[#allocation6_spill]] %s4962_s9  ;;  %s4288_s6 = sadd.s32 4294967294, %s4966_s30  }
  0x15   : > { %7321 = sst [smem:[#allocation7_spill]] %s4966_s30  ;;  %s5149_s10 = sadd.s32 1, %s4966_s30  }
  0x16   : > { %7322 = sst [smem:[#allocation8_spill]] %s5149_s10  ;;  %s646_s0 = sadd.s32 1, %s4962_s9 }
  0x17   : > { %s643_s11 = ssub.s32 %s4966_s30, %s5149_s10  ;;  %p656_p0 = scmp.ne.s32.totalorder %s4962_s9, %s4958_s5 }
  0x18   : > { %p644_p1 = scmp.eq.s32.totalorder %s643_s11, 0  ;;  %p657_p2 = scmp.eq.s32.totalorder %s5145_s3, 1 }
  0x19   : > { %p662_p3 = scmp.ne.s32.totalorder %s4958_s5, %s4954_s8  ;;  %p663_p4 = scmp.eq.s32.totalorder %s4288_s6, 1 }
  0x1a   : > { %s5160_s29 = scalar_select %p644_p1, %s4962_s9, %s646_s0  }
  0x1b   : > { %p5162_p5 = por %p657_p2, %p656_p0  ;;  %p5166_p6 = por %p663_p4, %p662_p3 }
  0x1c   : > { %7323 = sst [smem:[#allocation9_spill]] %s5160_s29  ;;  %p4291_p7 = scmp.ge.s32.totalorder %s4966_s30, 1 }
  0x1d   : > { %s7324_s2 = scalar_select %p5162_p5, 1, 0 }
  0x1e   : > { %s7326_s7 = scalar_select %p5166_p6, 1, 0 }
  0x1f   : > { %7325 = sst [smem:[#allocation10_spill]] %s7324_s2  ;;  %p775_p8 = scmp.lt.s32.totalorder %s4966_s30, 3 }
  0x20   : > { %7327 = sst [smem:[#allocation11_spill]] %s7326_s7 }
  0x21   : > { %p776_p9 = pnand %p4291_p7, %p775_p8 }
  0x22   : > { %p853_p10 = scmp.lt.s32.totalorder (!%p776_p9), %s5145_s3, 1  ;;  %s7328_s0 = sld [smem:[#allocation12_spill]] (!%p776_p9) }
  0x23   : > { %779 = sbr.rel (%p776_p9) target bundleno = 3095 (0xc17), region = 132  ;;  %s7329_s10 = sld [smem:[#allocation13_spill]] (!%p776_p9) }
  0x24   : > { %s7330_s29 = sld [smem:[#allocation14_spill]] (!%p776_p9)  ;;  %s851_s30 = sand.u32 (!%p776_p9), 1, %s4958_s5  }
  0x25   : > { %s7335_s14 = sld [smem:[#allocation26_spill]] (!%p776_p9) }
  0x26   : > { %s7338_s9 = sld [smem:[#allocation17_spill]] (!%p776_p9) }
  0x27   : > { %s7347_s13 = sld [smem:[#allocation25_spill]] (!%p776_p9) }
  0x28   : > { %v4968_v0 = vmov 0   ;;  %s854_s12 = scalar_select %p853_p10, %s5145_s3, 1  ;;  %v4969_v8 = vmov 1   ;;  %v4970_v10 = vmov 2   ;;  %vm1254_vm0 = vcmask 23568  }
  0x29   : > { %4744 = vset.pattern.permute.xlu1 %v4968_v0  ;;  %4743 = vset.pattern.permute.xlu0 %v4968_v0  ;;  %vm1108_vm2 = vcmask 7168   ;;  %vm1180_vm7 = vcmask 15368  }
  0x2a   : > { %4745 = vset.pattern.permute.xlu2 %v4968_v0  ;;  %s4691_s1 = sshll.u32 %s854_s12, 5  ;;  %v4882_v16 = vld [vmem:[%s7330_s29] ss:$0 sm:$0xff]  ;;  %s7341_s29 = sld [smem:[#allocation18_spill]] }
  0x2b   : > { %s857_s11 = scalar_lea.vmem %s7328_s0, %s4691_s1  ;;  %s862_s7 = scalar_lea.vmem %s7329_s10, %s4691_s1 }
  0x2c   : > { %v865_v1 = vld [vmem:[%s857_s11 + $0x10] sm:$0xff]  ;;  %v863_v2 = vld [vmem:[%s857_s11] sm:$0xff]  ;;  %v5183_v3 = vld [vmem:[%s862_s7 + $0x8] sm:$0xff]  ;;  %s7331_s1 = sld [smem:[#allocation15_spill]]  ;;  %s4217_s12 = scalar_lea.hbm %s7284_s28, %s5145_s3 }
  0x2d   : > { %885 = vperm.xlu1 %4744, %v865_v1   ;;  %875 = vperm.xlu0 %4743, %v863_v2   ;;  %v5186_v4 = vld [vmem:[%s862_s7] sm:$0xff]  ;;  %v864_v5 = vld [vmem:[%s857_s11 + $0x8] sm:$0xff]  ;;  %v866_v6 = vld [vmem:[%s857_s11 + $0x18] sm:$0xff]  ;;  %s7332_s0 = sld [smem:[#allocation16_spill]]  ;;  %v4971_v2 = vmov 128.0   ;;  %s4221_s8 = sshll.u32 %s4217_s12, 4  ;;  %s4222_s8 = int_to_ptr.hbm [resolvable:$true] %s4221_s8 }
  0x2e   : > { %915 = vperm.xlu2 %4745, %v5183_v3   ;;  %v5189_v7 = vld [vmem:[%s862_s7 + $0x10] sm:$0xff]  ;;  %v5196_v9 = vld [vmem:[%s862_s7 + $0x18] sm:$0xff]  ;;  %4886 = vrcp.f32 %v4971_v2  ;;  %s7333_s10 = sld [smem:[#allocation19_spill]] }
  0x2f   : > { %s7334_s7 = sld [smem:[#allocation23_spill]] }
  0x30   : > { %s7346_s11 = sld [smem:[#allocation24_spill]] }
  0x32   : > { %v907_v19 = vld [vmem:[%s7331_s1] sm:$0x7]  ;;  %s7345_s1 = sld [smem:[#allocation22_spill]] }
  0x33   : > { %v928_v21 = vperm.slane %v907_v19, 0  ;;  %v4883_v22 = vld [vmem:[%s7332_s0] ss:$0 sm:$0xff]  ;;  %v978_v26 = vperm.slane %v907_v19, 2  ;;  %v953_v27 = vperm.slane %v907_v19, 1  ;;  %s852_s0 = scalar_lea.vmem [#allocation2], %s851_s30 }
  0x34   : > { %v4310_v2 = vld [vmem:[%s7333_s10 + $0xf0] sm:$0xff] }
  0x35   : > { %910 = vperm.xlu1 %4744, %v5186_v4   ;;  %880 = vperm.xlu0 %4743, %v864_v5   ;;  %v4887_v5 = vpop.eup %4886 }
  0x36   : > { %890 = vperm.xlu2 %4745, %v866_v6   ;;  %v998_v6 = vmul.f32 128.0, %v4887_v5  ;;  %vm1002_vm1 = vweird.f32 %v4887_v5 }
  0x3d   : > { %4746 = vset.pattern.permute.xlu1 %v4969_v8  ;;  %920 = vperm.xlu0 %4743, %v5189_v7  }
  0x3e   : > { %938 = vperm.xlu1 %4746, %v5186_v4   ;;  %4747 = vset.pattern.permute.xlu2 %v4969_v8 }
  0x3f   : > { %942 = vperm.xlu2 %4747, %v5183_v3  }
  0x45   : > { %925 = vperm.xlu0 %4743, %v5196_v9  }
  0x46   : > { %946 = vperm.xlu1 %4746, %v5189_v7  }
  0x47   : > { %4748 = vset.pattern.permute.xlu2 %v4970_v10 }
  0x48   : > { %963 = vperm.xlu2 %4748, %v5186_v4  }
  0x4d   : > { %4749 = vset.pattern.permute.xlu0 %v4970_v10 }
  0x4e   : > { %950 = vperm.xlu1 %4746, %v5196_v9   ;;  %967 = vperm.xlu0 %4749, %v5183_v3  }
  0x50   : > { %971 = vperm.xlu2 %4748, %v5189_v7  }
  0x56   : > { %4750 = vset.pattern.permute.xlu1 %v4970_v10  ;;  %4751 = vset.pattern.permute.xlu0 %v4969_v8 }
  0x57   : > { %975 = vperm.xlu1 %4750, %v5196_v9  }
  0x58   : > { %4752 = vset.pattern.permute.xlu2 %v4968_v0 }
  0x88   : > { %v5210_v11 = vpop.permute.xlu2 %915 }
  0x89   : > { %v930_v46 = vmul.f32 %v928_v21, %v5210_v11 }
  0x90   : > { %v891_v12 = vpop.permute.xlu2 %890 }
  0x91   : > { %v899_v55 = vmul.f32 %v4882_v16, %v891_v12  ;;  %v999_v12 = vsub.f32 1.0, %v998_v6  ;;  %v4309_v6 = vld [vmem:[%s7333_s10 + $0xe8] sm:$0xff] }
  0x93   : > { %v906_v58 = vadd.f32 %v4883_v22, %v899_v55 }
  0x99   : > { %v5212_v15 = vpop.permute.xlu2 %942 }
  0x9a   : > { %v955_v49 = vmul.f32 %v953_v27, %v5212_v15 }
  0x9f   : > { %v886_v13 = vpop.permute.xlu1 %885  ;;  %v876_v14 = vpop.permute.xlu0 %875 }
  0xa0   : > { %v896_v20 = vmul.f32 %v4882_v16, %v876_v14  ;;  %v898_v33 = vmul.f32 %v4882_v16, %v886_v13  ;;  %v1000_v13 = vmul.f32 %v4887_v5, %v999_v12 }
  0xa2   : > { %v5225_v23 = vpop.permute.xlu2 %963  ;;  %v903_v24 = vadd.f32 %v4883_v22, %v896_v20  ;;  %v905_v39 = vadd.f32 %v4883_v22, %v898_v33  ;;  %v1001_v14 = vadd.f32 %v4887_v5, %v1000_v13  ;;  %v4308_v13 = vld [vmem:[%s7333_s10 + $0xe0] sm:$0xff] }
  0xa3   : > { %v979_v32 = vmul.f32 %v978_v26, %v5225_v23 }
  0xa4   : > { %v5257_v19 = vsel %vm1002_vm1, %v4887_v5, %v1001_v14  ;;  %vm1322_vm1 = vcmask 1041408  }
  0xa7   : > { %v5217_v17 = vpop.permute.xlu1 %910  ;;  %v881_v18 = vpop.permute.xlu0 %880 }
  0xa8   : > { %v929_v25 = vmul.f32 %v928_v21, %v5217_v17  ;;  %v897_v35 = vmul.f32 %v4882_v16, %v881_v18  ;;  %v1255_v16 = vsel %vm1254_vm0, %v5186_v4, 0.0  ;;  %v1256_v18 = vsel %vm1254_vm0, %v5183_v3, 0.0 }
  0xaa   : > { %v933_v31 = vadd.f32 %v929_v25, %v903_v24  ;;  %v5235_v38 = vpop.permute.xlu2 %971  ;;  %v904_v42 = vadd.f32 %v4883_v22, %v897_v35  ;;  %v1258_v24 = vsel %vm1254_vm0, %v5189_v7, 0.0 }
  0xab   : > { %v981_v45 = vmul.f32 %v978_v26, %v5235_v38 }
  0xac   : > { %v934_v48 = vadd.f32 %v930_v46, %v904_v42 }
  0xae   : > { %v959_v54 = vadd.f32 %v955_v49, %v934_v48 }
  0xaf   : > { %v5228_v28 = vpop.permute.xlu0 %920 }
  0xb0   : > { %v5230_v29 = vpop.permute.xlu1 %938  ;;  %v931_v36 = vmul.f32 %v928_v21, %v5228_v28 }
  0xb1   : > { %v954_v30 = vmul.f32 %v953_v27, %v5230_v29 }
  0xb2   : > { %v935_v43 = vadd.f32 %v931_v36, %v905_v39 }
  0xb3   : > { %v958_v34 = vadd.f32 %v954_v30, %v933_v31  ;;  %v1260_v30 = vsel %vm1254_vm0, %v5196_v9, 0.0  ;;  %vm1320_vm0 = vcmask 1040384  }
  0xb5   : > { %v983_v37 = vadd.f32 %v979_v32, %v958_v34 }
  0xb7   : > { %989 = vadd.xlane.f32.xlu2 %v983_v37  ;;  %v5237_v40 = vpop.permute.xlu0 %925 }
  0xb8   : > { %v5239_v41 = vpop.permute.xlu1 %946  ;;  %v932_v57 = vmul.f32 %v928_v21, %v5237_v40  ;;  %v1257_v21 = vadd.f32 %v1256_v18, %v1255_v16  ;;  %v4307_v16 = vld [vmem:[%s7333_s10 + $0xd8] sm:$0xff] }
  0xb9   : > { %v956_v44 = vmul.f32 %v953_v27, %v5239_v41 }
  0xba   : > { %v936_v60 = vadd.f32 %v932_v57, %v906_v58  ;;  %v1110_v57 = vsel %vm1108_vm2, %v5183_v3, 0.0 }
  0xbb   : > { %v960_v47 = vadd.f32 %v956_v44, %v935_v43 }
  0xbd   : > { %v985_v50 = vadd.f32 %v981_v45, %v960_v47 }
  0xbf   : > { %993 = vadd.xlane.f32.xlu1 %v985_v50 }
  0xc0   : > { %v5245_v51 = vpop.permute.xlu1 %950  ;;  %v5247_v52 = vpop.permute.xlu0 %967 }
  0xc1   : > { %v980_v53 = vmul.f32 %v978_v26, %v5247_v52  ;;  %v957_v59 = vmul.f32 %v953_v27, %v5245_v51 }
  0xc3   : > { %v984_v56 = vadd.f32 %v980_v53, %v959_v54  ;;  %v961_v62 = vadd.f32 %v957_v59, %v936_v60  ;;  %v1112_v59 = vsel %vm1108_vm2, %v5189_v7, 0.0 }
  0xc5   : > { %991 = vadd.xlane.f32.xlu0 %v984_v56 }
  0xc9   : > { %v5252_v61 = vpop.permute.xlu1 %975 }
  0xca   : > { %v982_v63 = vmul.f32 %v978_v26, %v5252_v61  ;;  %v1259_v26 = vadd.f32 %v1258_v24, %v1257_v21 }
  0xcc   : > { %v986_v1 = vadd.f32 %v982_v63, %v961_v62  ;;  %v1261_v32 = vadd.f32 %v1260_v30, %v1259_v26  ;;  %v4311_v62 = vld [vmem:[%s7333_s10 + $0xf8] sm:$0xff]  ;;  %v1114_v63 = vsel %vm1108_vm2, %v5196_v9, 0.0  ;;  %v4304_v26 = vld [vmem:[%s7333_s10 + $0xc0] sm:$0xff] }
  0xcd   : > { %1220 = vmatpush.msra.mxu1 %v4311_v62  ;;  %v4296_v62 = vld [vmem:[%s7333_s10 + $0x80] sm:$0xff] }
  0xce   : > { %995 = vadd.xlane.f32.xlu2 %v986_v1  ;;  %v1262_v35 = vrot.slane %v1261_v32, 4 }
  0xcf   : > { %1221 = vmatpush.msra.mxu1 %v4310_v2  ;;  %v4328_v2 = vld [vmem:[%s7333_s10 + $0x178] sm:$0xff] }
  0xd0   : > { %v1263_v42 = vadd.f32 %v1262_v35, %v1261_v32  ;;  %v4303_v32 = vld [vmem:[%s7333_s10 + $0xb8] sm:$0xff]  ;;  %v4302_v35 = vld [vmem:[%s7333_s10 + $0xb0] sm:$0xff] }
  0xd1   : > { %1222 = vmatpush.msra.mxu1 %v4309_v6 }
  0xd2   : > { %v1264_v45 = vrot.slane %v1263_v42, 2 }
  0xd3   : > { %1223 = vmatpush.msra.mxu1 %v4308_v13  ;;  %v4327_v13 = vld [vmem:[%s7333_s10 + $0x170] sm:$0xff] }
  0xd4   : > { %v1265_v48 = vadd.f32 %v1264_v45, %v1263_v42  ;;  %v1138_v42 = vld [vmem:[%s7333_s10 + $0x78] sm:$0xff] }
  0xd5   : > { %1224 = vmatpush.msra.mxu1 %v4307_v16  ;;  %1146 = vmatpush.msra.mxu0 %v1138_v42  ;;  %v4299_v45 = vld [vmem:[%s7333_s10 + $0x98] sm:$0xff]  ;;  %v4326_v16 = vld [vmem:[%s7333_s10 + $0x168] sm:$0xff]  ;;  %v4323_v42 = vld [vmem:[%s7333_s10 + $0x150] sm:$0xff] }
  0xd6   : > { %v1266_v53 = vrot.slane %v1265_v48, 1 }
  0xd8   : > { %v1267_v54 = vadd.f32 %v1266_v53, %v1265_v48  ;;  %v4298_v53 = vld [vmem:[%s7333_s10 + $0x90] sm:$0xff] }
  0xda   : > { %v1268_v55 = vmul.f32 0.03125, %v1267_v54 }
 0x12a   : > { %v990_v20 = vpop.xlane.xlu2 %989 }
 0x12b   : > { %v1004_v22 = vmul.f32 %v5257_v19, %v990_v20  ;;  %v4306_v20 = vld [vmem:[%s7333_s10 + $0xd0] sm:$0xff] }
 0x12c   : > { %1225 = vmatpush.msra.mxu1 %v4306_v20 }
 0x12d   : > { %v5261_v25 = vsub.f32 %v983_v37, %v1004_v22  ;;  %v4305_v22 = vld [vmem:[%s7333_s10 + $0xc8] sm:$0xff] }
 0x12e   : > { %1226 = vmatpush.msra.mxu1 %v4305_v22  ;;  %v1131_v22 = vld [vmem:[%s7333_s10 + $0x40] sm:$0xff] }
 0x12f   : > { %v1012_v27 = vmul.f32 %v5261_v25, %v5261_v25 }
 0x130   : > { %1227 = vmatpush.msra.mxu1 %v4304_v26 }
 0x131   : > { %1016 = vadd.xlane.f32.xlu2 %v1012_v27 }
 0x132   : > { %v994_v31 = vpop.xlane.xlu1 %993  ;;  %1228 = vmatpush.msra.mxu1 %v4303_v32  ;;  %v1612_v32 = vld [vmem:[%s7335_s14 + $0x10] sm:$0xff] }
 0x133   : > { %v1006_v33 = vmul.f32 %v5257_v19, %v994_v31 }
 0x134   : > { %1229 = vmatpush.msra.mxu1 %v4302_v35 }
 0x135   : > { %v5267_v34 = vsub.f32 %v985_v50, %v1006_v33 }
 0x137   : > { %v1014_v36 = vmul.f32 %v5267_v34, %v5267_v34 }
 0x138   : > { %v992_v39 = vpop.xlane.xlu0 %991 }
 0x139   : > { %v1005_v37 = vmul.f32 %v5257_v19, %v992_v39  ;;  %1020 = vadd.xlane.f32.xlu1 %v1014_v36  ;;  %v4301_v36 = vld [vmem:[%s7333_s10 + $0xa8] sm:$0xff]  ;;  %v4300_v39 = vld [vmem:[%s7333_s10 + $0xa0] sm:$0xff] }
 0x13a   : > { %1230 = vmatpush.msra.mxu1 %v4301_v36 }
 0x13b   : > { %v5272_v43 = vsub.f32 %v984_v56, %v1005_v37  ;;  %v1109_v56 = vsel %vm1108_vm2, %v5186_v4, 0.0  ;;  %vm1336_vm2 = vcmask 523264  }
 0x13c   : > { %v1111_v58 = vadd.f32 %v1110_v57, %v1109_v56  ;;  %1231 = vmatpush.msra.mxu1 %v4300_v39  ;;  %v4297_v56 = vld [vmem:[%s7333_s10 + $0x88] sm:$0xff] }
 0x13d   : > { %v1013_v44 = vmul.f32 %v5272_v43, %v5272_v43 }
 0x13e   : > { %v1113_v60 = vadd.f32 %v1112_v59, %v1111_v58  ;;  %1232 = vmatpush.msra.mxu1 %v4299_v45  ;;  %v1135_v59 = vld [vmem:[%s7333_s10 + $0x60] sm:$0xff] }
 0x13f   : > { %1018 = vadd.xlane.f32.xlu0 %v1013_v44 }
 0x140   : > { %1233 = vmatpush.msra.mxu1 %v4298_v53  ;;  %v4322_v53 = vld [vmem:[%s7333_s10 + $0x148] sm:$0xff] }
 0x141   : > { %v996_v46 = vpop.xlane.xlu2 %995 }
 0x142   : > { %v1007_v47 = vmul.f32 %v5257_v19, %v996_v46  ;;  %v1325_v46 = vld [vmem:[%s7334_s7 + $0x8] sm:$0xff]  ;;  %1234 = vmatpush.msra.mxu1 %v4297_v56 }
 0x144   : > { %v5277_v49 = vsub.f32 %v986_v1, %v1007_v47  ;;  %v1115_v1 = vadd.f32 %v1114_v63, %v1113_v60  ;;  %v1137_v47 = vld [vmem:[%s7333_s10 + $0x70] sm:$0xff]  ;;  %1235 = vmatpush.msra.mxu1 %v4296_v62  ;;  %v1181_v62 = vsel %vm1180_vm7, %v5186_v4, 0.0  ;;  %v1614_v4 = vld [vmem:[%s7335_s14 + $0x20] sm:$0xff] }
 0x145   : > { %1147 = vmatpush.msra.mxu0 %v1137_v47 }
 0x146   : > { %v1015_v50 = vmul.f32 %v5277_v49, %v5277_v49  ;;  %v1116_v5 = vrot.slane %v1115_v1, 4  ;;  %1294 = vmatpush.msrb.mxu1 %v4328_v2 }
 0x148   : > { %1022 = vadd.xlane.f32.xlu2 %v1015_v50  ;;  %v1117_v12 = vadd.f32 %v1116_v5, %v1115_v1  ;;  %v1134_v1 = vld [vmem:[%s7333_s10 + $0x58] sm:$0xff]  ;;  %1295 = vmatpush.msrb.mxu1 %v4327_v13  ;;  %v4319_v13 = vld [vmem:[%s7333_s10 + $0x130] sm:$0xff] }
 0x149   : > { %v1327_v5 = vld [vmem:[%s7334_s7 + $0x18] sm:$0xff] }
 0x14a   : > { %v1118_v14 = vrot.slane %v1117_v12, 2  ;;  %1296 = vmatpush.msrb.mxu1 %v4326_v16 }
 0x14c   : > { %v1119_v18 = vadd.f32 %v1118_v14, %v1117_v12  ;;  %v1133_v12 = vld [vmem:[%s7333_s10 + $0x50] sm:$0xff]  ;;  %v1132_v14 = vld [vmem:[%s7333_s10 + $0x48] sm:$0xff] }
 0x14e   : > { %v1120_v21 = vrot.slane %v1119_v18, 1 }
 0x150   : > { %v1121_v24 = vadd.f32 %v1120_v21, %v1119_v18 }
 0x152   : > { %1290 = vperm.xlu1 %4750, %v1268_v55   ;;  %v1122_v30 = vmul.f32 0.03125, %v1121_v24  ;;  %v1136_v55 = vld [vmem:[%s7333_s10 + $0x68] sm:$0xff]  ;;  %v4325_v24 = vld [vmem:[%s7333_s10 + $0x160] sm:$0xff] }
 0x153   : > { %1148 = vmatpush.msra.mxu0 %v1136_v55  ;;  %1297 = vmatpush.msrb.mxu1 %v4325_v24  ;;  %v4885_v24 = vld [vmem:[%s7341_s29] ss:$0 sm:$0xff] }
 0x155   : > { %1149 = vmatpush.msra.mxu0 %v1135_v59  ;;  %v1126_v59 = vld [vmem:[%s7333_s10 + $0x18] sm:$0xff] }
 0x157   : > { %1150 = vmatpush.msra.mxu0 %v1134_v1  ;;  %v5462_v1 = vld [vmem:[%s7338_s9] ss:$0 sm:$0xff]  ;;  %s7342_s9 = sld [smem:[#allocation21_spill]] }
 0x159   : > { %1151 = vmatpush.msra.mxu0 %v1133_v12  ;;  %v1125_v12 = vld [vmem:[%s7333_s10 + $0x10] sm:$0xff] }
 0x15a   : > { %4753 = vset.pattern.permute.xlu1 %v4968_v0 }
 0x15b   : > { %1152 = vmatpush.msra.mxu0 %v1132_v14 }
 0x15d   : > { %1153 = vmatpush.msra.mxu0 %v1131_v22  ;;  %s7343_s29 = smov %s7342_s9 }
 0x160   : > { %1142 = vperm.xlu2 %4752, %v1122_v30   ;;  %v4324_v30 = vld [vmem:[%s7333_s10 + $0x158] sm:$0xff] }
 0x161   : > { %1298 = vmatpush.msrb.mxu1 %v4324_v30  ;;  %v1123_v30 = vld [vmem:[%s7333_s10] sm:$0xff] }
 0x163   : > { %1299 = vmatpush.msrb.mxu1 %v4323_v42 }
 0x165   : > { %1300 = vmatpush.msrb.mxu1 %v4322_v53 }
 0x168   : > { %1417 = vperm.xlu2 %4752, %v1325_v46  }
 0x170   : > { %1427 = vperm.xlu2 %4752, %v1327_v5  }
 0x178   : > { %1749 = vperm.xlu2 %4752, %v1612_v32  }
 0x180   : > { %1759 = vperm.xlu2 %4752, %v1614_v4  }
 0x1a4   : > { %v1017_v27 = vpop.xlane.xlu2 %1016 }
 0x1a5   : > { %v1024_v31 = vmul.f32 %v1017_v27, %v5257_v19  ;;  %v1130_v27 = vld [vmem:[%s7333_s10 + $0x38] sm:$0xff] }
 0x1a6   : > { %1154 = vmatpush.msra.mxu0 %v1130_v27 }
 0x1a7   : > { %v5314_v33 = vadd.f32 1e-05, %v1024_v31 }
 0x1a9   : > { %4888 = vrsqrt.f32 %v5314_v33  ;;  %vm1038_vm4 = vweird.f32 %v5314_v33 }
 0x1ac   : > { %v1021_v37 = vpop.xlane.xlu1 %1020 }
 0x1ad   : > { %v1026_v44 = vmul.f32 %v1021_v37, %v5257_v19  ;;  %v1129_v37 = vld [vmem:[%s7333_s10 + $0x30] sm:$0xff] }
 0x1ae   : > { %1155 = vmatpush.msra.mxu0 %v1129_v37 }
 0x1af   : > { %v5339_v48 = vpop.eup %4888  ;;  %v5341_v50 = vadd.f32 1e-05, %v1026_v44 }
 0x1b0   : > { %v1033_v54 = vmul.f32 %v5339_v48, %v5314_v33  ;;  %vm1039_vm3 = vweird.f32 %v5339_v48 }
 0x1b1   : > { %4890 = vrsqrt.f32 %v5341_v50  ;;  %vm5431_vm5 = vmor %vm1038_vm4, %vm1039_vm3  ;;  %vm1058_vm8 = vweird.f32 %v5341_v50  ;;  %vm1377_vm3 = vcmask 1042432   ;;  %vm1364_vm4 = vcmask 23552  }
 0x1b2   : > { %v1034_v57 = vmul.f32 %v5339_v48, %v1033_v54  ;;  %v1019_v58 = vpop.xlane.xlu0 %1018 }
 0x1b3   : > { %v1025_v60 = vmul.f32 %v1019_v58, %v5257_v19  ;;  %v4321_v58 = vld [vmem:[%s7333_s10 + $0x140] sm:$0xff] }
 0x1b4   : > { %v1035_v63 = vmul.f32 0.5, %v1034_v57  ;;  %v1127_v57 = vld [vmem:[%s7333_s10 + $0x20] sm:$0xff]  ;;  %1301 = vmatpush.msrb.mxu1 %v4321_v58 }
 0x1b5   : > { %v5372_v6 = vadd.f32 1e-05, %v1025_v60  ;;  %v4320_v60 = vld [vmem:[%s7333_s10 + $0x138] sm:$0xff] }
 0x1b6   : > { %v1036_v20 = vsub.f32 1.5, %v1035_v63  ;;  %v1182_v63 = vsel %vm1180_vm7, %v5183_v3, 0.0  ;;  %v1184_v3 = vsel %vm1180_vm7, %v5189_v7, 0.0  ;;  %1302 = vmatpush.msrb.mxu1 %v4320_v60  ;;  %v1186_v7 = vsel %vm1180_vm7, %v5196_v9, 0.0 }
 0x1b7   : > { %v5386_v18 = vpop.eup %4890  ;;  %4892 = vrsqrt.f32 %v5372_v6  ;;  %v1183_v14 = vadd.f32 %v1182_v63, %v1181_v62  ;;  %vm1048_vm11 = vweird.f32 %v5372_v6 }
 0x1b8   : > { %v1053_v21 = vmul.f32 %v5386_v18, %v5341_v50  ;;  %v1037_v35 = vmul.f32 %v5339_v48, %v1036_v20  ;;  %vm1059_vm6 = vweird.f32 %v5386_v18  ;;  %v1124_v20 = vld [vmem:[%s7333_s10 + $0x8] sm:$0xff]  ;;  %1303 = vmatpush.msrb.mxu1 %v4319_v13 }
 0x1b9   : > { %vm5467_vm9 = vmor %vm1058_vm8, %vm1059_vm6  ;;  %v1185_v22 = vadd.f32 %v1184_v3, %v1183_v14  ;;  %vm1622_vm6 = vcmask 261120  }
 0x1ba   : > { %v1054_v26 = vmul.f32 %v5386_v18, %v1053_v21  ;;  %v1041_v33 = vsel %vm5431_vm5, %v5339_v48, %v1037_v35  ;;  %v4318_v21 = vld [vmem:[%s7333_s10 + $0x128] sm:$0xff] }
 0x1bb   : > { %v1023_v31 = vpop.xlane.xlu2 %1022  ;;  %v1072_v50 = vmul.f32 %v1041_v33, %v5261_v25  ;;  %v1187_v32 = vadd.f32 %v1186_v7, %v1185_v22  ;;  %1304 = vmatpush.msrb.mxu1 %v4318_v21  ;;  %v4314_v33 = vld [vmem:[%s7333_s10 + $0x108] sm:$0xff] }
 0x1bc   : > { %v1055_v36 = vmul.f32 0.5, %v1054_v26  ;;  %v1027_v39 = vmul.f32 %v1023_v31, %v5257_v19  ;;  %v1128_v19 = vld [vmem:[%s7333_s10 + $0x28] sm:$0xff]  ;;  %v4317_v31 = vld [vmem:[%s7333_s10 + $0x120] sm:$0xff] }
 0x1bd   : > { %v5416_v44 = vpop.eup %4892  ;;  %1156 = vmatpush.msra.mxu0 %v1128_v19  ;;  %v1079_v9 = vmul.f32 %v5462_v1, %v1072_v50  ;;  %1305 = vmatpush.msrb.mxu1 %v4317_v31 }
 0x1be   : > { %v1056_v45 = vsub.f32 1.5, %v1055_v36  ;;  %v1043_v46 = vmul.f32 %v5416_v44, %v5372_v6  ;;  %v5421_v47 = vadd.f32 1e-05, %v1027_v39  ;;  %vm1049_vm10 = vweird.f32 %v5416_v44 }
 0x1bf   : > { %1157 = vmatpush.msra.mxu0 %v1127_v57  ;;  %vm1050_vm12 = vmor %vm1048_vm11, %vm1049_vm10  ;;  %v1188_v36 = vrot.slane %v1187_v32, 4  ;;  %v1086_v39 = vadd.f32 %v4885_v24, %v1079_v9  ;;  %vm2059_vm11 = vcmask 130048  }
 0x1c0   : > { %v1057_v55 = vmul.f32 %v5386_v18, %v1056_v45  ;;  %v1044_v56 = vmul.f32 %v5416_v44, %v1043_v46  ;;  %4894 = vrsqrt.f32 %v5421_v47  ;;  %v4316_v45 = vld [vmem:[%s7333_s10 + $0x118] sm:$0xff]  ;;  %v4315_v46 = vld [vmem:[%s7333_s10 + $0x110] sm:$0xff]  ;;  %vm1068_vm14 = vweird.f32 %v5421_v47 }
 0x1c1   : > { %1158 = vmatpush.msra.mxu0 %v1126_v59  ;;  %v1189_v19 = vadd.f32 %v1188_v36, %v1187_v32  ;;  %1306 = vmatpush.msrb.mxu1 %v4316_v45  ;;  %v4313_v59 = vld [vmem:[%s7333_s10 + $0x100] sm:$0xff]  ;;  %s7344_s10 = sld [smem:[#allocation20_spill]] }
 0x1c2   : > { %v1045_v48 = vmul.f32 0.5, %v1044_v56  ;;  %v1061_v5 = vsel %vm5467_vm9, %v5386_v18, %v1057_v55  ;;  %v1090_v56 = vmax.f32 %v1086_v39, 0.0 }
 0x1c3   : > { %v1074_v26 = vmul.f32 %v1061_v5, %v5267_v34  ;;  %1159 = vmatpush.msra.mxu0 %v1125_v12  ;;  %v1190_v55 = vrot.slane %v1189_v19, 2  ;;  %1307 = vmatpush.msrb.mxu1 %v4315_v46 }
 0x1c4   : > { %v1046_v25 = vsub.f32 1.5, %v1045_v48  ;;  %v1094_v5 = vmul.f32 %v1090_v56, %v5217_v17  ;;  %v1240_v13 = vmul.f32 %v1090_v56, %v5225_v23 }
 0x1c5   : > { %1160 = vmatpush.msra.mxu0 %v1124_v20  ;;  %v1081_v37 = vmul.f32 %v5462_v1, %v1074_v26  ;;  %v1191_v60 = vadd.f32 %v1190_v55, %v1189_v19  ;;  %1308 = vmatpush.msrb.mxu1 %v4314_v33  ;;  %v2046_v26 = vld [vmem:[%s7273_s17 + $0x28] sm:$0xff] }
 0x1c6   : > { %v4895_v16 = vpop.eup %4894  ;;  %v1047_v18 = vmul.f32 %v5416_v44, %v1046_v25  ;;  %v1166_v25 = vmul.f32 %v1090_v56, %v5230_v29  ;;  %v2055_v56 = vld [vmem:[%s7273_s17 + $0x70] sm:$0xff] }
 0x1c7   : > { %v1063_v6 = vmul.f32 %v4895_v16, %v5421_v47  ;;  %1161 = vmatpush.msra.mxu0 %v1123_v30  ;;  %vm1069_vm13 = vweird.f32 %v4895_v16  ;;  %v1088_v57 = vadd.f32 %v4885_v24, %v1081_v37  ;;  %v1192_v4 = vrot.slane %v1191_v60, 1  ;;  %1309 = vmatpush.msrb.mxu1 %v4313_v59  ;;  %v1332_v59 = vld [vmem:[%s7343_s29 + $0x20] sm:$0xff] }
 0x1c8   : > { %v1051_v27 = vsel %vm1050_vm12, %v5416_v44, %v1047_v18  ;;  %vm1070_vm15 = vmor %vm1068_vm14, %vm1069_vm13 }
 0x1c9   : > { %v1073_v34 = vmul.f32 %v1051_v27, %v5272_v43  ;;  %v1064_v35 = vmul.f32 %v4895_v16, %v1063_v6  ;;  %v1617_v43 = vld [vmem:[%s7335_s14 + $0x38] sm:$0xff]  ;;  %v1092_v3 = vmax.f32 %v1088_v57, 0.0  ;;  %v1193_v14 = vadd.f32 %v1192_v4, %v1191_v60 }
 0x1ca   : > { %1774 = vperm.xlu2 %4752, %v1617_v43   ;;  %v1335_v57 = vld [vmem:[%s7342_s9 + $0x38] sm:$0xff]  ;;  %s4219_s9 = sshll.u32 %s852_s0, 4  ;;  %s4220_s9 = int_to_ptr.vmem [resolvable:$true] %s4219_s9 }
 0x1cb   : > { %v1080_v42 = vmul.f32 %v5462_v1, %v1073_v34  ;;  %v1065_v44 = vmul.f32 0.5, %v1064_v35  ;;  %v1096_v17 = vmul.f32 %v1092_v3, %v5228_v28  ;;  %v1168_v29 = vmul.f32 %v1092_v3, %v5239_v41  ;;  %v2049_v35 = vld [vmem:[%s7273_s17 + $0x40] sm:$0xff]  ;;  %1348 = vmatpush.msra.mxu3 %v1335_v57  ;;  %v1331_v60 = vld [vmem:[%s7343_s29 + $0x18] sm:$0xff] }
 0x1cd   : > { %v1087_v53 = vadd.f32 %v4885_v24, %v1080_v42  ;;  %v1066_v54 = vsub.f32 1.5, %v1065_v44 }
 0x1cf   : > { %v1091_v58 = vmax.f32 %v1087_v53, 0.0  ;;  %v1067_v48 = vmul.f32 %v4895_v16, %v1066_v54  ;;  %v2052_v54 = vld [vmem:[%s7273_s17 + $0x58] sm:$0xff] }
 0x1d1   : > { %v1071_v62 = vsel %vm1070_vm15, %v4895_v16, %v1067_v48  ;;  %v1095_v47 = vmul.f32 %v1091_v58, %v5210_v11  ;;  %v1167_v63 = vmul.f32 %v1091_v58, %v5212_v15  ;;  %v1241_v2 = vmul.f32 %v1091_v58, %v5247_v52  ;;  %v2043_v11 = vld [vmem:[%s7273_s17 + $0x10] sm:$0xff]  ;;  %v1333_v48 = vld [vmem:[%s7343_s29 + $0x28] sm:$0xff] }
 0x1d2   : > { %v1075_v50 = vmul.f32 %v1071_v62, %v5277_v49  ;;  %v1194_v16 = vmul.f32 0.03125, %v1193_v14  ;;  %2266 = vperm.xlu2 %4752, %v2043_v11   ;;  %v1334_v58 = vld [vmem:[%s7343_s29 + $0x30] sm:$0xff]  ;;  %v1143_v14 = vpop.permute.xlu2 %1142 }
 0x1d3   : > { %v1098_v15 = vadd.f32 %v1095_v47, %v1094_v5  ;;  %v1170_v49 = vadd.f32 %v1167_v63, %v1166_v25  ;;  %v1244_v52 = vadd.f32 %v1241_v2, %v1240_v13  ;;  %1349 = vmatpush.msra.mxu3 %v1334_v58  ;;  %v1330_v62 = vld [vmem:[%s7343_s29 + $0x10] sm:$0xff]  ;;  %v1329_v47 = vld [vmem:[%s7343_s29 + $0x8] sm:$0xff]  ;;  %v1328_v63 = vld [vmem:[%s7343_s29] sm:$0xff] }
 0x1d4   : > { %v1082_v12 = vmul.f32 %v5462_v1, %v1075_v50  ;;  %v1242_v1 = vmul.f32 %v1092_v3, %v5235_v38  ;;  %1216 = vperm.xlu0 %4751, %v1194_v16   ;;  %v4312_v50 = vld [vmem:[%s7344_s10 + $0x1] sm:$0x1]  ;;  %v1139_v5 = vld [vmem:[%s7344_s10] sm:$0x1]  ;;  %v4329_v25 = vld [vmem:[%s7344_s10 + $0x2] sm:$0x1] }
 0x1d5   : > { %v1099_v23 = vadd.f32 %v1098_v15, %v1096_v17  ;;  %v1171_v20 = vadd.f32 %v1170_v49, %v1168_v29  ;;  %1350 = vmatpush.msra.mxu3 %v1333_v48  ;;  %v1145_v11 = vmul.f32 %v1143_v14, %v1139_v5  ;;  %v4345_v58 = vld [vmem:[%s7345_s1 + $0x20] sm:$0xff]  ;;  %v4387_v5 = vld [vmem:[%s7346_s11 + $0x38] sm:$0xff]  ;;  %v1619_v14 = vld [vmem:[%s7346_s11 + $0x8] sm:$0xff] }
 0x1d6   : > { %v1089_v7 = vadd.f32 %v4885_v24, %v1082_v12  ;;  %v1245_v24 = vadd.f32 %v1244_v52, %v1242_v1  ;;  %v1291_v12 = vpop.permute.xlu1 %1290 }
 0x1d7   : > { %1351 = vmatpush.msra.mxu3 %v1332_v59  ;;  %v1293_v15 = vmul.f32 %v4329_v25, %v1291_v12  ;;  %v4346_v59 = vld [vmem:[%s7345_s1 + $0x28] sm:$0xff]  ;;  %v1620_v25 = vld [vmem:[%s7346_s11 + $0x10] sm:$0xff] }
 0x1d8   : > { %v1093_v18 = vmax.f32 %v1089_v7, 0.0  ;;  %v4386_v12 = vld [vmem:[%s7346_s11 + $0x30] sm:$0xff] }
 0x1d9   : > { %1352 = vmatpush.msra.mxu3 %v1331_v60  ;;  %v4363_v60 = vld [vmem:[%s7345_s1 + $0x40] sm:$0xff] }
 0x1da   : > { %v1097_v21 = vmul.f32 %v1093_v18, %v5237_v40  ;;  %v1169_v22 = vmul.f32 %v1093_v18, %v5245_v51  ;;  %v1243_v9 = vmul.f32 %v1093_v18, %v5252_v61  ;;  %2281 = vperm.xlu2 %4752, %v2046_v26   ;;  %v4341_v26 = vld [vmem:[%s7343_s29 + $0x68] sm:$0xff] }
 0x1db   : > { %1353 = vmatpush.msra.mxu3 %v1330_v62 }
 0x1dc   : > { %v1100_v28 = vadd.f32 %v1099_v23, %v1097_v21  ;;  %v1172_v6 = vadd.f32 %v1171_v20, %v1169_v22  ;;  %v1246_v41 = vadd.f32 %v1245_v24, %v1243_v9  ;;  %4754 = vset.pattern.permute.xlu0 %v4968_v0  ;;  %v1324_v23 = vld [vmem:[%s7334_s7] sm:$0xff]  ;;  %v4343_v22 = vld [vmem:[%s7343_s29 + $0x78] sm:$0xff]  ;;  %v4342_v9 = vld [vmem:[%s7343_s29 + $0x70] sm:$0xff] }
 0x1dd   : > { %1354 = vmatpush.msra.mxu3 %v1329_v47  ;;  %1412 = vperm.xlu1 %4753, %v1324_v23   ;;  %v1360_v20 = vld [vmem:[%s7345_s1] sm:$0xff]  ;;  %v1326_v24 = vld [vmem:[%s7334_s7 + $0x10] sm:$0xff]  ;;  %s4924_s7 = scalar_lea.hbm %s7284_s28, 2 }
 0x1de   : > { %v1101_v27 = vrot.slane %v1100_v28, 4  ;;  %v1173_v30 = vrot.slane %v1172_v6, 4  ;;  %v1247_v38 = vrot.slane %v1246_v41, 4  ;;  %v4347_v47 = vld [vmem:[%s7345_s1 + $0x30] sm:$0xff] }
 0x1df   : > { %1355 = vmatpush.msra.mxu3 %v1328_v63  ;;  %v4364_v63 = vld [vmem:[%s7345_s1 + $0x48] sm:$0xff] }
 0x1e0   : > { %v1102_v31 = vadd.f32 %v1101_v27, %v1100_v28  ;;  %v1174_v32 = vadd.f32 %v1173_v30, %v1172_v6  ;;  %v1248_v34 = vadd.f32 %v1247_v38, %v1246_v41  ;;  %v4340_v28 = vld [vmem:[%s7343_s29 + $0x60] sm:$0xff]  ;;  %v1361_v6 = vld [vmem:[%s7345_s1 + $0x8] sm:$0xff]  ;;  %v4339_v41 = vld [vmem:[%s7343_s29 + $0x58] sm:$0xff] }
 0x1e1   : > { %v4338_v27 = vld [vmem:[%s7343_s29 + $0x50] sm:$0xff]  ;;  %v1611_v30 = vld [vmem:[%s7335_s14 + $0x8] sm:$0xff] }
 0x1e2   : > { %v1103_v40 = vrot.slane %v1102_v31, 2  ;;  %v1175_v51 = vrot.slane %v1174_v32, 2  ;;  %v1249_v61 = vrot.slane %v1248_v34, 2  ;;  %2296 = vperm.xlu2 %4752, %v2049_v35   ;;  %v4337_v38 = vld [vmem:[%s7343_s29 + $0x48] sm:$0xff]  ;;  %v1363_v35 = vld [vmem:[%s7345_s1 + $0x18] sm:$0xff] }
 0x1e4   : > { %v1104_v36 = vadd.f32 %v1103_v40, %v1102_v31  ;;  %v1176_v39 = vadd.f32 %v1175_v51, %v1174_v32  ;;  %v1250_v44 = vadd.f32 %v1249_v61, %v1248_v34  ;;  %v4336_v31 = vld [vmem:[%s7343_s29 + $0x40] sm:$0xff]  ;;  %v1362_v32 = vld [vmem:[%s7345_s1 + $0x10] sm:$0xff]  ;;  %v4361_v34 = vld [vmem:[%s7343_s29 + $0xb8] sm:$0xff] }
 0x1e5   : > { %1422 = vperm.xlu1 %4753, %v1326_v24   ;;  %v4360_v40 = vld [vmem:[%s7343_s29 + $0xb0] sm:$0xff]  ;;  %v4359_v51 = vld [vmem:[%s7343_s29 + $0xa8] sm:$0xff]  ;;  %v4358_v61 = vld [vmem:[%s7343_s29 + $0xa0] sm:$0xff] }
 0x1e6   : > { %v1105_v37 = vrot.slane %v1104_v36, 1  ;;  %v1177_v42 = vrot.slane %v1176_v39, 1  ;;  %v1251_v53 = vrot.slane %v1250_v44, 1  ;;  %v4408_v24 = vld [vmem:[%s7346_s11 + $0x40] sm:$0xff] }
 0x1e8   : > { %v1106_v45 = vadd.f32 %v1105_v37, %v1104_v36  ;;  %v1178_v43 = vadd.f32 %v1177_v42, %v1176_v39  ;;  %v1252_v33 = vadd.f32 %v1251_v53, %v1250_v44  ;;  %v4357_v36 = vld [vmem:[%s7343_s29 + $0x98] sm:$0xff]  ;;  %v4356_v39 = vld [vmem:[%s7343_s29 + $0x90] sm:$0xff]  ;;  %v4355_v37 = vld [vmem:[%s7343_s29 + $0x88] sm:$0xff] }
 0x1e9   : > { %v4354_v42 = vld [vmem:[%s7343_s29 + $0x80] sm:$0xff]  ;;  %v1613_v44 = vld [vmem:[%s7335_s14 + $0x18] sm:$0xff] }
 0x1ea   : > { %v1107_v46 = vmul.f32 0.03125, %v1106_v45  ;;  %v1179_v19 = vmul.f32 0.03125, %v1178_v43  ;;  %2311 = vperm.xlu2 %4752, %v2052_v54   ;;  %v1253_v55 = vmul.f32 0.03125, %v1252_v33  ;;  %v1616_v45 = vld [vmem:[%s7335_s14 + $0x30] sm:$0xff]  ;;  %v2042_v43 = vld [vmem:[%s7273_s17 + $0x8] sm:$0xff]  ;;  %v2048_v53 = vld [vmem:[%s7273_s17 + $0x38] sm:$0xff] }
 0x1eb   : > { %v2051_v33 = vld [vmem:[%s7273_s17 + $0x50] sm:$0xff] }
 0x1ec   : > { %1162 = vmatmul.f32.vlgmr.msra.gmra.mxu0 %v1107_v46  ;;  %1236 = vmatmul.f32.vlgmr.msra.gmra.mxu1 %v1179_v19  ;;  %v2045_v46 = vld [vmem:[%s7273_s17 + $0x20] sm:$0xff] }
 0x1ed   : > { %1744 = vperm.xlu1 %4753, %v1611_v30  }
 0x1f2   : > { %2326 = vperm.xlu2 %4752, %v2055_v56  }
 0x1f4   : > { %1310 = vmatmul.f32.vlgmr.msrb.gmra.mxu1 %v1253_v55  ;;  %v2054_v55 = vld [vmem:[%s7273_s17 + $0x68] sm:$0xff] }
 0x1f5   : > { %1754 = vperm.xlu1 %4753, %v1613_v44  }
 0x1fa   : > { %4755 = vset.pattern.permute.xlu2 %v4969_v8 }
 0x1fd   : > { %1769 = vperm.xlu1 %4753, %v1616_v45  }
 0x205   : > { %2261 = vperm.xlu1 %4753, %v2042_v43  }
 0x20d   : > { %2276 = vperm.xlu1 %4753, %v2045_v46  }
 0x215   : > { %2291 = vperm.xlu1 %4753, %v2048_v53  }
 0x21d   : > { %2306 = vperm.xlu1 %4753, %v2051_v33   ;;  %v1610_v33 = vld [vmem:[%s7335_s14] sm:$0xff] }
 0x21e   : > { %1739 = vperm.xlu0 %4754, %v1610_v33  }
 0x225   : > { %2321 = vperm.xlu1 %4753, %v2054_v55   ;;  %v1615_v55 = vld [vmem:[%s7335_s14 + $0x28] sm:$0xff] }
 0x226   : > { %1764 = vperm.xlu0 %4754, %v1615_v55  }
 0x246   : > { %v1217_v2 = vpop.permute.xlu0 %1216 }
 0x247   : > { %v1219_v4 = vmul.f32 %v4312_v50, %v1217_v2  ;;  %v4348_v50 = vld [vmem:[%s7345_s1 + $0x38] sm:$0xff]  ;;  %v4365_v2 = vld [vmem:[%s7345_s1 + $0x50] sm:$0xff] }
 0x269   : > { %v1237_v3 = vpop.f32.mrf.mxu1  ;;  %v1163_v49 = vpop.f32.mrf.mxu0 }
 0x26a   : > { %v5594_v13 = vadd.f32 %v1237_v3, %v1219_v4  ;;  %v5599_v17 = vadd.f32 %v1163_v49, %v1145_v11  ;;  %v4366_v4 = vld [vmem:[%s7345_s1 + $0x58] sm:$0xff]  ;;  %v4385_v11 = vld [vmem:[%s7346_s11 + $0x28] sm:$0xff]  ;;  %v4384_v49 = vld [vmem:[%s7346_s11 + $0x20] sm:$0xff]  ;;  %s4209_s1 = scalar_lea.sflag [#allocation3], %s851_s30 }
 0x26b   : > { %v1621_v3 = vld [vmem:[%s7346_s11 + $0x18] sm:$0xff] }
 0x26c   : > { %v1315_v7 = vrot.slane %v5594_v13, 7  ;;  %1647 = vmatpush.msra.mxu2 %v1621_v3 }
 0x26e   : > { %v1321_v18 = vsel %vm1320_vm0, %v5599_v17, %v1315_v7  ;;  %1648 = vmatpush.msra.mxu2 %v1620_v25  ;;  %v2053_v25 = vld [vmem:[%s7273_s17 + $0x60] sm:$0xff] }
 0x270   : > { %1649 = vmatpush.msra.mxu2 %v1619_v14 }
 0x271   : > { %v1311_v52 = vpop.f32.mrf.mxu1 }
 0x272   : > { %v5597_v16 = vadd.f32 %v1311_v52, %v1293_v15  ;;  %v1618_v15 = vld [vmem:[%s7346_s11] sm:$0xff]  ;;  %v1413_v52 = vpop.permute.xlu1 %1412 }
 0x273   : > { %1650 = vmatpush.msra.mxu2 %v1618_v15  ;;  %v1665_v15 = vld [vmem:[%s7347_s13 + $0x8] sm:$0xff] }
 0x274   : > { %v1318_v29 = vrot.slane %v5597_v16, 6 }
 0x276   : > { %v1323_v1 = vsel %vm1322_vm1, %v1321_v18, %v1318_v29  ;;  %v4411_v18 = vld [vmem:[%s7346_s11 + $0x58] sm:$0xff] }
 0x277   : > { %4330 = vmatmul.msk.f32.vlgmr.msra.gmra.mxu3 %vm1336_vm2, %v1323_v1  ;;  %1918 = vmatpush.msrb.mxu2 %v4411_v18 }
 0x2fa   : > { %v1357_v21 = vpop.f32.mrf.mxu3 }
 0x2fb   : > { %4331 = vmatpush.msk.msrb.mxu3 %vm1377_vm3, %v1357_v21 }
 0x2fc   : > { %4332 = vmatmul.msk.f32.vlgmr.msrb.gmra.mxu3 %vm1364_vm4, %v1360_v20 }
 0x2fd   : > { %1451 = vmatpush.msra.mxu3 %v4343_v22  ;;  %v4409_v22 = vld [vmem:[%s7346_s11 + $0x48] sm:$0xff] }
 0x2ff   : > { %1452 = vmatpush.msra.mxu3 %v4342_v9 }
 0x301   : > { %1453 = vmatpush.msra.mxu3 %v4341_v26 }
 0x303   : > { %1454 = vmatpush.msra.mxu3 %v4340_v28  ;;  %v1418_v28 = vpop.permute.xlu2 %1417 }
 0x304   : > { %4333 = vmatmul.msk.f32.gmra.mxu3 %vm1364_vm4, %v1361_v6 }
 0x305   : > { %1455 = vmatpush.msra.mxu3 %v4339_v41 }
 0x307   : > { %1456 = vmatpush.msra.mxu3 %v4338_v27 }
 0x309   : > { %1457 = vmatpush.msra.mxu3 %v4337_v38 }
 0x30b   : > { %1458 = vmatpush.msra.mxu3 %v4336_v31  ;;  %v1423_v31 = vpop.permute.xlu1 %1422 }
 0x30c   : > { %4334 = vmatmul.msk.f32.gmra.mxu3 %vm1364_vm4, %v1362_v32 }
 0x30d   : > { %1533 = vmatpush.msrb.mxu3 %v4361_v34 }
 0x30f   : > { %1534 = vmatpush.msrb.mxu3 %v4360_v40 }
 0x311   : > { %1535 = vmatpush.msrb.mxu3 %v4359_v51 }
 0x313   : > { %1536 = vmatpush.msrb.mxu3 %v4358_v61  ;;  %v1745_v33 = vpop.permute.xlu1 %1744 }
 0x314   : > { %4335 = vmatmul.msk.f32.gmra.mxu3 %vm1364_vm4, %v1363_v35 }
 0x315   : > { %1537 = vmatpush.msrb.mxu3 %v4357_v36 }
 0x317   : > { %1538 = vmatpush.msrb.mxu3 %v4356_v39 }
 0x319   : > { %1539 = vmatpush.msrb.mxu3 %v4355_v37  ;;  %v1428_v37 = vpop.permute.xlu2 %1427 }
 0x31b   : > { %1540 = vmatpush.msrb.mxu3 %v4354_v42 }
 0x31c   : > { %4344 = vmatmul.msk.f32.vlgmr.msra.gmra.mxu3 %vm1336_vm2, %v1323_v1 }
 0x324   : > { %4362 = vmatmul.msk.f32.vlgmr.msrb.gmra.mxu3 %vm1336_vm2, %v1323_v1  ;;  %v4410_v1 = vld [vmem:[%s7346_s11 + $0x50] sm:$0xff]  ;;  %s4918_s11 = sshra.s32 %s4222_s8, 4  ;;  %s4919_s11 = int_to_ptr.hbm [resolvable:$true] %s4918_s11 }
 0x325   : > { %1919 = vmatpush.msrb.mxu2 %v4410_v1  ;;  %v1667_v1 = vld [vmem:[%s7347_s13 + $0x18] sm:$0xff]  ;;  %p4925_p0 = scmp.lt.s32.totalorder %s4919_s11, %s7284_s28 }
 0x327   : > { %1920 = vmatpush.msrb.mxu2 %v4409_v22  ;;  %v4416_v22 = vld [vmem:[%s7347_s13 + $0x80] sm:$0xff] }
 0x329   : > { %1921 = vmatpush.msrb.mxu2 %v4408_v24  ;;  %v1669_v24 = vld [vmem:[%s7347_s13 + $0x28] sm:$0xff] }
 0x37f   : > { %v1398_v19 = vpop.f32.mrf.mxu3 }
 0x380   : > { %v1430_v29 = vadd.f32 %v1413_v52, %v1398_v19  ;;  %v1666_v52 = vld [vmem:[%s7347_s13 + $0x10] sm:$0xff] }
 0x387   : > { %v1401_v54 = vpop.f32.mrf.mxu3 }
 0x388   : > { %v1431_v6 = vadd.f32 %v1418_v28, %v1401_v54  ;;  %v4398_v28 = vld [vmem:[%s7347_s13 + $0x70] sm:$0xff] }
 0x38f   : > { %v5701_v56 = vpop.f32.mrf.mxu3 }
 0x390   : > { %v1432_v40 = vadd.f32 %v1423_v31, %v5701_v56  ;;  %v4420_v31 = vld [vmem:[%s7347_s13 + $0xa0] sm:$0xff] }
 0x397   : > { %v5703_v57 = vpop.f32.mrf.mxu3 }
 0x398   : > { %v1433_v44 = vadd.f32 %v1428_v37, %v5703_v57  ;;  %v2041_v57 = vld [vmem:[%s7273_s17] sm:$0xff] }
 0x399   : > { %2256 = vperm.xlu0 %4754, %v2041_v57  }
 0x39f   : > { %v1460_v48 = vpop.f32.mrf.mxu3 }
 0x3a0   : > { %4349 = vmatpush.msk.msra.mxu1 %vm1377_vm3, %v1460_v48 }
 0x3a1   : > { %4350 = vmatmul.msk.f32.vlgmr.msra.gmra.mxu1 %vm1364_vm4, %v4345_v58 }
 0x3a2   : > { %1802 = vmatpush.msrb.mxu1 %v4387_v5  ;;  %v1664_v5 = vld [vmem:[%s7347_s13] sm:$0xff] }
 0x3a4   : > { %1803 = vmatpush.msrb.mxu1 %v4386_v12  ;;  %v4393_v12 = vld [vmem:[%s7347_s13 + $0x48] sm:$0xff] }
 0x3a6   : > { %1804 = vmatpush.msrb.mxu1 %v4385_v11  ;;  %v2056_v11 = vld [vmem:[%s7273_s17 + $0x78] sm:$0xff] }
 0x3a7   : > { %v1542_v62 = vpop.f32.mrf.mxu3 }
 0x3a8   : > { %4367 = vmatpush.msk.msrb.mxu0 %vm1377_vm3, %v1542_v62  ;;  %1805 = vmatpush.msrb.mxu1 %v4384_v49  ;;  %v4394_v49 = vld [vmem:[%s7347_s13 + $0x50] sm:$0xff] }
 0x3a9   : > { %4351 = vmatmul.msk.f32.gmra.mxu1 %vm1364_vm4, %v4346_v59  ;;  %4368 = vmatmul.msk.f32.vlgmr.msrb.gmra.mxu0 %vm1364_vm4, %v4363_v60  ;;  %v2044_v59 = vld [vmem:[%s7273_s17 + $0x18] sm:$0xff] }
 0x3aa   : > { %2271 = vperm.xlu0 %4754, %v2044_v59  }
 0x3b1   : > { %4352 = vmatmul.msk.f32.gmra.mxu1 %vm1364_vm4, %v4347_v47  ;;  %4369 = vmatmul.msk.f32.gmra.mxu0 %vm1364_vm4, %v4364_v63  ;;  %v2047_v47 = vld [vmem:[%s7273_s17 + $0x30] sm:$0xff] }
 0x3b2   : > { %2286 = vperm.xlu0 %4754, %v2047_v47   ;;  %v1750_v47 = vpop.permute.xlu2 %1749 }
 0x3b9   : > { %4353 = vmatmul.msk.f32.gmra.mxu1 %vm1364_vm4, %v4348_v50  ;;  %4370 = vmatmul.msk.f32.gmra.mxu0 %vm1364_vm4, %v4365_v2  ;;  %v2050_v2 = vld [vmem:[%s7273_s17 + $0x48] sm:$0xff] }
 0x3ba   : > { %2301 = vperm.xlu0 %4754, %v2050_v2  }
 0x3c1   : > { %4371 = vmatmul.msk.f32.gmra.mxu0 %vm1364_vm4, %v4366_v4  ;;  %v4392_v4 = vld [vmem:[%s7347_s13 + $0x40] sm:$0xff] }
 0x3c2   : > { %2316 = vperm.xlu0 %4754, %v2053_v25  }
 0x3ca   : > { %2331 = vperm.xlu0 %4754, %v2056_v11  }
 0x3d2   : > { %4763 = vset.pattern.permute.xlu0 %v4969_v8 }
 0x41e   : > { %v1500_v7 = vpop.f32.mrf.mxu1 }
 0x41f   : > { %v1512_v23 = vadd.f32 %v1500_v7, %v1430_v29  ;;  %v4395_v29 = vld [vmem:[%s7347_s13 + $0x58] sm:$0xff] }
 0x426   : > { %v1503_v20 = vpop.f32.mrf.mxu1  ;;  %v1582_v21 = vpop.f32.mrf.mxu0 }
 0x427   : > { %v1594_v9 = vadd.f32 %v1582_v21, %v1512_v23  ;;  %v1513_v27 = vadd.f32 %v1503_v20, %v1431_v6  ;;  %v4396_v23 = vld [vmem:[%s7347_s13 + $0x60] sm:$0xff]  ;;  %v1670_v6 = vld [vmem:[%s7347_s13 + $0x30] sm:$0xff] }
 0x428   : > { %v1668_v21 = vld [vmem:[%s7347_s13 + $0x20] sm:$0xff] }
 0x429   : > { %vm1598_vm5 = vcmp.ge.f32.partialorder %v1594_v9, 0.0  ;;  %v1602_v26 = vmul.f32 0.01, %v1594_v9 }
 0x42b   : > { %v1606_v41 = vsel %vm1598_vm5, %v1594_v9, %v1602_v26  ;;  %v4397_v9 = vld [vmem:[%s7347_s13 + $0x68] sm:$0xff]  ;;  %vm2779_vm5 = vcmask 64512  }
 0x42c   : > { %4372 = vmatmul.msk.f32.vlgmr.msra.gmra.mxu2 %vm1622_vm6, %v1606_v41  ;;  %4388 = vmatmul.msk.f32.vlgmr.msrb.gmra.mxu1 %vm1622_vm6, %v1606_v41  ;;  %v4417_v26 = vld [vmem:[%s7347_s13 + $0x88] sm:$0xff] }
 0x42e   : > { %v1585_v30 = vpop.f32.mrf.mxu0  ;;  %v1506_v32 = vpop.f32.mrf.mxu1 }
 0x42f   : > { %v1595_v38 = vadd.f32 %v1585_v30, %v1513_v27  ;;  %v1514_v61 = vadd.f32 %v1506_v32, %v1432_v40  ;;  %v4399_v27 = vld [vmem:[%s7347_s13 + $0x78] sm:$0xff]  ;;  %v4421_v32 = vld [vmem:[%s7347_s13 + $0xa8] sm:$0xff] }
 0x430   : > { %v1671_v30 = vld [vmem:[%s7347_s13 + $0x38] sm:$0xff] }
 0x431   : > { %vm1599_vm7 = vcmp.ge.f32.partialorder %v1595_v38, 0.0  ;;  %v1603_v34 = vmul.f32 0.01, %v1595_v38  ;;  %v4423_v40 = vld [vmem:[%s7347_s13 + $0xb8] sm:$0xff] }
 0x433   : > { %v1607_v51 = vsel %vm1599_vm7, %v1595_v38, %v1603_v34  ;;  %v4419_v38 = vld [vmem:[%s7347_s13 + $0x98] sm:$0xff]  ;;  %v4422_v34 = vld [vmem:[%s7347_s13 + $0xb0] sm:$0xff] }
 0x434   : > { %4373 = vmatmul.msk.f32.gmra.mxu2 %vm1622_vm6, %v1607_v51  ;;  %4389 = vmatmul.msk.f32.gmra.mxu1 %vm1622_vm6, %v1607_v51 }
 0x436   : > { %v1588_v35 = vpop.f32.mrf.mxu0  ;;  %v1509_v42 = vpop.f32.mrf.mxu1 }
 0x437   : > { %v1596_v36 = vadd.f32 %v1588_v35, %v1514_v61  ;;  %v1515_v43 = vadd.f32 %v1509_v42, %v1433_v44  ;;  %v4457_v61 = vld [vmem:[%s7271_s15 + $0x18] sm:$0xff]  ;;  %v2057_v35 = vld [vmem:[%s7271_s15] sm:$0xff]  ;;  %v1740_v44 = vpop.permute.xlu0 %1739 }
 0x439   : > { %vm1600_vm8 = vcmp.ge.f32.partialorder %v1596_v36, 0.0  ;;  %v1604_v39 = vmul.f32 0.01, %v1596_v36 }
 0x43b   : > { %v1608_v45 = vsel %vm1600_vm8, %v1596_v36, %v1604_v39  ;;  %v4456_v36 = vld [vmem:[%s7271_s15 + $0x10] sm:$0xff] }
 0x43c   : > { %4374 = vmatmul.msk.f32.gmra.mxu2 %vm1622_vm6, %v1608_v45  ;;  %4390 = vmatmul.msk.f32.gmra.mxu1 %vm1622_vm6, %v1608_v45 }
 0x43e   : > { %v1591_v46 = vpop.f32.mrf.mxu0 }
 0x43f   : > { %v1597_v19 = vadd.f32 %v1591_v46, %v1515_v43 }
 0x441   : > { %vm1601_vm9 = vcmp.ge.f32.partialorder %v1597_v19, 0.0  ;;  %v1605_v53 = vmul.f32 0.01, %v1597_v19 }
 0x443   : > { %v1609_v54 = vsel %vm1601_vm9, %v1597_v19, %v1605_v53 }
 0x444   : > { %4375 = vmatmul.msk.f32.gmra.mxu2 %vm1622_vm6, %v1609_v54  ;;  %4391 = vmatmul.msk.f32.gmra.mxu1 %vm1622_vm6, %v1609_v54 }
 0x44c   : > { %4412 = vmatmul.msk.f32.vlgmr.msrb.gmra.mxu2 %vm1622_vm6, %v1606_v41  ;;  %v4418_v41 = vld [vmem:[%s7347_s13 + $0x90] sm:$0xff]  ;;  %s4920_s13 = scalar_lea.hbm %s4919_s11, 1 }
 0x44d   : > { %p4921_p11 = scmp.ne.s32.totalorder %s4919_s11, %s4920_s13  ;;  %p4926_p1 = scmp.lt.s32.totalorder %s4924_s7, %s4920_s13 }
 0x44f   : > { %p4922_p12 = pnand %p4921_p11, %p5162_p5  ;;  %p4927_p2 = por %p4926_p1, %p4925_p0 }
 0x451   : > { %p4923_p13 = pneg %p4922_p12 }
 0x453   : > { %p4928_p3 = pnand %p4927_p2, %p4923_p13 }
 0x454   : > { %4413 = vmatmul.msk.f32.gmra.mxu2 %vm1622_vm6, %v1607_v51  ;;  %v2058_v51 = vld [vmem:[%s7271_s15 + $0x8] sm:$0xff] }
 0x455   : > { %2098 = vmatpush.msra.mxu2 %v2058_v51 }
 0x457   : > { %2099 = vmatpush.msra.mxu2 %v2057_v35 }
 0x45c   : > { %4414 = vmatmul.msk.f32.gmra.mxu2 %vm1622_vm6, %v1608_v45 }
 0x464   : > { %4415 = vmatmul.msk.f32.gmra.mxu2 %vm1622_vm6, %v1609_v54 }
 0x4a9   : > { %v1807_v56 = vpop.f32.mrf.mxu1 }
 0x4af   : > { %v1652_v58 = vpop.f32.mrf.mxu2 }
 0x4b1   : > { %v1810_v48 = vpop.f32.mrf.mxu1 }
 0x4b7   : > { %v1655_v60 = vpop.f32.mrf.mxu2 }
 0x4b9   : > { %v1813_v62 = vpop.f32.mrf.mxu1 }
 0x4bf   : > { %v1658_v63 = vpop.f32.mrf.mxu2 }
 0x4c1   : > { %v1816_v50 = vpop.f32.mrf.mxu1 }
 0x4c2   : > { %1864 = vmatpush.msra.mxu0 %v1816_v50 }
 0x4c4   : > { %1865 = vmatpush.msra.mxu0 %v1813_v62 }
 0x4c6   : > { %1866 = vmatpush.msra.mxu0 %v1810_v48 }
 0x4c7   : > { %v1661_v3 = vpop.f32.mrf.mxu2 }
 0x4c8   : > { %1708 = vmatpush.msra.mxu3 %v1661_v3  ;;  %1867 = vmatpush.msra.mxu0 %v1807_v56 }
 0x4c9   : > { %4400 = vmatmul.msk.f32.vlgmr.msra.gmra.mxu0 %vm1622_vm6, %v4392_v4 }
 0x4ca   : > { %1709 = vmatpush.msra.mxu3 %v1658_v63  ;;  %2367 = vmatpush.msrb.mxu0 %v4457_v61 }
 0x4cc   : > { %1710 = vmatpush.msra.mxu3 %v1655_v60  ;;  %2368 = vmatpush.msrb.mxu0 %v4456_v36 }
 0x4ce   : > { %1711 = vmatpush.msra.mxu3 %v1652_v58 }
 0x4cf   : > { %4376 = vmatmul.msk.f32.vlgmr.msra.gmra.mxu3 %vm1622_vm6, %v1664_v5  ;;  %v1923_v14 = vpop.f32.mrf.mxu2 }
 0x4d1   : > { %4401 = vmatmul.msk.f32.gmra.mxu0 %vm1622_vm6, %v4393_v12  ;;  %v1755_v12 = vpop.permute.xlu1 %1754 }
 0x4d7   : > { %4377 = vmatmul.msk.f32.gmra.mxu3 %vm1622_vm6, %v1665_v15  ;;  %v1926_v7 = vpop.f32.mrf.mxu2 }
 0x4d9   : > { %4402 = vmatmul.msk.f32.gmra.mxu0 %vm1622_vm6, %v4394_v49  ;;  %v1770_v61 = vpop.permute.xlu1 %1769 }
 0x4df   : > { %4378 = vmatmul.msk.f32.gmra.mxu3 %vm1622_vm6, %v1666_v52  ;;  %v1929_v18 = vpop.f32.mrf.mxu2  ;;  %v4499_v52 = vld [vmem:[%s7271_s15 + $0x28] sm:$0xff] }
 0x4e0   : > { %2557 = vmatpush.msrb.mxu2 %v4499_v52 }
 0x4e1   : > { %4403 = vmatmul.msk.f32.gmra.mxu0 %vm1622_vm6, %v4395_v29 }
 0x4e7   : > { %4379 = vmatmul.msk.f32.gmra.mxu3 %vm1622_vm6, %v1667_v1  ;;  %v1932_v20 = vpop.f32.mrf.mxu2 }
 0x4e8   : > { %1980 = vmatpush.msra.mxu1 %v1932_v20 }
 0x4e9   : > { %4404 = vmatmul.msk.f32.gmra.mxu0 %vm1622_vm6, %v4396_v23  ;;  %v1760_v23 = vpop.permute.xlu2 %1759 }
 0x4ea   : > { %1981 = vmatpush.msra.mxu1 %v1929_v18 }
 0x4ec   : > { %1982 = vmatpush.msra.mxu1 %v1926_v7 }
 0x4ee   : > { %1983 = vmatpush.msra.mxu1 %v1923_v14 }
 0x4ef   : > { %4380 = vmatmul.msk.f32.gmra.mxu3 %vm1622_vm6, %v1668_v21  ;;  %4424 = vmatmul.msk.f32.vlgmr.msra.gmra.mxu1 %vm1622_vm6, %v4416_v22 }
 0x4f1   : > { %4405 = vmatmul.msk.f32.gmra.mxu0 %vm1622_vm6, %v4397_v9 }
 0x4f7   : > { %4381 = vmatmul.msk.f32.gmra.mxu3 %vm1622_vm6, %v1669_v24  ;;  %4425 = vmatmul.msk.f32.gmra.mxu1 %vm1622_vm6, %v4417_v26  ;;  %v4498_v24 = vld [vmem:[%s7271_s15 + $0x20] sm:$0xff] }
 0x4f8   : > { %2558 = vmatpush.msrb.mxu2 %v4498_v24 }
 0x4f9   : > { %4406 = vmatmul.msk.f32.gmra.mxu0 %vm1622_vm6, %v4398_v28 }
 0x4ff   : > { %4382 = vmatmul.msk.f32.gmra.mxu3 %vm1622_vm6, %v1670_v6  ;;  %4426 = vmatmul.msk.f32.gmra.mxu1 %vm1622_vm6, %v4418_v41 }
 0x501   : > { %4407 = vmatmul.msk.f32.gmra.mxu0 %vm1622_vm6, %v4399_v27  ;;  %v1765_v27 = vpop.permute.xlu0 %1764 }
 0x507   : > { %4383 = vmatmul.msk.f32.gmra.mxu3 %vm1622_vm6, %v1671_v30  ;;  %4427 = vmatmul.msk.f32.gmra.mxu1 %vm1622_vm6, %v4419_v38 }
 0x50f   : > { %4428 = vmatmul.msk.f32.gmra.mxu1 %vm1622_vm6, %v4420_v31 }
 0x517   : > { %4429 = vmatmul.msk.f32.gmra.mxu1 %vm1622_vm6, %v4421_v32 }
 0x51f   : > { %4430 = vmatmul.msk.f32.gmra.mxu1 %vm1622_vm6, %v4422_v34 }
 0x527   : > { %4431 = vmatmul.msk.f32.gmra.mxu1 %vm1622_vm6, %v4423_v40 }
 0x546   : > { %v1869_v37 = vpop.f32.mrf.mxu0 }
 0x54e   : > { %v1872_v45 = vpop.f32.mrf.mxu0 }
 0x552   : > { %v1713_v39 = vpop.f32.mrf.mxu3 }
 0x553   : > { %v1777_v43 = vadd.f32 %v1740_v44, %v1713_v39 }
 0x555   : > { %v1893_v46 = vadd.f32 %v1869_v37, %v1777_v43 }
 0x556   : > { %v1875_v55 = vpop.f32.mrf.mxu0 }
 0x55a   : > { %v1716_v42 = vpop.f32.mrf.mxu3 }
 0x55b   : > { %v1778_v56 = vadd.f32 %v1745_v33, %v1716_v42 }
 0x55d   : > { %v1894_v48 = vadd.f32 %v1872_v45, %v1778_v56 }
 0x55e   : > { %v1878_v2 = vpop.f32.mrf.mxu0 }
 0x562   : > { %v1719_v19 = vpop.f32.mrf.mxu3 }
 0x563   : > { %v1779_v63 = vadd.f32 %v1750_v47, %v1719_v19 }
 0x565   : > { %v1895_v3 = vadd.f32 %v1875_v55, %v1779_v63 }
 0x566   : > { %v1881_v7 = vpop.f32.mrf.mxu0 }
 0x56a   : > { %v1722_v59 = vpop.f32.mrf.mxu3 }
 0x56b   : > { %v1780_v11 = vadd.f32 %v1755_v12, %v1722_v59 }
 0x56c   : > { %v1985_v53 = vpop.f32.mrf.mxu1 }
 0x56d   : > { %v2009_v54 = vadd.f32 %v1985_v53, %v1893_v46  ;;  %v1896_v29 = vadd.f32 %v1878_v2, %v1780_v11  ;;  %v1775_v46 = vpop.permute.xlu2 %1774 }
 0x56e   : > { %v1884_v28 = vpop.f32.mrf.mxu0 }
 0x56f   : > { %vm2017_vm10 = vcmp.ge.f32.partialorder %v2009_v54, 0.0  ;;  %v2025_v57 = vmul.f32 0.01, %v2009_v54 }
 0x571   : > { %v5922_v58 = vsel %vm2017_vm10, %v2009_v54, %v2025_v57 }
 0x572   : > { %4432 = vmatmul.msk.f32.vlgmr.msra.gmra.mxu2 %vm2059_vm11, %v5922_v58  ;;  %4458 = vmatmul.msk.f32.vlgmr.msrb.gmra.mxu0 %vm2059_vm11, %v5922_v58  ;;  %v1725_v14 = vpop.f32.mrf.mxu3 }
 0x573   : > { %v1781_v20 = vadd.f32 %v1760_v23, %v1725_v14  ;;  %v2126_v23 = vld [vmem:[%s7272_s16 + $0x8] sm:$0xff] }
 0x574   : > { %v1988_v60 = vpop.f32.mrf.mxu1 }
 0x575   : > { %v2010_v62 = vadd.f32 %v1988_v60, %v1894_v48  ;;  %v1897_v26 = vadd.f32 %v1881_v7, %v1781_v20  ;;  %v4466_v7 = vld [vmem:[%s7272_s16 + $0x80] sm:$0xff]  ;;  %v4468_v20 = vld [vmem:[%s7272_s16 + $0x90] sm:$0xff] }
 0x576   : > { %v1887_v35 = vpop.f32.mrf.mxu0 }
 0x577   : > { %v2026_v50 = vmul.f32 0.01, %v2010_v62  ;;  %vm2018_vm12 = vcmp.ge.f32.partialorder %v2010_v62, 0.0 }
 0x579   : > { %v5928_v4 = vsel %vm2018_vm12, %v2010_v62, %v2026_v50 }
 0x57a   : > { %4433 = vmatmul.msk.f32.gmra.mxu2 %vm2059_vm11, %v5928_v4  ;;  %4459 = vmatmul.msk.f32.gmra.mxu0 %vm2059_vm11, %v5928_v4  ;;  %v1728_v22 = vpop.f32.mrf.mxu3 }
 0x57b   : > { %v1782_v30 = vadd.f32 %v1765_v27, %v1728_v22  ;;  %v2127_v22 = vld [vmem:[%s7272_s16 + $0x10] sm:$0xff]  ;;  %v4471_v27 = vld [vmem:[%s7272_s16 + $0xa8] sm:$0xff] }
 0x57c   : > { %v1991_v5 = vpop.f32.mrf.mxu1 }
 0x57d   : > { %v2011_v25 = vadd.f32 %v1991_v5, %v1895_v3  ;;  %v1898_v34 = vadd.f32 %v1884_v28, %v1782_v30  ;;  %v4470_v28 = vld [vmem:[%s7272_s16 + $0xa0] sm:$0xff] }
 0x57e   : > { %v1890_v54 = vpop.f32.mrf.mxu0 }
 0x57f   : > { %v2027_v15 = vmul.f32 0.01, %v2011_v25  ;;  %vm2019_vm13 = vcmp.ge.f32.partialorder %v2011_v25, 0.0 }
 0x581   : > { %v5934_v49 = vsel %vm2019_vm13, %v2011_v25, %v2027_v15 }
 0x582   : > { %4434 = vmatmul.msk.f32.gmra.mxu2 %vm2059_vm11, %v5934_v49  ;;  %4460 = vmatmul.msk.f32.gmra.mxu0 %vm2059_vm11, %v5934_v49  ;;  %v1731_v32 = vpop.f32.mrf.mxu3 }
 0x583   : > { %v1783_v36 = vadd.f32 %v1770_v61, %v1731_v32  ;;  %v2132_v61 = vld [vmem:[%s7272_s16 + $0x38] sm:$0xff] }
 0x584   : > { %v1994_v18 = vpop.f32.mrf.mxu1 }
 0x585   : > { %v2012_v1 = vadd.f32 %v1994_v18, %v1896_v29  ;;  %v1899_v42 = vadd.f32 %v1887_v35, %v1783_v36  ;;  %v2125_v29 = vld [vmem:[%s7272_s16] sm:$0xff]  ;;  %v4467_v18 = vld [vmem:[%s7272_s16 + $0x88] sm:$0xff] }
 0x586   : > { %v4474_v35 = vld [vmem:[%s7272_s16 + $0xc0] sm:$0xff] }
 0x587   : > { %v2028_v21 = vmul.f32 0.01, %v2012_v1  ;;  %vm2020_vm14 = vcmp.ge.f32.partialorder %v2012_v1, 0.0  ;;  %v2133_v36 = vld [vmem:[%s7272_s16 + $0x40] sm:$0xff] }
 0x589   : > { %v2036_v9 = vsel %vm2020_vm14, %v2012_v1, %v2028_v21 }
 0x58a   : > { %4435 = vmatmul.msk.f32.gmra.mxu2 %vm2059_vm11, %v2036_v9  ;;  %4461 = vmatmul.msk.f32.gmra.mxu0 %vm2059_vm11, %v2036_v9  ;;  %v1734_v44 = vpop.f32.mrf.mxu3 }
 0x58b   : > { %v1784_v19 = vadd.f32 %v1775_v46, %v1734_v44  ;;  %v4509_v44 = vld [vmem:[%s7272_s16 + $0x108] sm:$0xff]  ;;  %v4685_v46 = vld [vmem:[%s7277_s21 + $0xb0] sm:$0xff] }
 0x58c   : > { %v1997_v6 = vpop.f32.mrf.mxu1 }
 0x58d   : > { %v2013_v41 = vadd.f32 %v1997_v6, %v1897_v26  ;;  %v1900_v55 = vadd.f32 %v1890_v54, %v1784_v19  ;;  %v2128_v26 = vld [vmem:[%s7272_s16 + $0x18] sm:$0xff]  ;;  %v4684_v19 = vld [vmem:[%s7277_s21 + $0xa8] sm:$0xff]  ;;  %v4510_v54 = vld [vmem:[%s7272_s16 + $0x110] sm:$0xff] }
 0x58f   : > { %v2029_v38 = vmul.f32 0.01, %v2013_v41  ;;  %vm2021_vm15 = vcmp.ge.f32.partialorder %v2013_v41, 0.0 }
 0x591   : > { %v2037_v31 = vsel %vm2021_vm15, %v2013_v41, %v2029_v38  ;;  %v2129_v41 = vld [vmem:[%s7272_s16 + $0x20] sm:$0xff]  ;;  %v2130_v38 = vld [vmem:[%s7272_s16 + $0x28] sm:$0xff] }
 0x592   : > { %4436 = vmatmul.msk.f32.gmra.mxu2 %vm2059_vm11, %v2037_v31  ;;  %4462 = vmatmul.msk.f32.gmra.mxu0 %vm2059_vm11, %v2037_v31 }
 0x594   : > { %v2000_v40 = vpop.f32.mrf.mxu1 }
 0x595   : > { %v2014_v51 = vadd.f32 %v2000_v40, %v1898_v34  ;;  %v2131_v34 = vld [vmem:[%s7272_s16 + $0x30] sm:$0xff]  ;;  %v4473_v40 = vld [vmem:[%s7272_s16 + $0xb8] sm:$0xff] }
 0x597   : > { %v2030_v39 = vmul.f32 0.01, %v2014_v51  ;;  %vm2022_vm0 = vcmp.ge.f32.partialorder %v2014_v51, 0.0 }
 0x599   : > { %v2038_v37 = vsel %vm2022_vm0, %v2014_v51, %v2030_v39  ;;  %v4508_v39 = vld [vmem:[%s7272_s16 + $0x100] sm:$0xff] }
 0x59a   : > { %4437 = vmatmul.msk.f32.gmra.mxu2 %vm2059_vm11, %v2038_v37  ;;  %4463 = vmatmul.msk.f32.gmra.mxu0 %vm2059_vm11, %v2038_v37 }
 0x59c   : > { %v2003_v45 = vpop.f32.mrf.mxu1 }
 0x59d   : > { %v2015_v43 = vadd.f32 %v2003_v45, %v1899_v42  ;;  %v2134_v42 = vld [vmem:[%s7272_s16 + $0x48] sm:$0xff]  ;;  %v4476_v45 = vld [vmem:[%s7272_s16 + $0xd0] sm:$0xff] }
 0x59f   : > { %v2031_v53 = vmul.f32 0.01, %v2015_v43  ;;  %vm2023_vm1 = vcmp.ge.f32.partialorder %v2015_v43, 0.0 }
 0x5a1   : > { %v2039_v33 = vsel %vm2023_vm1, %v2015_v43, %v2031_v53  ;;  %v4686_v43 = vld [vmem:[%s7277_s21 + $0xb8] sm:$0xff]  ;;  %v2135_v53 = vld [vmem:[%s7272_s16 + $0x50] sm:$0xff] }
 0x5a2   : > { %4438 = vmatmul.msk.f32.gmra.mxu2 %vm2059_vm11, %v2039_v33  ;;  %4464 = vmatmul.msk.f32.gmra.mxu0 %vm2059_vm11, %v2039_v33 }
 0x5a4   : > { %v2006_v56 = vpop.f32.mrf.mxu1 }
 0x5a5   : > { %v2016_v57 = vadd.f32 %v2006_v56, %v1900_v55  ;;  %v4683_v55 = vld [vmem:[%s7277_s21 + $0xa0] sm:$0xff]  ;;  %v4682_v56 = vld [vmem:[%s7277_s21 + $0x98] sm:$0xff] }
 0x5a7   : > { %v2032_v48 = vmul.f32 0.01, %v2016_v57  ;;  %vm2024_vm3 = vcmp.ge.f32.partialorder %v2016_v57, 0.0 }
 0x5a9   : > { %v2040_v59 = vsel %vm2024_vm3, %v2016_v57, %v2032_v48  ;;  %v4681_v57 = vld [vmem:[%s7277_s21 + $0x90] sm:$0xff]  ;;  %v2136_v48 = vld [vmem:[%s7272_s16 + $0x58] sm:$0xff] }
 0x5aa   : > { %4439 = vmatmul.msk.f32.gmra.mxu2 %vm2059_vm11, %v2040_v59  ;;  %4465 = vmatmul.msk.f32.gmra.mxu0 %vm2059_vm11, %v2040_v59 }
 0x5b2   : > { %4500 = vmatmul.msk.f32.vlgmr.msrb.gmra.mxu2 %vm2059_vm11, %v5922_v58 }
 0x5ba   : > { %4501 = vmatmul.msk.f32.gmra.mxu2 %vm2059_vm11, %v5928_v4 }
 0x5c2   : > { %4502 = vmatmul.msk.f32.gmra.mxu2 %vm2059_vm11, %v5934_v49 }
 0x5ca   : > { %4503 = vmatmul.msk.f32.gmra.mxu2 %vm2059_vm11, %v2036_v9  ;;  %v4469_v9 = vld [vmem:[%s7272_s16 + $0x98] sm:$0xff] }
 0x5d2   : > { %4504 = vmatmul.msk.f32.gmra.mxu2 %vm2059_vm11, %v2037_v31  ;;  %v4472_v31 = vld [vmem:[%s7272_s16 + $0xb0] sm:$0xff] }
 0x5da   : > { %4505 = vmatmul.msk.f32.gmra.mxu2 %vm2059_vm11, %v2038_v37  ;;  %v4475_v37 = vld [vmem:[%s7272_s16 + $0xc8] sm:$0xff] }
 0x5e2   : > { %4506 = vmatmul.msk.f32.gmra.mxu2 %vm2059_vm11, %v2039_v33  ;;  %v4477_v33 = vld [vmem:[%s7272_s16 + $0xd8] sm:$0xff] }
 0x5ea   : > { %4507 = vmatmul.msk.f32.gmra.mxu2 %vm2059_vm11, %v2040_v59  ;;  %v4511_v59 = vld [vmem:[%s7272_s16 + $0x118] sm:$0xff] }
 0x5ef   : > { %v2370_v60 = vpop.f32.mrf.mxu0 }
 0x5f5   : > { %v2101_v62 = vpop.f32.mrf.mxu2 }
 0x5f7   : > { %v2373_v47 = vpop.f32.mrf.mxu0 }
 0x5fd   : > { %v2104_v58 = vpop.f32.mrf.mxu2 }
 0x5ff   : > { %v2376_v63 = vpop.f32.mrf.mxu0 }
 0x605   : > { %v2107_v50 = vpop.f32.mrf.mxu2 }
 0x607   : > { %v2379_v2 = vpop.f32.mrf.mxu0 }
 0x60d   : > { %v2110_v4 = vpop.f32.mrf.mxu2 }
 0x60f   : > { %v2382_v3 = vpop.f32.mrf.mxu0 }
 0x615   : > { %v2113_v5 = vpop.f32.mrf.mxu2 }
 0x617   : > { %v2385_v25 = vpop.f32.mrf.mxu0 }
 0x61d   : > { %v2116_v12 = vpop.f32.mrf.mxu2 }
 0x61f   : > { %v2388_v14 = vpop.f32.mrf.mxu0 }
 0x625   : > { %v2119_v11 = vpop.f32.mrf.mxu2 }
 0x627   : > { %v2391_v15 = vpop.f32.mrf.mxu0 }
 0x628   : > { %2467 = vmatpush.msrb.mxu1 %v2391_v15  ;;  %v4516_v15 = vld [vmem:[%s7272_s16 + $0x140] sm:$0xff] }
 0x62a   : > { %2468 = vmatpush.msrb.mxu1 %v2388_v14  ;;  %v2140_v14 = vld [vmem:[%s7272_s16 + $0x78] sm:$0xff] }
 0x62c   : > { %2469 = vmatpush.msrb.mxu1 %v2385_v25  ;;  %v4514_v25 = vld [vmem:[%s7272_s16 + $0x130] sm:$0xff] }
 0x62d   : > { %v2122_v49 = vpop.f32.mrf.mxu2 }
 0x62e   : > { %2197 = vmatpush.msrb.mxu3 %v2122_v49  ;;  %2470 = vmatpush.msrb.mxu1 %v2382_v3  ;;  %v4480_v3 = vld [vmem:[%s7272_s16 + $0xf0] sm:$0xff]  ;;  %v4517_v49 = vld [vmem:[%s7272_s16 + $0x148] sm:$0xff] }
 0x630   : > { %2198 = vmatpush.msrb.mxu3 %v2119_v11  ;;  %2471 = vmatpush.msrb.mxu1 %v2379_v2  ;;  %v2138_v2 = vld [vmem:[%s7272_s16 + $0x68] sm:$0xff]  ;;  %v4515_v11 = vld [vmem:[%s7272_s16 + $0x138] sm:$0xff] }
 0x632   : > { %2199 = vmatpush.msrb.mxu3 %v2116_v12  ;;  %2472 = vmatpush.msrb.mxu1 %v2376_v63  ;;  %v4512_v63 = vld [vmem:[%s7272_s16 + $0x120] sm:$0xff]  ;;  %v4481_v12 = vld [vmem:[%s7272_s16 + $0xf8] sm:$0xff] }
 0x634   : > { %2200 = vmatpush.msrb.mxu3 %v2113_v5  ;;  %2473 = vmatpush.msrb.mxu1 %v2373_v47  ;;  %v4679_v47 = vld [vmem:[%s7277_s21 + $0x80] sm:$0xff]  ;;  %v2139_v5 = vld [vmem:[%s7272_s16 + $0x70] sm:$0xff] }
 0x635   : > { %v2560_v52 = vpop.f32.mrf.mxu2 }
 0x636   : > { %2201 = vmatpush.msrb.mxu3 %v2110_v4  ;;  %2474 = vmatpush.msrb.mxu1 %v2370_v60  ;;  %v4478_v60 = vld [vmem:[%s7272_s16 + $0xe0] sm:$0xff]  ;;  %v4513_v4 = vld [vmem:[%s7272_s16 + $0x128] sm:$0xff] }
 0x637   : > { %4482 = vmatmul.msk.f32.vlgmr.msrb.gmra.mxu1 %vm1336_vm2, %v4466_v7  ;;  %v4518_v7 = vld [vmem:[%s7272_s16 + $0x150] sm:$0xff] }
 0x638   : > { %2202 = vmatpush.msrb.mxu3 %v2107_v50  ;;  %4101 = vmatpush.msra.mxu1 %v4686_v43  ;;  %v4479_v50 = vld [vmem:[%s7272_s16 + $0xe8] sm:$0xff] }
 0x63a   : > { %2203 = vmatpush.msrb.mxu3 %v2104_v58  ;;  %4102 = vmatpush.msra.mxu1 %v4685_v46  ;;  %v2137_v58 = vld [vmem:[%s7272_s16 + $0x60] sm:$0xff] }
 0x63c   : > { %2204 = vmatpush.msrb.mxu3 %v2101_v62  ;;  %4103 = vmatpush.msra.mxu1 %v4684_v19  ;;  %v4680_v62 = vld [vmem:[%s7277_s21 + $0x88] sm:$0xff] }
 0x63d   : > { %4440 = vmatmul.msk.f32.vlgmr.msrb.gmra.mxu3 %vm1336_vm2, %v2125_v29  ;;  %v2563_v1 = vpop.f32.mrf.mxu2 }
 0x63e   : > { %4104 = vmatpush.msra.mxu1 %v4683_v55 }
 0x63f   : > { %4483 = vmatmul.msk.f32.gmra.mxu1 %vm1336_vm2, %v4467_v18 }
 0x640   : > { %4105 = vmatpush.msra.mxu1 %v4682_v56 }
 0x642   : > { %4106 = vmatpush.msra.mxu1 %v4681_v57 }
 0x644   : > { %4107 = vmatpush.msra.mxu1 %v4680_v62 }
 0x645   : > { %4441 = vmatmul.msk.f32.gmra.mxu3 %vm1336_vm2, %v2126_v23  ;;  %v2566_v21 = vpop.f32.mrf.mxu2 }
 0x646   : > { %4108 = vmatpush.msra.mxu1 %v4679_v47 }
 0x647   : > { %4484 = vmatmul.msk.f32.gmra.mxu1 %vm1336_vm2, %v4468_v20  ;;  %v4521_v20 = vld [vmem:[%s7272_s16 + $0x168] sm:$0xff] }
 0x64d   : > { %4442 = vmatmul.msk.f32.gmra.mxu3 %vm1336_vm2, %v2127_v22  ;;  %v2569_v24 = vpop.f32.mrf.mxu2 }
 0x64f   : > { %4485 = vmatmul.msk.f32.gmra.mxu1 %vm1336_vm2, %v4469_v9  ;;  %v4522_v9 = vld [vmem:[%s7272_s16 + $0x170] sm:$0xff] }
 0x655   : > { %4443 = vmatmul.msk.f32.gmra.mxu3 %vm1336_vm2, %v2128_v26  ;;  %v2572_v6 = vpop.f32.mrf.mxu2 }
 0x657   : > { %4486 = vmatmul.msk.f32.gmra.mxu1 %vm1336_vm2, %v4470_v28  ;;  %v4523_v28 = vld [vmem:[%s7272_s16 + $0x178] sm:$0xff] }
 0x65d   : > { %4444 = vmatmul.msk.f32.gmra.mxu3 %vm1336_vm2, %v2129_v41  ;;  %v2575_v30 = vpop.f32.mrf.mxu2 }
 0x65f   : > { %4487 = vmatmul.msk.f32.gmra.mxu1 %vm1336_vm2, %v4471_v27 }
 0x665   : > { %4445 = vmatmul.msk.f32.gmra.mxu3 %vm1336_vm2, %v2130_v38  ;;  %v2578_v32 = vpop.f32.mrf.mxu2 }
 0x667   : > { %4488 = vmatmul.msk.f32.gmra.mxu1 %vm1336_vm2, %v4472_v31 }
 0x66d   : > { %4446 = vmatmul.msk.f32.gmra.mxu3 %vm1336_vm2, %v2131_v34  ;;  %v2581_v51 = vpop.f32.mrf.mxu2 }
 0x66e   : > { %2657 = vmatpush.msra.mxu0 %v2581_v51 }
 0x66f   : > { %4489 = vmatmul.msk.f32.gmra.mxu1 %vm1336_vm2, %v4473_v40 }
 0x670   : > { %2658 = vmatpush.msra.mxu0 %v2578_v32  ;;  %v2262_v32 = vpop.permute.xlu1 %2261 }
 0x672   : > { %2659 = vmatpush.msra.mxu0 %v2575_v30 }
 0x674   : > { %2660 = vmatpush.msra.mxu0 %v2572_v6  ;;  %v2257_v6 = vpop.permute.xlu0 %2256 }
 0x675   : > { %4447 = vmatmul.msk.f32.gmra.mxu3 %vm1336_vm2, %v2132_v61 }
 0x676   : > { %2661 = vmatpush.msra.mxu0 %v2569_v24 }
 0x677   : > { %4490 = vmatmul.msk.f32.gmra.mxu1 %vm1336_vm2, %v4474_v35 }
 0x678   : > { %2662 = vmatpush.msra.mxu0 %v2566_v21 }
 0x67a   : > { %2663 = vmatpush.msra.mxu0 %v2563_v1  ;;  %v4520_v1 = vld [vmem:[%s7272_s16 + $0x160] sm:$0xff] }
 0x67c   : > { %2664 = vmatpush.msra.mxu0 %v2560_v52  ;;  %v4519_v52 = vld [vmem:[%s7272_s16 + $0x158] sm:$0xff] }
 0x67d   : > { %4448 = vmatmul.msk.f32.gmra.mxu3 %vm1336_vm2, %v2133_v36  ;;  %4524 = vmatmul.msk.f32.vlgmr.msra.gmra.mxu0 %vm1336_vm2, %v4508_v39 }
 0x67f   : > { %4491 = vmatmul.msk.f32.gmra.mxu1 %vm1336_vm2, %v4475_v37 }
 0x685   : > { %4449 = vmatmul.msk.f32.gmra.mxu3 %vm1336_vm2, %v2134_v42  ;;  %4525 = vmatmul.msk.f32.gmra.mxu0 %vm1336_vm2, %v4509_v44  ;;  %v2267_v42 = vpop.permute.xlu2 %2266 }
 0x687   : > { %4492 = vmatmul.msk.f32.gmra.mxu1 %vm1336_vm2, %v4476_v45 }
 0x68d   : > { %4450 = vmatmul.msk.f32.gmra.mxu3 %vm1336_vm2, %v2135_v53  ;;  %4526 = vmatmul.msk.f32.gmra.mxu0 %vm1336_vm2, %v4510_v54 }
 0x68f   : > { %4493 = vmatmul.msk.f32.gmra.mxu1 %vm1336_vm2, %v4477_v33  ;;  %v2272_v33 = vpop.permute.xlu0 %2271 }
 0x695   : > { %4451 = vmatmul.msk.f32.gmra.mxu3 %vm1336_vm2, %v2136_v48  ;;  %4527 = vmatmul.msk.f32.gmra.mxu0 %vm1336_vm2, %v4511_v59 }
 0x697   : > { %4494 = vmatmul.msk.f32.gmra.mxu1 %vm1336_vm2, %v4478_v60 }
 0x69d   : > { %4452 = vmatmul.msk.f32.gmra.mxu3 %vm1336_vm2, %v2137_v58  ;;  %4528 = vmatmul.msk.f32.gmra.mxu0 %vm1336_vm2, %v4512_v63  ;;  %v2277_v58 = vpop.permute.xlu1 %2276 }
 0x69f   : > { %4495 = vmatmul.msk.f32.gmra.mxu1 %vm1336_vm2, %v4479_v50 }
 0x6a5   : > { %4453 = vmatmul.msk.f32.gmra.mxu3 %vm1336_vm2, %v2138_v2  ;;  %4529 = vmatmul.msk.f32.gmra.mxu0 %vm1336_vm2, %v4513_v4 }
 0x6a7   : > { %4496 = vmatmul.msk.f32.gmra.mxu1 %vm1336_vm2, %v4480_v3 }
 0x6ad   : > { %4454 = vmatmul.msk.f32.gmra.mxu3 %vm1336_vm2, %v2139_v5  ;;  %4530 = vmatmul.msk.f32.gmra.mxu0 %vm1336_vm2, %v4514_v25 }
 0x6af   : > { %4497 = vmatmul.msk.f32.gmra.mxu1 %vm1336_vm2, %v4481_v12 }
 0x6b4   : > { %v2476_v18 = vpop.f32.mrf.mxu1 }
 0x6b5   : > { %4455 = vmatmul.msk.f32.gmra.mxu3 %vm1336_vm2, %v2140_v14  ;;  %4531 = vmatmul.msk.f32.gmra.mxu0 %vm1336_vm2, %v4515_v11  ;;  %v2282_v14 = vpop.permute.xlu2 %2281 }
 0x6b7   : > { %4687 = vmatmul.msk.f32.vlgmr.msra.gmra.mxu1 %vm1336_vm2, %v5597_v16  ;;  %v2778_v16 = vld [vmem:[%s7274_s18] sm:$0xff] }
 0x6b8   : > { %2843 = vmatpush.msra.mxu2 %v2778_v16 }
 0x6bc   : > { %v2479_v21 = vpop.f32.mrf.mxu1 }
 0x6bd   : > { %4532 = vmatmul.msk.f32.gmra.mxu0 %vm1336_vm2, %v4516_v15 }
 0x6c0   : > { %v2206_v29 = vpop.f32.mrf.mxu3 }
 0x6c1   : > { %v2334_v41 = vadd.f32 %v2257_v6, %v2206_v29 }
 0x6c3   : > { %v2524_v30 = vadd.f32 %v2476_v18, %v2334_v41  ;;  %v2287_v18 = vpop.permute.xlu0 %2286 }
 0x6c4   : > { %v2482_v24 = vpop.f32.mrf.mxu1 }
 0x6c5   : > { %4533 = vmatmul.msk.f32.gmra.mxu0 %vm1336_vm2, %v4517_v49 }
 0x6c8   : > { %v2209_v23 = vpop.f32.mrf.mxu3 }
 0x6c9   : > { %v2335_v40 = vadd.f32 %v2262_v32, %v2209_v23 }
 0x6cb   : > { %v2525_v35 = vadd.f32 %v2479_v21, %v2335_v40 }
 0x6cc   : > { %v2485_v27 = vpop.f32.mrf.mxu1 }
 0x6cd   : > { %4534 = vmatmul.msk.f32.gmra.mxu0 %vm1336_vm2, %v4518_v7 }
 0x6d0   : > { %v2212_v22 = vpop.f32.mrf.mxu3 }
 0x6d1   : > { %v2336_v44 = vadd.f32 %v2267_v42, %v2212_v22 }
 0x6d3   : > { %v2526_v19 = vadd.f32 %v2482_v24, %v2336_v44  ;;  %v2302_v44 = vpop.permute.xlu0 %2301 }
 0x6d4   : > { %v2488_v36 = vpop.f32.mrf.mxu1 }
 0x6d5   : > { %4535 = vmatmul.msk.f32.gmra.mxu0 %vm1336_vm2, %v4519_v52 }
 0x6d8   : > { %v2215_v26 = vpop.f32.mrf.mxu3 }
 0x6d9   : > { %v2337_v56 = vadd.f32 %v2272_v33, %v2215_v26 }
 0x6db   : > { %v2527_v60 = vadd.f32 %v2485_v27, %v2337_v56 }
 0x6dc   : > { %v2491_v55 = vpop.f32.mrf.mxu1 }
 0x6dd   : > { %4536 = vmatmul.msk.f32.gmra.mxu0 %vm1336_vm2, %v4520_v1 }
 0x6e0   : > { %v2218_v34 = vpop.f32.mrf.mxu3 }
 0x6e1   : > { %v2338_v63 = vadd.f32 %v2277_v58, %v2218_v34  ;;  %v2297_v34 = vpop.permute.xlu2 %2296 }
 0x6e3   : > { %v2528_v3 = vadd.f32 %v2488_v36, %v2338_v63 }
 0x6e4   : > { %v2494_v2 = vpop.f32.mrf.mxu1 }
 0x6e5   : > { %4537 = vmatmul.msk.f32.gmra.mxu0 %vm1336_vm2, %v4521_v20 }
 0x6e8   : > { %v2221_v43 = vpop.f32.mrf.mxu3 }
 0x6e9   : > { %v2339_v11 = vadd.f32 %v2282_v14, %v2221_v43  ;;  %v2312_v63 = vpop.permute.xlu2 %2311 }
 0x6eb   : > { %v2529_v16 = vadd.f32 %v2491_v55, %v2339_v11  ;;  %v2317_v11 = vpop.permute.xlu0 %2316 }
 0x6ec   : > { %v2497_v7 = vpop.f32.mrf.mxu1 }
 0x6ed   : > { %4538 = vmatmul.msk.f32.gmra.mxu0 %vm1336_vm2, %v4522_v9 }
 0x6f0   : > { %v2224_v59 = vpop.f32.mrf.mxu3 }
 0x6f1   : > { %v2340_v23 = vadd.f32 %v2287_v18, %v2224_v59 }
 0x6f3   : > { %v2530_v22 = vadd.f32 %v2494_v2, %v2340_v23 }
 0x6f4   : > { %v2500_v9 = vpop.f32.mrf.mxu1 }
 0x6f5   : > { %4539 = vmatmul.msk.f32.gmra.mxu0 %vm1336_vm2, %v4523_v28  ;;  %v2292_v28 = vpop.permute.xlu1 %2291 }
 0x6f8   : > { %v2227_v5 = vpop.f32.mrf.mxu3 }
 0x6f9   : > { %v2341_v6 = vadd.f32 %v2292_v28, %v2227_v5 }
 0x6fa   : > { %v2666_v38 = vpop.f32.mrf.mxu0 }
 0x6fb   : > { %v2714_v31 = vadd.f32 %v2666_v38, %v2524_v30  ;;  %v2531_v38 = vadd.f32 %v2497_v7, %v2341_v6  ;;  %v2327_v6 = vpop.permute.xlu2 %2326 }
 0x6fc   : > { %v2503_v40 = vpop.f32.mrf.mxu1 }
 0x6fd   : > { %vm2730_vm4 = vcmp.ge.f32.partialorder %v2714_v31, 0.0  ;;  %v2746_v51 = vmul.f32 0.01, %v2714_v31  ;;  %v2307_v56 = vpop.permute.xlu1 %2306 }
 0x6ff   : > { %v2762_v61 = vsel %vm2730_vm4, %v2714_v31, %v2746_v51 }
 0x700   : > { %4540 = vmatmul.msk.f32.vlgmr.msra.gmra.mxu2 %vm2779_vm5, %v2762_v61  ;;  %v2230_v1 = vpop.f32.mrf.mxu3 }
 0x701   : > { %v2342_v51 = vadd.f32 %v2297_v34, %v2230_v1 }
 0x702   : > { %v2669_v39 = vpop.f32.mrf.mxu0 }
 0x703   : > { %v2715_v37 = vadd.f32 %v2669_v39, %v2525_v35  ;;  %v2532_v39 = vadd.f32 %v2500_v9, %v2342_v51  ;;  %v2332_v51 = vpop.permute.xlu0 %2331 }
 0x705   : > { %vm2731_vm7 = vcmp.ge.f32.partialorder %v2715_v37, 0.0  ;;  %v2747_v45 = vmul.f32 0.01, %v2715_v37  ;;  %v2322_v1 = vpop.permute.xlu1 %2321 }
 0x707   : > { %v2763_v46 = vsel %vm2731_vm7, %v2715_v37, %v2747_v45 }
 0x708   : > { %4541 = vmatmul.msk.f32.gmra.mxu2 %vm2779_vm5, %v2763_v46  ;;  %v2233_v27 = vpop.f32.mrf.mxu3  ;;  %v2506_v46 = vpop.f32.mrf.mxu1 }
 0x709   : > { %v2343_v45 = vadd.f32 %v2302_v44, %v2233_v27 }
 0x70a   : > { %v2672_v53 = vpop.f32.mrf.mxu0 }
 0x70b   : > { %v2716_v54 = vadd.f32 %v2672_v53, %v2526_v19  ;;  %v2533_v53 = vadd.f32 %v2503_v40, %v2343_v45 }
 0x70d   : > { %vm2732_vm8 = vcmp.ge.f32.partialorder %v2716_v54, 0.0  ;;  %v2748_v57 = vmul.f32 0.01, %v2716_v54 }
 0x70f   : > { %v2764_v48 = vsel %vm2732_vm8, %v2716_v54, %v2748_v57 }
 0x710   : > { %4542 = vmatmul.msk.f32.gmra.mxu2 %vm2779_vm5, %v2764_v48  ;;  %v2236_v36 = vpop.f32.mrf.mxu3 }
 0x711   : > { %v2344_v57 = vadd.f32 %v2307_v56, %v2236_v36  ;;  %v4976_v56 = vmov 6  }
 0x712   : > { %v2675_v62 = vpop.f32.mrf.mxu0 }
 0x713   : > { %v2717_v47 = vadd.f32 %v2675_v62, %v2527_v60  ;;  %v2509_v60 = vpop.f32.mrf.mxu1  ;;  %v2534_v62 = vadd.f32 %v2506_v46, %v2344_v57 }
 0x715   : > { %vm2733_vm9 = vcmp.ge.f32.partialorder %v2717_v47, 0.0  ;;  %v2749_v50 = vmul.f32 0.01, %v2717_v47 }
 0x717   : > { %v2765_v4 = vsel %vm2733_vm9, %v2717_v47, %v2749_v50 }
 0x718   : > { %4543 = vmatmul.msk.f32.gmra.mxu2 %vm2779_vm5, %v2765_v4  ;;  %v2239_v54 = vpop.f32.mrf.mxu3 }
 0x719   : > { %v2345_v2 = vadd.f32 %v2312_v63, %v2239_v54  ;;  %v4973_v54 = vmov 4  }
 0x71a   : > { %v2678_v25 = vpop.f32.mrf.mxu0 }
 0x71b   : > { %v2718_v12 = vadd.f32 %v2678_v25, %v2528_v3  ;;  %v2535_v5 = vadd.f32 %v2509_v60, %v2345_v2  ;;  %v2512_v25 = vpop.f32.mrf.mxu1 }
 0x71d   : > { %vm2734_vm10 = vcmp.ge.f32.partialorder %v2718_v12, 0.0  ;;  %v2750_v15 = vmul.f32 0.01, %v2718_v12 }
 0x71f   : > { %v2766_v49 = vsel %vm2734_vm10, %v2718_v12, %v2750_v15 }
 0x720   : > { %4544 = vmatmul.msk.f32.gmra.mxu2 %vm2779_vm5, %v2766_v49  ;;  %v2242_v50 = vpop.f32.mrf.mxu3 }
 0x721   : > { %v2346_v15 = vadd.f32 %v2317_v11, %v2242_v50 }
 0x722   : > { %v2681_v52 = vpop.f32.mrf.mxu0 }
 0x723   : > { %v2719_v29 = vadd.f32 %v2681_v52, %v2529_v16  ;;  %v2536_v52 = vadd.f32 %v2512_v25, %v2346_v15  ;;  %v2515_v23 = vpop.f32.mrf.mxu1 }
 0x725   : > { %vm2735_vm11 = vcmp.ge.f32.partialorder %v2719_v29, 0.0  ;;  %v2751_v20 = vmul.f32 0.01, %v2719_v29 }
 0x727   : > { %v2767_v21 = vsel %vm2735_vm11, %v2719_v29, %v2751_v20 }
 0x728   : > { %4545 = vmatmul.msk.f32.gmra.mxu2 %vm2779_vm5, %v2767_v21  ;;  %v2245_v7 = vpop.f32.mrf.mxu3 }
 0x729   : > { %v2347_v20 = vadd.f32 %v2322_v1, %v2245_v7  ;;  %v2895_v7 = vld [vmem:[%s7275_s19 + $0x8] sm:$0xff] }
 0x72a   : > { %v2684_v24 = vpop.f32.mrf.mxu0 }
 0x72b   : > { %v2720_v26 = vadd.f32 %v2684_v24, %v2530_v22  ;;  %v2537_v24 = vadd.f32 %v2515_v23, %v2347_v20  ;;  %v4589_v20 = vld [vmem:[%s7275_s19 + $0x188] sm:$0xff] }
 0x72d   : > { %vm2736_vm12 = vcmp.ge.f32.partialorder %v2720_v26, 0.0  ;;  %v2752_v41 = vmul.f32 0.01, %v2720_v26 }
 0x72f   : > { %v2768_v30 = vsel %vm2736_vm12, %v2720_v26, %v2752_v41 }
 0x730   : > { %4546 = vmatmul.msk.f32.gmra.mxu2 %vm2779_vm5, %v2768_v30  ;;  %v2248_v9 = vpop.f32.mrf.mxu3  ;;  %v2518_v30 = vpop.f32.mrf.mxu1 }
 0x731   : > { %v2348_v41 = vadd.f32 %v2327_v6, %v2248_v9 }
 0x732   : > { %v2687_v31 = vpop.f32.mrf.mxu0 }
 0x733   : > { %v2721_v32 = vadd.f32 %v2687_v31, %v2531_v38  ;;  %v2538_v31 = vadd.f32 %v2518_v30, %v2348_v41 }
 0x735   : > { %vm2737_vm13 = vcmp.ge.f32.partialorder %v2721_v32, 0.0  ;;  %v2753_v61 = vmul.f32 0.01, %v2721_v32 }
 0x737   : > { %v2769_v35 = vsel %vm2737_vm13, %v2721_v32, %v2753_v61  ;;  %vm4206_vm13 = vcmask 253952  }
 0x738   : > { %4547 = vmatmul.msk.f32.gmra.mxu2 %vm2779_vm5, %v2769_v35  ;;  %v2251_v32 = vpop.f32.mrf.mxu3 }
 0x739   : > { %v2349_v61 = vadd.f32 %v2332_v51, %v2251_v32 }
 0x73a   : > { %v2690_v37 = vpop.f32.mrf.mxu0 }
 0x73b   : > { %v2722_v42 = vadd.f32 %v2690_v37, %v2532_v39  ;;  %v2521_v39 = vpop.f32.mrf.mxu1 }
 0x73c   : > { %v2539_v37 = vadd.f32 %v2521_v39, %v2349_v61 }
 0x73d   : > { %vm2738_vm14 = vcmp.ge.f32.partialorder %v2722_v42, 0.0  ;;  %v2754_v43 = vmul.f32 0.01, %v2722_v42 }
 0x73f   : > { %v2770_v19 = vsel %vm2738_vm14, %v2722_v42, %v2754_v43 }
 0x740   : > { %4548 = vmatmul.msk.f32.gmra.mxu2 %vm2779_vm5, %v2770_v19 }
 0x742   : > { %v2693_v33 = vpop.f32.mrf.mxu0 }
 0x743   : > { %v2723_v55 = vadd.f32 %v2693_v33, %v2533_v53  ;;  %v4972_v53 = vmov 3   ;;  %v4974_v33 = vmov 5  }
 0x745   : > { %vm2739_vm15 = vcmp.ge.f32.partialorder %v2723_v55, 0.0  ;;  %v2755_v48 = vmul.f32 0.01, %v2723_v55 }
 0x747   : > { %v2771_v59 = vsel %vm2739_vm15, %v2723_v55, %v2755_v48  ;;  %v4975_v55 = vmov 7  }
 0x748   : > { %4549 = vmatmul.msk.f32.gmra.mxu2 %vm2779_vm5, %v2771_v59 }
 0x74a   : > { %v2696_v47 = vpop.f32.mrf.mxu0 }
 0x74b   : > { %v2724_v58 = vadd.f32 %v2696_v47, %v2534_v62 }
 0x74d   : > { %vm2740_vm0 = vcmp.ge.f32.partialorder %v2724_v58, 0.0  ;;  %v2756_v4 = vmul.f32 0.01, %v2724_v58 }
 0x74f   : > { %v2772_v3 = vsel %vm2740_vm0, %v2724_v58, %v2756_v4  ;;  %v4556_v4 = vld [vmem:[%s7275_s19 + $0x80] sm:$0xff] }
 0x750   : > { %4550 = vmatmul.msk.f32.gmra.mxu2 %vm2779_vm5, %v2772_v3  ;;  %v4557_v3 = vld [vmem:[%s7275_s19 + $0x88] sm:$0xff] }
 0x752   : > { %v2699_v12 = vpop.f32.mrf.mxu0 }
 0x753   : > { %v2725_v14 = vadd.f32 %v2699_v12, %v2535_v5  ;;  %v2894_v12 = vld [vmem:[%s7275_s19] sm:$0xff] }
 0x755   : > { %vm2741_vm1 = vcmp.ge.f32.partialorder %v2725_v14, 0.0  ;;  %v2757_v49 = vmul.f32 0.01, %v2725_v14 }
 0x757   : > { %v2773_v16 = vsel %vm2741_vm1, %v2725_v14, %v2757_v49 }
 0x758   : > { %4551 = vmatmul.msk.f32.gmra.mxu2 %vm2779_vm5, %v2773_v16 }
 0x75a   : > { %v2702_v29 = vpop.f32.mrf.mxu0 }
 0x75b   : > { %v2726_v18 = vadd.f32 %v2702_v29, %v2536_v52 }
 0x75d   : > { %vm2742_vm3 = vcmp.ge.f32.partialorder %v2726_v18, 0.0  ;;  %v2758_v21 = vmul.f32 0.01, %v2726_v18 }
 0x75f   : > { %v2774_v22 = vsel %vm2742_vm3, %v2726_v18, %v2758_v21  ;;  %v4588_v18 = vld [vmem:[%s7275_s19 + $0x180] sm:$0xff] }
 0x760   : > { %4552 = vmatmul.msk.f32.gmra.mxu2 %vm2779_vm5, %v2774_v22 }
 0x762   : > { %v2705_v26 = vpop.f32.mrf.mxu0 }
 0x763   : > { %v2727_v28 = vadd.f32 %v2705_v26, %v2537_v24 }
 0x765   : > { %vm2743_vm4 = vcmp.ge.f32.partialorder %v2727_v28, 0.0  ;;  %v2759_v27 = vmul.f32 0.01, %v2727_v28 }
 0x767   : > { %v2775_v38 = vsel %vm2743_vm4, %v2727_v28, %v2759_v27  ;;  %v4572_v28 = vld [vmem:[%s7275_s19 + $0x100] sm:$0xff] }
 0x768   : > { %4553 = vmatmul.msk.f32.gmra.mxu2 %vm2779_vm5, %v2775_v38  ;;  %v4573_v38 = vld [vmem:[%s7275_s19 + $0x108] sm:$0xff] }
 0x76a   : > { %v2708_v34 = vpop.f32.mrf.mxu0 }
 0x76b   : > { %v2728_v40 = vadd.f32 %v2708_v34, %v2538_v31 }
 0x76d   : > { %vm2744_vm7 = vcmp.ge.f32.partialorder %v2728_v40, 0.0  ;;  %v2760_v35 = vmul.f32 0.01, %v2728_v40 }
 0x76f   : > { %v2776_v36 = vsel %vm2744_vm7, %v2728_v40, %v2760_v35  ;;  %v4652_v40 = vld [vmem:[%s7275_s19 + $0x380] sm:$0xff] }
 0x770   : > { %4554 = vmatmul.msk.f32.gmra.mxu2 %vm2779_vm5, %v2776_v36  ;;  %v4653_v36 = vld [vmem:[%s7275_s19 + $0x388] sm:$0xff] }
 0x772   : > { %v2711_v42 = vpop.f32.mrf.mxu0 }
 0x773   : > { %v2729_v44 = vadd.f32 %v2711_v42, %v2539_v37 }
 0x775   : > { %vm2745_vm8 = vcmp.ge.f32.partialorder %v2729_v44, 0.0  ;;  %v2761_v45 = vmul.f32 0.01, %v2729_v44 }
 0x777   : > { %v2777_v43 = vsel %vm2745_vm8, %v2729_v44, %v2761_v45  ;;  %v4620_v44 = vld [vmem:[%s7275_s19 + $0x280] sm:$0xff] }
 0x778   : > { %4555 = vmatmul.msk.f32.gmra.mxu2 %vm2779_vm5, %v2777_v43 }
 0x783   : > { %v2845_v46 = vpop.f32.mrf.mxu2 }
 0x784   : > { %3062 = vperm.xlu2 %4755, %v2845_v46   ;;  %2912 = vperm.xlu1 %4753, %v2845_v46  }
 0x78b   : > { %v2848_v19 = vpop.f32.mrf.mxu2 }
 0x78c   : > { %4757 = vset.pattern.permute.xlu2 %v4972_v53  ;;  %4756 = vset.pattern.permute.xlu1 %v4970_v10 }
 0x78d   : > { %3066 = vperm.xlu0 %4763, %v2848_v19   ;;  %3332 = vperm.xlu2 %4757, %v2845_v46  }
 0x78e   : > { %3197 = vperm.xlu1 %4756, %v2845_v46  }
 0x793   : > { %v2851_v57 = vpop.f32.mrf.mxu2 }
 0x795   : > { %4765 = vset.pattern.permute.xlu0 %v4972_v53  ;;  %4758 = vset.pattern.permute.xlu2 %v4973_v54 }
 0x796   : > { %4759 = vset.pattern.permute.xlu1 %v4974_v33  ;;  %3336 = vperm.xlu0 %4765, %v2848_v19  }
 0x797   : > { %3467 = vperm.xlu2 %4758, %v2845_v46   ;;  %3602 = vperm.xlu1 %4759, %v2845_v46  }
 0x79b   : > { %v2854_v48 = vpop.f32.mrf.mxu2 }
 0x79e   : > { %4769 = vset.pattern.permute.xlu0 %v4975_v55 }
 0x79f   : > { %4761 = vset.pattern.permute.xlu2 %v4975_v55  ;;  %4760 = vset.pattern.permute.xlu1 %v4976_v56 }
 0x7a0   : > { %3876 = vperm.xlu0 %4769, %v2848_v19   ;;  %3872 = vperm.xlu2 %4761, %v2845_v46  }
 0x7a1   : > { %3737 = vperm.xlu1 %4760, %v2845_v46  }
 0x7a3   : > { %v6227_v59 = vpop.f32.mrf.mxu2 }
 0x7a8   : > { %4770 = vset.pattern.permute.xlu0 %v4968_v0  ;;  %4762 = vset.pattern.permute.xlu2 %v4968_v0 }
 0x7a9   : > { %4766 = vset.pattern.permute.xlu1 %v4973_v54  ;;  %2922 = vperm.xlu0 %4770, %v2851_v57  }
 0x7aa   : > { %3471 = vperm.xlu1 %4766, %v2848_v19   ;;  %2917 = vperm.xlu2 %4762, %v2848_v19  }
 0x7ab   : > { %v6232_v62 = vpop.f32.mrf.mxu2 }
 0x7b1   : > { %4772 = vset.pattern.permute.xlu0 %v4970_v10 }
 0x7b2   : > { %4771 = vset.pattern.permute.xlu1 %v4969_v8  ;;  %4764 = vset.pattern.permute.xlu2 %v4970_v10 }
 0x7b3   : > { %3205 = vperm.xlu0 %4772, %v2851_v57   ;;  %3201 = vperm.xlu2 %4764, %v2848_v19   ;;  %v6246_v63 = vpop.f32.mrf.mxu2 }
 0x7b4   : > { %3070 = vperm.xlu1 %4771, %v2851_v57  }
 0x7bb   : > { %4774 = vset.pattern.permute.xlu0 %v4973_v54  ;;  %4767 = vset.pattern.permute.xlu2 %v4974_v33  ;;  %v6275_v29 = vpop.f32.mrf.mxu2 }
 0x7bc   : > { %4773 = vset.pattern.permute.xlu1 %v4972_v53  ;;  %3475 = vperm.xlu0 %4774, %v2851_v57  }
 0x7bd   : > { %3606 = vperm.xlu2 %4767, %v2848_v19   ;;  %3340 = vperm.xlu1 %4773, %v2851_v57  }
 0x7c4   : > { %4775 = vset.pattern.permute.xlu0 %v4974_v33 }
 0x7c5   : > { %4768 = vset.pattern.permute.xlu2 %v4976_v56  ;;  %4776 = vset.pattern.permute.xlu1 %v4976_v56 }
 0x7c6   : > { %3610 = vperm.xlu0 %4775, %v2851_v57   ;;  %3741 = vperm.xlu2 %4768, %v2848_v19  }
 0x7c7   : > { %3745 = vperm.xlu1 %4776, %v2851_v57  }
 0x7ce   : > { %4777 = vset.pattern.permute.xlu0 %v4975_v55  ;;  %4779 = vset.pattern.permute.xlu2 %v4969_v8 }
 0x7cf   : > { %4778 = vset.pattern.permute.xlu1 %v4968_v0  ;;  %3880 = vperm.xlu0 %4777, %v2851_v57   ;;  %v4621_v57 = vld [vmem:[%s7275_s19 + $0x288] sm:$0xff] }
 0x7d0   : > { %3074 = vperm.xlu2 %4779, %v2854_v48   ;;  %2927 = vperm.xlu1 %4778, %v2854_v48  }
 0x7d7   : > { %4783 = vset.pattern.permute.xlu0 %v4974_v33 }
 0x7d8   : > { %3614 = vperm.xlu0 %4783, %v2854_v48   ;;  %4781 = vset.pattern.permute.xlu2 %v4972_v53 }
 0x7d9   : > { %4780 = vset.pattern.permute.xlu1 %v4970_v10  ;;  %3344 = vperm.xlu2 %4781, %v2854_v48  }
 0x7da   : > { %3209 = vperm.xlu1 %4780, %v2854_v48  }
 0x7de   : > { %v3063_v60 = vpop.permute.xlu2 %3062 }
 0x7df   : > { %v3125_v5 = vmul.f32 %v4556_v4, %v3063_v60  ;;  %v2896_v4 = vld [vmem:[%s7275_s19 + $0x10] sm:$0xff] }
 0x7e0   : > { %4794 = vset.pattern.permute.xlu0 %v4968_v0 }
 0x7e1   : > { %4782 = vset.pattern.permute.xlu2 %v4973_v54  ;;  %2937 = vperm.xlu0 %4794, %v6232_v62   ;;  %v3141_v15 = vsel %vm1622_vm6, %v3125_v5, 0.0 }
 0x7e2   : > { %4787 = vset.pattern.permute.xlu1 %v4969_v8  ;;  %3479 = vperm.xlu2 %4782, %v2854_v48  }
 0x7e3   : > { %3078 = vperm.xlu1 %4787, %v6227_v59  }
 0x7e7   : > { %v3333_v47 = vpop.permute.xlu2 %3332 }
 0x7e8   : > { %v3395_v21 = vmul.f32 %v4588_v18, %v3333_v47 }
 0x7e9   : > { %4799 = vset.pattern.permute.xlu0 %v4974_v33 }
 0x7ea   : > { %4784 = vset.pattern.permute.xlu2 %v4976_v56  ;;  %3622 = vperm.xlu0 %4799, %v6232_v62   ;;  %v3411_v27 = vsel %vm1622_vm6, %v3395_v21, 0.0 }
 0x7eb   : > { %4789 = vset.pattern.permute.xlu1 %v4972_v53  ;;  %3749 = vperm.xlu2 %4784, %v2854_v48  }
 0x7ec   : > { %3348 = vperm.xlu1 %4789, %v6227_v59  }
 0x7f1   : > { %v6244_v58 = vpop.permute.xlu2 %3467 }
 0x7f2   : > { %4803 = vset.pattern.permute.xlu0 %v4969_v8 }
 0x7f3   : > { %4785 = vset.pattern.permute.xlu2 %v4975_v55  ;;  %3086 = vperm.xlu0 %4803, %v6246_v63  }
 0x7f4   : > { %4791 = vset.pattern.permute.xlu1 %v4974_v33  ;;  %3884 = vperm.xlu2 %4785, %v2854_v48   ;;  %v6323_v48 = vpop.f32.mrf.mxu2 }
 0x7f5   : > { %3618 = vperm.xlu1 %4791, %v6227_v59  }
 0x7f6   : > { %v2913_v50 = vpop.permute.xlu1 %2912 }
 0x7f7   : > { %v2990_v16 = vmul.f32 %v2913_v50, %v2894_v12  ;;  %v4604_v50 = vld [vmem:[%s7275_s19 + $0x200] sm:$0xff] }
 0x7f8   : > { %v3530_v12 = vmul.f32 %v4604_v50, %v6244_v58  ;;  %v4591_v50 = vld [vmem:[%s7275_s19 + $0x198] sm:$0xff] }
 0x7f9   : > { %v3006_v22 = vsel %vm1622_vm6, %v2990_v16, 0.0 }
 0x7fa   : > { %v3873_v2 = vpop.permute.xlu2 %3872 }
 0x7fb   : > { %4809 = vset.pattern.permute.xlu0 %v4975_v55  ;;  %v3935_v39 = vmul.f32 %v4652_v40, %v3873_v2 }
 0x7fc   : > { %4786 = vset.pattern.permute.xlu2 %v4968_v0  ;;  %3896 = vperm.xlu0 %4809, %v6246_v63   ;;  %v6372_v40 = vpop.f32.mrf.mxu2 }
 0x7fd   : > { %4792 = vset.pattern.permute.xlu1 %v4976_v56  ;;  %2932 = vperm.xlu2 %4786, %v6227_v59   ;;  %v3951_v46 = vsel %vm1622_vm6, %v3935_v39, 0.0 }
 0x7fe   : > { %3753 = vperm.xlu1 %4792, %v6227_v59  }
 0x7ff   : > { %v3067_v25 = vpop.permute.xlu0 %3066 }
 0x800   : > { %v3126_v14 = vmul.f32 %v4557_v3, %v3067_v25  ;;  %v3198_v11 = vpop.permute.xlu1 %3197  ;;  %v4605_v25 = vld [vmem:[%s7275_s19 + $0x208] sm:$0xff] }
 0x801   : > { %v3260_v31 = vmul.f32 %v4572_v28, %v3198_v11 }
 0x802   : > { %v3142_v49 = vsel %vm1622_vm6, %v3126_v14, 0.0 }
 0x803   : > { %v6273_v52 = vadd.f32 %v3142_v49, %v3141_v15  ;;  %v3276_v61 = vsel %vm1622_vm6, %v3260_v31, 0.0  ;;  %v4636_v15 = vld [vmem:[%s7275_s19 + $0x300] sm:$0xff] }
 0x804   : > { %4812 = vset.pattern.permute.xlu0 %v4970_v10  ;;  %v2918_v1 = vpop.permute.xlu2 %2917 }
 0x805   : > { %4788 = vset.pattern.permute.xlu2 %v4970_v10  ;;  %3225 = vperm.xlu0 %4812, %v6275_v29   ;;  %v2991_v23 = vmul.f32 %v2918_v1, %v2895_v7  ;;  %v4637_v1 = vld [vmem:[%s7275_s19 + $0x308] sm:$0xff] }
 0x806   : > { %4793 = vset.pattern.permute.xlu1 %v4975_v55  ;;  %3213 = vperm.xlu2 %4788, %v6227_v59  }
 0x807   : > { %v3007_v9 = vsel %vm1622_vm6, %v2991_v23, 0.0  ;;  %3888 = vperm.xlu1 %4793, %v6227_v59   ;;  %v3546_v23 = vsel %vm1622_vm6, %v3530_v12, 0.0 }
 0x808   : > { %v3008_v24 = vadd.f32 %v3007_v9, %v3006_v22  ;;  %v3337_v26 = vpop.permute.xlu0 %3336 }
 0x809   : > { %v3396_v6 = vmul.f32 %v4589_v20, %v3337_v26  ;;  %v3603_v41 = vpop.permute.xlu1 %3602 }
 0x80b   : > { %v3412_v30 = vsel %vm1622_vm6, %v3396_v6, 0.0  ;;  %v4574_v6 = vld [vmem:[%s7275_s19 + $0x110] sm:$0xff] }
 0x80c   : > { %v6299_v32 = vadd.f32 %v3412_v30, %v3411_v27  ;;  %v4558_v27 = vld [vmem:[%s7275_s19 + $0x90] sm:$0xff] }
 0x80d   : > { %4814 = vset.pattern.permute.xlu0 %v4973_v54  ;;  %v3202_v34 = vpop.permute.xlu2 %3201 }
 0x80e   : > { %4790 = vset.pattern.permute.xlu2 %v4973_v54  ;;  %3495 = vperm.xlu0 %4814, %v6275_v29   ;;  %v3261_v51 = vmul.f32 %v4573_v38, %v3202_v34 }
 0x80f   : > { %4796 = vset.pattern.permute.xlu1 %v4970_v10  ;;  %3483 = vperm.xlu2 %4790, %v6227_v59   ;;  %v3665_v59 = vmul.f32 %v4620_v44, %v3603_v41 }
 0x810   : > { %v3277_v35 = vsel %vm1622_vm6, %v3261_v51, 0.0  ;;  %3217 = vperm.xlu1 %4796, %v6232_v62  }
 0x811   : > { %v3278_v37 = vadd.f32 %v3277_v35, %v3276_v61  ;;  %v3681_v3 = vsel %vm1622_vm6, %v3665_v59, 0.0  ;;  %v4559_v61 = vld [vmem:[%s7275_s19 + $0x98] sm:$0xff] }
 0x812   : > { %v3877_v42 = vpop.permute.xlu0 %3876 }
 0x813   : > { %v3936_v45 = vmul.f32 %v4653_v36, %v3877_v42  ;;  %v3738_v43 = vpop.permute.xlu1 %3737 }
 0x814   : > { %v3800_v20 = vmul.f32 %v4636_v15, %v3738_v43  ;;  %v4590_v43 = vld [vmem:[%s7275_s19 + $0x190] sm:$0xff] }
 0x815   : > { %v3952_v19 = vsel %vm1622_vm6, %v3936_v45, 0.0 }
 0x816   : > { %v6325_v60 = vadd.f32 %v3952_v19, %v3951_v46  ;;  %4818 = vset.pattern.permute.xlu0 %v4968_v0 }
 0x817   : > { %4795 = vset.pattern.permute.xlu2 %v4969_v8  ;;  %2952 = vperm.xlu0 %4818, %v6323_v48   ;;  %v3607_v47 = vpop.permute.xlu2 %3606 }
 0x818   : > { %4797 = vset.pattern.permute.xlu1 %v4972_v53  ;;  %v3666_v2 = vmul.f32 %v4621_v57, %v3607_v47  ;;  %3082 = vperm.xlu2 %4795, %v6232_v62  }
 0x819   : > { %3352 = vperm.xlu1 %4797, %v6232_v62  }
 0x81a   : > { %v3682_v5 = vsel %vm1622_vm6, %v3666_v2, 0.0 }
 0x81b   : > { %v6345_v14 = vadd.f32 %v3682_v5, %v3681_v3  ;;  %v2923_v11 = vpop.permute.xlu0 %2922 }
 0x81c   : > { %v2992_v49 = vmul.f32 %v2923_v11, %v2896_v4  ;;  %v3472_v7 = vpop.permute.xlu1 %3471  ;;  %v4622_v11 = vld [vmem:[%s7275_s19 + $0x290] sm:$0xff] }
 0x81d   : > { %v3531_v16 = vmul.f32 %v4605_v25, %v3472_v7  ;;  %v6418_v7 = vpop.f32.mrf.mxu2 }
 0x81e   : > { %v3009_v18 = vsel %vm1622_vm6, %v2992_v49, 0.0 }
 0x81f   : > { %v6355_v58 = vadd.f32 %v3009_v18, %v3008_v24  ;;  %v3547_v21 = vsel %vm1622_vm6, %v3531_v16, 0.0  ;;  %4824 = vset.pattern.permute.xlu0 %v4976_v56  ;;  %v3816_v24 = vsel %vm1622_vm6, %v3800_v20, 0.0 }
 0x820   : > { %v3548_v22 = vadd.f32 %v3547_v21, %v3546_v23  ;;  %4798 = vset.pattern.permute.xlu2 %v4973_v54  ;;  %3769 = vperm.xlu0 %4824, %v6323_v48   ;;  %v3742_v9 = vpop.permute.xlu2 %3741 }
 0x821   : > { %4802 = vset.pattern.permute.xlu1 %v4968_v0  ;;  %v3801_v26 = vmul.f32 %v4637_v1, %v3742_v9  ;;  %3487 = vperm.xlu2 %4798, %v6232_v62   ;;  %v4607_v1 = vld [vmem:[%s7275_s19 + $0x218] sm:$0xff] }
 0x822   : > { %2942 = vperm.xlu1 %4802, %v6246_v63  }
 0x823   : > { %v3817_v28 = vsel %vm1622_vm6, %v3801_v26, 0.0 }
 0x824   : > { %v3818_v41 = vadd.f32 %v3817_v28, %v3816_v24  ;;  %v4654_v28 = vld [vmem:[%s7275_s19 + $0x390] sm:$0xff] }
 0x825   : > { %v3206_v30 = vpop.permute.xlu0 %3205 }
 0x826   : > { %v3262_v38 = vmul.f32 %v4574_v6, %v3206_v30  ;;  %v3071_v31 = vpop.permute.xlu1 %3070 }
 0x827   : > { %v3127_v34 = vmul.f32 %v4558_v27, %v3071_v31  ;;  %v6441_v31 = vpop.f32.mrf.mxu2 }
 0x828   : > { %v3279_v51 = vsel %vm1622_vm6, %v3262_v38, 0.0  ;;  %4827 = vset.pattern.permute.xlu0 %v4969_v8 }
 0x829   : > { %v6379_v35 = vadd.f32 %v3279_v51, %v3278_v37  ;;  %v3144_v36 = vsel %vm1622_vm6, %v3127_v34, 0.0  ;;  %4800 = vset.pattern.permute.xlu2 %v4976_v56  ;;  %3098 = vperm.xlu0 %4827, %v6372_v40   ;;  %v4606_v37 = vld [vmem:[%s7275_s19 + $0x210] sm:$0xff]  ;;  %v4639_v34 = vld [vmem:[%s7275_s19 + $0x318] sm:$0xff] }
 0x82a   : > { %v3145_v39 = vadd.f32 %v3144_v36, %v6273_v52  ;;  %4805 = vset.pattern.permute.xlu1 %v4972_v53  ;;  %v3075_v42 = vpop.permute.xlu2 %3074  ;;  %3757 = vperm.xlu2 %4800, %v6232_v62  }
 0x82b   : > { %v3128_v44 = vmul.f32 %v4559_v61, %v3075_v42  ;;  %3356 = vperm.xlu1 %4805, %v6246_v63  }
 0x82d   : > { %v3146_v45 = vsel %vm1622_vm6, %v3128_v44, 0.0 }
 0x82e   : > { %v6395_v46 = vadd.f32 %v3146_v45, %v3145_v39  ;;  %v3476_v52 = vpop.permute.xlu0 %3475  ;;  %v4623_v45 = vld [vmem:[%s7275_s19 + $0x298] sm:$0xff] }
 0x82f   : > { %v3532_v19 = vmul.f32 %v4606_v37, %v3476_v52  ;;  %v3341_v57 = vpop.permute.xlu1 %3340  ;;  %v4575_v52 = vld [vmem:[%s7275_s19 + $0x118] sm:$0xff] }
 0x830   : > { %v3397_v59 = vmul.f32 %v4590_v43, %v3341_v57 }
 0x831   : > { %v3549_v47 = vsel %vm1622_vm6, %v3532_v19, 0.0  ;;  %4829 = vset.pattern.permute.xlu0 %v4972_v53 }
 0x832   : > { %v3550_v2 = vadd.f32 %v3549_v47, %v3548_v22  ;;  %v3414_v4 = vsel %vm1622_vm6, %v3397_v59, 0.0  ;;  %4801 = vset.pattern.permute.xlu2 %v4975_v55  ;;  %3368 = vperm.xlu0 %4829, %v6372_v40  }
 0x833   : > { %v3415_v3 = vadd.f32 %v3414_v4, %v6299_v32  ;;  %4807 = vset.pattern.permute.xlu1 %v4974_v33  ;;  %v3345_v5 = vpop.permute.xlu2 %3344  ;;  %3892 = vperm.xlu2 %4801, %v6232_v62   ;;  %v4638_v32 = vld [vmem:[%s7275_s19 + $0x310] sm:$0xff] }
 0x834   : > { %v3398_v25 = vmul.f32 %v4591_v50, %v3345_v5  ;;  %3626 = vperm.xlu1 %4807, %v6246_v63  }
 0x836   : > { %v3416_v12 = vsel %vm1622_vm6, %v3398_v25, 0.0 }
 0x837   : > { %v6413_v15 = vadd.f32 %v3416_v12, %v3415_v3  ;;  %v4560_v12 = vld [vmem:[%s7275_s19 + $0xa0] sm:$0xff] }
 0x838   : > { %v3611_v49 = vpop.permute.xlu0 %3610 }
 0x839   : > { %v3667_v16 = vmul.f32 %v4622_v11, %v3611_v49  ;;  %v3746_v62 = vpop.permute.xlu1 %3745  ;;  %v6485_v11 = vpop.f32.mrf.mxu2 }
 0x83a   : > { %v3802_v18 = vmul.f32 %v4638_v32, %v3746_v62  ;;  %4839 = vset.pattern.permute.xlu0 %v4974_v33  ;;  %v2899_v32 = vld [vmem:[%s7275_s19 + $0x28] sm:$0xff] }
 0x83b   : > { %v3684_v23 = vsel %vm1622_vm6, %v3667_v16, 0.0  ;;  %4804 = vset.pattern.permute.xlu2 %v4970_v10  ;;  %3642 = vperm.xlu0 %4839, %v6418_v7  }
 0x83c   : > { %v3685_v20 = vadd.f32 %v3684_v23, %v6345_v14  ;;  %v3819_v21 = vsel %vm1622_vm6, %v3802_v18, 0.0  ;;  %4808 = vset.pattern.permute.xlu1 %v4976_v56  ;;  %v3480_v22 = vpop.permute.xlu2 %3479  ;;  %3221 = vperm.xlu2 %4804, %v6246_v63   ;;  %v2897_v14 = vld [vmem:[%s7275_s19 + $0x18] sm:$0xff] }
 0x83d   : > { %v3820_v9 = vadd.f32 %v3819_v21, %v3818_v41  ;;  %v3533_v26 = vmul.f32 %v4607_v1, %v3480_v22  ;;  %3761 = vperm.xlu1 %4808, %v6246_v63  }
 0x83f   : > { %v3551_v24 = vsel %vm1622_vm6, %v3533_v26, 0.0 }
 0x840   : > { %v6436_v6 = vadd.f32 %v3551_v24, %v3550_v2  ;;  %v4592_v24 = vld [vmem:[%s7275_s19 + $0x1a0] sm:$0xff] }
 0x841   : > { %v3881_v27 = vpop.permute.xlu0 %3880 }
 0x842   : > { %v3937_v30 = vmul.f32 %v4654_v28, %v3881_v27  ;;  %v2928_v38 = vpop.permute.xlu1 %2927  ;;  %v4576_v27 = vld [vmem:[%s7275_s19 + $0x120] sm:$0xff] }
 0x843   : > { %v2993_v41 = vmul.f32 %v2928_v38, %v2897_v14  ;;  %4842 = vset.pattern.permute.xlu0 %v4968_v0 }
 0x844   : > { %v3954_v51 = vsel %vm1622_vm6, %v3937_v30, 0.0  ;;  %4806 = vset.pattern.permute.xlu2 %v4973_v54  ;;  %2967 = vperm.xlu0 %4842, %v6441_v31  }
 0x845   : > { %v3955_v61 = vadd.f32 %v3954_v51, %v6325_v60  ;;  %v3011_v36 = vsel %vm1622_vm6, %v2993_v41, 0.0  ;;  %4811 = vset.pattern.permute.xlu1 %v4969_v8  ;;  %v3750_v39 = vpop.permute.xlu2 %3749  ;;  %3491 = vperm.xlu2 %4806, %v6246_v63  }
 0x846   : > { %v3012_v42 = vadd.f32 %v3011_v36, %v6355_v58  ;;  %v3803_v44 = vmul.f32 %v4639_v34, %v3750_v39  ;;  %3090 = vperm.xlu1 %4811, %v6275_v29   ;;  %v4655_v58 = vld [vmem:[%s7275_s19 + $0x398] sm:$0xff]  ;;  %v4625_v36 = vld [vmem:[%s7275_s19 + $0x2a8] sm:$0xff] }
 0x848   : > { %v3821_v37 = vsel %vm1622_vm6, %v3803_v44, 0.0 }
 0x849   : > { %v6460_v43 = vadd.f32 %v3821_v37, %v3820_v9 }
 0x84a   : > { %v3615_v60 = vpop.permute.xlu0 %3614 }
 0x84b   : > { %v3668_v19 = vmul.f32 %v4623_v45, %v3615_v60 }
 0x84c   : > { %v3210_v63 = vpop.permute.xlu1 %3209  ;;  %4844 = vset.pattern.permute.xlu0 %v4970_v10 }
 0x84d   : > { %v3686_v57 = vsel %vm1622_vm6, %v3668_v19, 0.0  ;;  %v3263_v59 = vmul.f32 %v4575_v52, %v3210_v63  ;;  %4810 = vset.pattern.permute.xlu2 %v4968_v0  ;;  %3241 = vperm.xlu0 %4844, %v6441_v31  }
 0x84e   : > { %v6472_v47 = vadd.f32 %v3686_v57, %v3685_v20  ;;  %4813 = vset.pattern.permute.xlu1 %v4972_v53  ;;  %v3885_v50 = vpop.permute.xlu2 %3884  ;;  %2947 = vperm.xlu2 %4810, %v6275_v29  }
 0x84f   : > { %v3281_v2 = vsel %vm1622_vm6, %v3263_v59, 0.0  ;;  %v3938_v4 = vmul.f32 %v4655_v58, %v3885_v50  ;;  %3360 = vperm.xlu1 %4813, %v6275_v29   ;;  %v4640_v50 = vld [vmem:[%s7275_s19 + $0x320] sm:$0xff] }
 0x850   : > { %v3282_v3 = vadd.f32 %v3281_v2, %v6379_v35  ;;  %v2898_v35 = vld [vmem:[%s7275_s19 + $0x20] sm:$0xff]  ;;  %v6549_v2 = vpop.f32.mrf.mxu2 }
 0x851   : > { %v3956_v5 = vsel %vm1622_vm6, %v3938_v4, 0.0  ;;  %v4562_v4 = vld [vmem:[%s7275_s19 + $0xb0] sm:$0xff] }
 0x852   : > { %v6480_v25 = vadd.f32 %v3956_v5, %v3955_v61 }
 0x853   : > { %v2938_v49 = vpop.permute.xlu0 %2937 }
 0x854   : > { %v2995_v1 = vmul.f32 %v2938_v49, %v2899_v32 }
 0x855   : > { %v3079_v16 = vpop.permute.xlu1 %3078  ;;  %4851 = vset.pattern.permute.xlu0 %v4969_v8 }
 0x856   : > { %v3129_v62 = vmul.f32 %v4560_v12, %v3079_v16  ;;  %4815 = vset.pattern.permute.xlu2 %v4974_v33  ;;  %3110 = vperm.xlu0 %4851, %v6485_v11   ;;  %v3015_v26 = vsel %vm1622_vm6, %v2995_v1, 0.0 }
 0x857   : > { %4817 = vset.pattern.permute.xlu1 %v4975_v55  ;;  %v2933_v18 = vpop.permute.xlu2 %2932  ;;  %3630 = vperm.xlu2 %4815, %v6275_v29  }
 0x858   : > { %v3148_v23 = vsel %vm1622_vm6, %v3129_v62, 0.0  ;;  %v2994_v20 = vmul.f32 %v2933_v18, %v2898_v35  ;;  %3900 = vperm.xlu1 %4817, %v6275_v29  }
 0x859   : > { %v3149_v21 = vadd.f32 %v3148_v23, %v6395_v46  ;;  %v4656_v23 = vld [vmem:[%s7275_s19 + $0x3a0] sm:$0xff] }
 0x85a   : > { %v3013_v22 = vsel %vm1622_vm6, %v2994_v20, 0.0 }
 0x85b   : > { %v3014_v9 = vadd.f32 %v3013_v22, %v3012_v42  ;;  %v6572_v22 = vpop.f32.mrf.mxu2 }
 0x85c   : > { %v3623_v39 = vpop.permute.xlu0 %3622 }
 0x85d   : > { %v6506_v28 = vadd.f32 %v3015_v26, %v3014_v9  ;;  %v3670_v44 = vmul.f32 %v4625_v36, %v3623_v39 }
 0x85e   : > { %v3349_v14 = vpop.permute.xlu1 %3348  ;;  %4854 = vset.pattern.permute.xlu0 %v4973_v54 }
 0x85f   : > { %v3399_v30 = vmul.f32 %v4592_v24, %v3349_v14  ;;  %4816 = vset.pattern.permute.xlu2 %v4976_v56  ;;  %3515 = vperm.xlu0 %4854, %v6485_v11   ;;  %v3690_v63 = vsel %vm1622_vm6, %v3670_v44, 0.0 }
 0x860   : > { %4820 = vset.pattern.permute.xlu1 %v4970_v10  ;;  %v3214_v46 = vpop.permute.xlu2 %3213  ;;  %3765 = vperm.xlu2 %4816, %v6275_v29   ;;  %v4624_v29 = vld [vmem:[%s7275_s19 + $0x2a0] sm:$0xff] }
 0x861   : > { %v3418_v38 = vsel %vm1622_vm6, %v3399_v30, 0.0  ;;  %v3264_v41 = vmul.f32 %v4576_v27, %v3214_v46  ;;  %3229 = vperm.xlu1 %4820, %v6323_v48  }
 0x862   : > { %v6519_v34 = vadd.f32 %v3418_v38, %v6413_v15  ;;  %v4608_v15 = vld [vmem:[%s7275_s19 + $0x220] sm:$0xff]  ;;  %v4577_v38 = vld [vmem:[%s7275_s19 + $0x128] sm:$0xff] }
 0x863   : > { %v3283_v51 = vsel %vm1622_vm6, %v3264_v41, 0.0 }
 0x864   : > { %v6522_v61 = vadd.f32 %v3283_v51, %v3282_v3 }
 0x865   : > { %v3087_v3 = vpop.permute.xlu0 %3086 }
 0x866   : > { %v3131_v32 = vmul.f32 %v4562_v4, %v3087_v3 }
 0x867   : > { %v3619_v42 = vpop.permute.xlu1 %3618  ;;  %4856 = vset.pattern.permute.xlu0 %v4976_v56 }
 0x868   : > { %v3669_v37 = vmul.f32 %v4624_v29, %v3619_v42  ;;  %4819 = vset.pattern.permute.xlu2 %v4969_v8  ;;  %3785 = vperm.xlu0 %4856, %v6485_v11   ;;  %v3152_v1 = vsel %vm1622_vm6, %v3131_v32, 0.0 }
 0x869   : > { %4822 = vset.pattern.permute.xlu1 %v4973_v54  ;;  %v3484_v45 = vpop.permute.xlu2 %3483  ;;  %3094 = vperm.xlu2 %4819, %v6323_v48  }
 0x86a   : > { %v3688_v60 = vsel %vm1622_vm6, %v3669_v37, 0.0  ;;  %v3534_v52 = vmul.f32 %v4608_v15, %v3484_v45  ;;  %3499 = vperm.xlu1 %4822, %v6323_v48   ;;  %v4593_v37 = vld [vmem:[%s7275_s19 + $0x1a8] sm:$0xff]  ;;  %v6608_v45 = vpop.f32.mrf.mxu2 }
 0x86b   : > { %v3689_v19 = vadd.f32 %v3688_v60, %v6472_v47  ;;  %v4658_v60 = vld [vmem:[%s7275_s19 + $0x3b0] sm:$0xff] }
 0x86c   : > { %v3553_v58 = vsel %vm1622_vm6, %v3534_v52, 0.0 }
 0x86d   : > { %v3554_v57 = vadd.f32 %v3553_v58, %v6436_v6  ;;  %v6544_v59 = vadd.f32 %v3690_v63, %v3689_v19  ;;  %v4561_v6 = vld [vmem:[%s7275_s19 + $0xa8] sm:$0xff] }
 0x86e   : > { %v3897_v15 = vpop.permute.xlu0 %3896 }
 0x86f   : > { %v3941_v58 = vmul.f32 %v4658_v60, %v3897_v15  ;;  %v4626_v15 = vld [vmem:[%s7275_s19 + $0x2b0] sm:$0xff]  ;;  %v2902_v60 = vld [vmem:[%s7275_s19 + $0x40] sm:$0xff] }
 0x870   : > { %v3754_v47 = vpop.permute.xlu1 %3753  ;;  %4857 = vset.pattern.permute.xlu0 %v4975_v55 }
 0x871   : > { %v3804_v5 = vmul.f32 %v4640_v50, %v3754_v47  ;;  %4821 = vset.pattern.permute.xlu2 %v4972_v53  ;;  %3920 = vperm.xlu0 %4857, %v6485_v11  }
 0x872   : > { %4823 = vset.pattern.permute.xlu1 %v4974_v33  ;;  %v3083_v12 = vpop.permute.xlu2 %3082  ;;  %3364 = vperm.xlu2 %4821, %v6323_v48  }
 0x873   : > { %v3823_v49 = vsel %vm1622_vm6, %v3804_v5, 0.0  ;;  %v3130_v16 = vmul.f32 %v4561_v6, %v3083_v12  ;;  %3634 = vperm.xlu1 %4823, %v6323_v48   ;;  %v3962_v6 = vsel %vm1622_vm6, %v3941_v58, 0.0  ;;  %v2900_v12 = vld [vmem:[%s7275_s19 + $0x30] sm:$0xff] }
 0x874   : > { %v3824_v35 = vadd.f32 %v3823_v49, %v6460_v43  ;;  %v4609_v43 = vld [vmem:[%s7275_s19 + $0x228] sm:$0xff]  ;;  %v4579_v49 = vld [vmem:[%s7275_s19 + $0x138] sm:$0xff] }
 0x875   : > { %v3150_v62 = vsel %vm1622_vm6, %v3130_v16, 0.0 }
 0x876   : > { %v3151_v18 = vadd.f32 %v3150_v62, %v3149_v21 }
 0x877   : > { %v3226_v5 = vpop.permute.xlu0 %3225 }
 0x878   : > { %v6570_v20 = vadd.f32 %v3152_v1, %v3151_v18  ;;  %v3267_v18 = vmul.f32 %v4579_v49, %v3226_v5  ;;  %v4642_v5 = vld [vmem:[%s7275_s19 + $0x330] sm:$0xff] }
 0x879   : > { %v3889_v9 = vpop.permute.xlu1 %3888  ;;  %4866 = vset.pattern.permute.xlu0 %v4968_v0 }
 0x87a   : > { %v3939_v26 = vmul.f32 %v4656_v23, %v3889_v9  ;;  %4825 = vset.pattern.permute.xlu2 %v4975_v55  ;;  %2982 = vperm.xlu0 %4866, %v6572_v22  }
 0x87b   : > { %4826 = vset.pattern.permute.xlu1 %v4968_v0  ;;  %v3488_v21 = vpop.permute.xlu2 %3487  ;;  %3904 = vperm.xlu2 %4825, %v6323_v48   ;;  %v4641_v48 = vld [vmem:[%s7275_s19 + $0x328] sm:$0xff] }
 0x87c   : > { %v3958_v24 = vsel %vm1622_vm6, %v3939_v26, 0.0  ;;  %v3535_v14 = vmul.f32 %v4609_v43, %v3488_v21  ;;  %2957 = vperm.xlu1 %4826, %v6372_v40   ;;  %v3289_v21 = vsel %vm1622_vm6, %v3267_v18, 0.0 }
 0x87d   : > { %v3959_v27 = vadd.f32 %v3958_v24, %v6480_v25  ;;  %v4594_v24 = vld [vmem:[%s7275_s19 + $0x1b0] sm:$0xff] }
 0x87e   : > { %v3555_v30 = vsel %vm1622_vm6, %v3535_v14, 0.0 }
 0x87f   : > { %v6586_v46 = vadd.f32 %v3555_v30, %v3554_v57  ;;  %v4611_v30 = vld [vmem:[%s7275_s19 + $0x238] sm:$0xff] }
 0x880   : > { %v3496_v14 = vpop.permute.xlu0 %3495 }
 0x882   : > { %v3218_v41 = vpop.permute.xlu1 %3217  ;;  %4869 = vset.pattern.permute.xlu0 %v4972_v53 }
 0x883   : > { %v3265_v51 = vmul.f32 %v4577_v38, %v3218_v41  ;;  %4830 = vset.pattern.permute.xlu2 %v4973_v54  ;;  %3388 = vperm.xlu0 %4869, %v6572_v22  }
 0x884   : > { %4828 = vset.pattern.permute.xlu1 %v4970_v10  ;;  %v3758_v25 = vpop.permute.xlu2 %3757  ;;  %3503 = vperm.xlu2 %4830, %v6372_v40  }
 0x885   : > { %v3285_v36 = vsel %vm1622_vm6, %v3265_v51, 0.0  ;;  %v3805_v39 = vmul.f32 %v4641_v48, %v3758_v25  ;;  %3233 = vperm.xlu1 %4828, %v6372_v40   ;;  %v3537_v48 = vmul.f32 %v4611_v30, %v3496_v14 }
 0x886   : > { %v3286_v29 = vadd.f32 %v3285_v36, %v6522_v61  ;;  %v4657_v61 = vld [vmem:[%s7275_s19 + $0x3a8] sm:$0xff] }
 0x887   : > { %v3825_v42 = vsel %vm1622_vm6, %v3805_v39, 0.0 }
 0x888   : > { %v6603_v44 = vadd.f32 %v3825_v42, %v3824_v35  ;;  %v3559_v42 = vsel %vm1622_vm6, %v3537_v48, 0.0 }
 0x88b   : > { %v3353_v52 = vpop.permute.xlu1 %3352  ;;  %4874 = vset.pattern.permute.xlu0 %v4969_v8 }
 0x88c   : > { %v3400_v19 = vmul.f32 %v4593_v37, %v3353_v52  ;;  %4831 = vset.pattern.permute.xlu2 %v4974_v33  ;;  %3122 = vperm.xlu0 %4874, %v6608_v45   ;;  %v2953_v52 = vpop.permute.xlu0 %2952 }
 0x88d   : > { %4832 = vset.pattern.permute.xlu1 %v4976_v56  ;;  %v3893_v63 = vpop.permute.xlu2 %3892  ;;  %3638 = vperm.xlu2 %4831, %v6372_v40   ;;  %v2998_v58 = vmul.f32 %v2953_v52, %v2902_v60 }
 0x88e   : > { %v3420_v57 = vsel %vm1622_vm6, %v3400_v19, 0.0  ;;  %v3940_v50 = vmul.f32 %v4657_v61, %v3893_v63  ;;  %3773 = vperm.xlu1 %4832, %v6372_v40   ;;  %v2901_v19 = vld [vmem:[%s7275_s19 + $0x38] sm:$0xff] }
 0x88f   : > { %v3421_v4 = vadd.f32 %v3420_v57, %v6519_v34  ;;  %v4578_v34 = vld [vmem:[%s7275_s19 + $0x130] sm:$0xff] }
 0x890   : > { %v3960_v3 = vsel %vm1622_vm6, %v3940_v50, 0.0 }
 0x891   : > { %v3961_v47 = vadd.f32 %v3960_v3, %v3959_v27 }
 0x893   : > { %v6629_v32 = vadd.f32 %v3962_v6, %v3961_v47  ;;  %v3021_v6 = vsel %vm1622_vm6, %v2998_v58, 0.0 }
 0x894   : > { %v2943_v16 = vpop.permute.xlu1 %2942  ;;  %4876 = vset.pattern.permute.xlu0 %v4972_v53 }
 0x895   : > { %v2996_v35 = vmul.f32 %v2943_v16, %v2900_v12  ;;  %4834 = vset.pattern.permute.xlu2 %v4968_v0  ;;  %3392 = vperm.xlu0 %4876, %v6608_v45   ;;  %v4627_v16 = vld [vmem:[%s7275_s19 + $0x2b8] sm:$0xff] }
 0x896   : > { %4833 = vset.pattern.permute.xlu1 %v4975_v55  ;;  %v3222_v62 = vpop.permute.xlu2 %3221  ;;  %2962 = vperm.xlu2 %4834, %v6418_v7  }
 0x897   : > { %v3017_v1 = vsel %vm1622_vm6, %v2996_v35, 0.0  ;;  %v3266_v23 = vmul.f32 %v4578_v34, %v3222_v62  ;;  %3908 = vperm.xlu1 %4833, %v6372_v40   ;;  %v4610_v40 = vld [vmem:[%s7275_s19 + $0x230] sm:$0xff] }
 0x898   : > { %v3018_v9 = vadd.f32 %v3017_v1, %v6506_v28 }
 0x899   : > { %v3287_v43 = vsel %vm1622_vm6, %v3266_v23, 0.0 }
 0x89a   : > { %v3288_v26 = vadd.f32 %v3287_v43, %v3286_v29  ;;  %v4563_v43 = vld [vmem:[%s7275_s19 + $0xb8] sm:$0xff] }
 0x89c   : > { %v6650_v27 = vadd.f32 %v3289_v21, %v3288_v26  ;;  %v4644_v26 = vld [vmem:[%s7275_s19 + $0x340] sm:$0xff] }
 0x89d   : > { %v3357_v38 = vpop.permute.xlu1 %3356  ;;  %4880 = vset.pattern.permute.xlu0 %v4975_v55 }
 0x89e   : > { %v3401_v28 = vmul.f32 %v4594_v24, %v3357_v38  ;;  %4836 = vset.pattern.permute.xlu2 %v4970_v10  ;;  %3928 = vperm.xlu0 %4880, %v6572_v22  }
 0x89f   : > { %4835 = vset.pattern.permute.xlu1 %v4969_v8  ;;  %v3492_v41 = vpop.permute.xlu2 %3491  ;;  %3237 = vperm.xlu2 %4836, %v6418_v7  }
 0x8a0   : > { %v3422_v51 = vsel %vm1622_vm6, %v3401_v28, 0.0  ;;  %v3536_v25 = vmul.f32 %v4610_v40, %v3492_v41  ;;  %3102 = vperm.xlu1 %4835, %v6418_v7  }
 0x8a1   : > { %v6665_v36 = vadd.f32 %v3422_v51, %v3421_v4  ;;  %v4595_v51 = vld [vmem:[%s7275_s19 + $0x1b8] sm:$0xff] }
 0x8a2   : > { %v3557_v39 = vsel %vm1622_vm6, %v3536_v25, 0.0 }
 0x8a3   : > { %v3558_v29 = vadd.f32 %v3557_v39, %v6586_v46 }
 0x8a5   : > { %v6673_v37 = vadd.f32 %v3559_v42, %v3558_v29  ;;  %v4565_v29 = vld [vmem:[%s7275_s19 + $0xc8] sm:$0xff] }
 0x8a6   : > { %v3627_v61 = vpop.permute.xlu1 %3626 }
 0x8a7   : > { %v3671_v63 = vmul.f32 %v4626_v15, %v3627_v61  ;;  %4840 = vset.pattern.permute.xlu2 %v4976_v56 }
 0x8a8   : > { %4837 = vset.pattern.permute.xlu1 %v4972_v53  ;;  %v2948_v46 = vpop.permute.xlu2 %2947  ;;  %3777 = vperm.xlu2 %4840, %v6418_v7  }
 0x8a9   : > { %v3692_v57 = vsel %vm1622_vm6, %v3671_v63, 0.0  ;;  %v2997_v50 = vmul.f32 %v2948_v46, %v2901_v19  ;;  %3372 = vperm.xlu1 %4837, %v6418_v7  }
 0x8aa   : > { %v3693_v4 = vadd.f32 %v3692_v57, %v6544_v59 }
 0x8ab   : > { %v3019_v3 = vsel %vm1622_vm6, %v2997_v50, 0.0  ;;  %v4659_v50 = vld [vmem:[%s7275_s19 + $0x3b8] sm:$0xff] }
 0x8ac   : > { %v3020_v47 = vadd.f32 %v3019_v3, %v3018_v9  ;;  %v3770_v9 = vpop.permute.xlu0 %3769  ;;  %v4597_v3 = vld [vmem:[%s7275_s19 + $0x1c8] sm:$0xff] }
 0x8ad   : > { %v3808_v14 = vmul.f32 %v4644_v26, %v3770_v9  ;;  %v4580_v9 = vld [vmem:[%s7275_s19 + $0x140] sm:$0xff] }
 0x8ae   : > { %v6692_v12 = vadd.f32 %v3021_v6, %v3020_v47 }
 0x8af   : > { %v3762_v49 = vpop.permute.xlu1 %3761  ;;  %v3831_v48 = vsel %vm1622_vm6, %v3808_v14, 0.0 }
 0x8b0   : > { %v3806_v34 = vmul.f32 %v4642_v5, %v3762_v49  ;;  %4841 = vset.pattern.permute.xlu2 %v4975_v55 }
 0x8b1   : > { %4838 = vset.pattern.permute.xlu1 %v4973_v54  ;;  %v3631_v59 = vpop.permute.xlu2 %3630  ;;  %3912 = vperm.xlu2 %4841, %v6418_v7  }
 0x8b2   : > { %v3827_v35 = vsel %vm1622_vm6, %v3806_v34, 0.0  ;;  %v3672_v62 = vmul.f32 %v4627_v16, %v3631_v59  ;;  %3507 = vperm.xlu1 %4838, %v6418_v7   ;;  %v4643_v7 = vld [vmem:[%s7275_s19 + $0x338] sm:$0xff] }
 0x8b3   : > { %v3828_v18 = vadd.f32 %v3827_v35, %v6603_v44 }
 0x8b4   : > { %v3694_v1 = vsel %vm1622_vm6, %v3672_v62, 0.0  ;;  %v3099_v25 = vpop.permute.xlu0 %3098 }
 0x8b5   : > { %v6704_v23 = vadd.f32 %v3694_v1, %v3693_v4  ;;  %v3134_v52 = vmul.f32 %v4565_v29, %v3099_v25 }
 0x8b7   : > { %v3158_v57 = vsel %vm1622_vm6, %v3134_v52, 0.0 }
 0x8b8   : > { %v3091_v21 = vpop.permute.xlu1 %3090 }
 0x8b9   : > { %v3132_v24 = vmul.f32 %v4563_v43, %v3091_v21  ;;  %4843 = vset.pattern.permute.xlu2 %v4969_v8  ;;  %v4660_v21 = vld [vmem:[%s7275_s19 + $0x3c0] sm:$0xff] }
 0x8ba   : > { %4847 = vset.pattern.permute.xlu1 %v4974_v33  ;;  %v3766_v44 = vpop.permute.xlu2 %3765  ;;  %3106 = vperm.xlu2 %4843, %v6441_v31  }
 0x8bb   : > { %v3154_v30 = vsel %vm1622_vm6, %v3132_v24, 0.0  ;;  %v3807_v38 = vmul.f32 %v4643_v7, %v3766_v44  ;;  %3646 = vperm.xlu1 %4847, %v6441_v31  }
 0x8bc   : > { %v3155_v40 = vadd.f32 %v3154_v30, %v6570_v20  ;;  %v4564_v20 = vld [vmem:[%s7275_s19 + $0xc0] sm:$0xff]  ;;  %v3369_v47 = vpop.permute.xlu0 %3368 }
 0x8bd   : > { %v3829_v28 = vsel %vm1622_vm6, %v3807_v38, 0.0  ;;  %v3404_v16 = vmul.f32 %v4597_v3, %v3369_v47  ;;  %v4612_v38 = vld [vmem:[%s7275_s19 + $0x240] sm:$0xff] }
 0x8be   : > { %v3830_v41 = vadd.f32 %v3829_v28, %v3828_v18  ;;  %v4613_v28 = vld [vmem:[%s7275_s19 + $0x248] sm:$0xff] }
 0x8bf   : > { %v3428_v1 = vsel %vm1622_vm6, %v3404_v16, 0.0 }
 0x8c0   : > { %v6726_v39 = vadd.f32 %v3831_v48, %v3830_v41 }
 0x8c1   : > { %v3361_v42 = vpop.permute.xlu1 %3360 }
 0x8c2   : > { %v3402_v15 = vmul.f32 %v4595_v51, %v3361_v42  ;;  %4845 = vset.pattern.permute.xlu2 %v4972_v53 }
 0x8c3   : > { %4848 = vset.pattern.permute.xlu1 %v4976_v56  ;;  %v3095_v60 = vpop.permute.xlu2 %3094  ;;  %3376 = vperm.xlu2 %4845, %v6441_v31  }
 0x8c4   : > { %v3424_v61 = vsel %vm1622_vm6, %v3402_v15, 0.0  ;;  %v3133_v19 = vmul.f32 %v4564_v20, %v3095_v60  ;;  %3781 = vperm.xlu1 %4848, %v6441_v31   ;;  %v4628_v20 = vld [vmem:[%s7275_s19 + $0x2c0] sm:$0xff]  ;;  %v4630_v15 = vld [vmem:[%s7275_s19 + $0x2d0] sm:$0xff]  ;;  %v3643_v60 = vpop.permute.xlu0 %3642 }
 0x8c5   : > { %v3425_v63 = vadd.f32 %v3424_v61, %v6665_v36  ;;  %v4596_v36 = vld [vmem:[%s7275_s19 + $0x1c0] sm:$0xff]  ;;  %v4629_v61 = vld [vmem:[%s7275_s19 + $0x2c8] sm:$0xff] }
 0x8c6   : > { %v3156_v46 = vsel %vm1622_vm6, %v3133_v19, 0.0 }
 0x8c7   : > { %v3157_v58 = vadd.f32 %v3156_v46, %v3155_v40 }
 0x8c9   : > { %v6745_v4 = vadd.f32 %v3158_v57, %v3157_v58 }
 0x8ca   : > { %v3901_v6 = vpop.permute.xlu1 %3900 }
 0x8cb   : > { %v3942_v5 = vmul.f32 %v4659_v50, %v3901_v6  ;;  %4846 = vset.pattern.permute.xlu2 %v4973_v54  ;;  %v2903_v6 = vld [vmem:[%s7275_s19 + $0x48] sm:$0xff] }
 0x8cc   : > { %4849 = vset.pattern.permute.xlu1 %v4975_v55  ;;  %v3365_v49 = vpop.permute.xlu2 %3364  ;;  %3511 = vperm.xlu2 %4846, %v6441_v31  }
 0x8cd   : > { %v3964_v34 = vsel %vm1622_vm6, %v3942_v5, 0.0  ;;  %v3403_v59 = vmul.f32 %v4596_v36, %v3365_v49  ;;  %3916 = vperm.xlu1 %4849, %v6441_v31   ;;  %v2904_v49 = vld [vmem:[%s7275_s19 + $0x50] sm:$0xff] }
 0x8ce   : > { %v3965_v35 = vadd.f32 %v3964_v34, %v6629_v32 }
 0x8cf   : > { %v3426_v62 = vsel %vm1622_vm6, %v3403_v59, 0.0 }
 0x8d0   : > { %v3427_v18 = vadd.f32 %v3426_v62, %v3425_v63  ;;  %v3675_v63 = vmul.f32 %v4630_v15, %v3643_v60 }
 0x8d2   : > { %v6764_v43 = vadd.f32 %v3428_v1, %v3427_v18  ;;  %v3700_v47 = vsel %vm1622_vm6, %v3675_v63, 0.0  ;;  %v4582_v1 = vld [vmem:[%s7275_s19 + $0x150] sm:$0xff]  ;;  %v4567_v63 = vld [vmem:[%s7275_s19 + $0xd8] sm:$0xff] }
 0x8d3   : > { %v3230_v26 = vpop.permute.xlu1 %3229 }
 0x8d4   : > { %v3268_v7 = vmul.f32 %v4580_v9, %v3230_v26  ;;  %4855 = vset.pattern.permute.xlu2 %v4974_v33 }
 0x8d5   : > { %4850 = vset.pattern.permute.xlu1 %v4968_v0  ;;  %v3905_v31 = vpop.permute.xlu2 %3904  ;;  %3650 = vperm.xlu2 %4855, %v6485_v11  }
 0x8d6   : > { %v3291_v32 = vsel %vm1622_vm6, %v3268_v7, 0.0  ;;  %v3943_v24 = vmul.f32 %v4660_v21, %v3905_v31  ;;  %2972 = vperm.xlu1 %4850, %v6485_v11  }
 0x8d7   : > { %v3292_v44 = vadd.f32 %v3291_v32, %v6650_v27 }
 0x8d8   : > { %v3966_v14 = vsel %vm1622_vm6, %v3943_v24, 0.0  ;;  %v4645_v24 = vld [vmem:[%s7275_s19 + $0x348] sm:$0xff] }
 0x8d9   : > { %v6776_v30 = vadd.f32 %v3966_v14, %v3965_v35 }
 0x8dc   : > { %v3500_v40 = vpop.permute.xlu1 %3499 }
 0x8dd   : > { %v3538_v41 = vmul.f32 %v4612_v38, %v3500_v40  ;;  %4858 = vset.pattern.permute.xlu2 %v4968_v0  ;;  %v4646_v38 = vld [vmem:[%s7275_s19 + $0x350] sm:$0xff] }
 0x8de   : > { %4852 = vset.pattern.permute.xlu1 %v4970_v10  ;;  %v3504_v48 = vpop.permute.xlu2 %3503  ;;  %2977 = vperm.xlu2 %4858, %v6549_v2  }
 0x8df   : > { %v3561_v27 = vsel %vm1622_vm6, %v3538_v41, 0.0  ;;  %v3539_v51 = vmul.f32 %v4613_v28, %v3504_v48  ;;  %3245 = vperm.xlu1 %4852, %v6485_v11  }
 0x8e0   : > { %v3562_v25 = vadd.f32 %v3561_v27, %v6673_v37 }
 0x8e1   : > { %v3563_v29 = vsel %vm1622_vm6, %v3539_v51, 0.0 }
 0x8e2   : > { %v6791_v42 = vadd.f32 %v3563_v29, %v3562_v25  ;;  %v4661_v25 = vld [vmem:[%s7275_s19 + $0x3c8] sm:$0xff] }
 0x8e5   : > { %v3635_v52 = vpop.permute.xlu1 %3634 }
 0x8e6   : > { %v3673_v19 = vmul.f32 %v4628_v20, %v3635_v52  ;;  %4860 = vset.pattern.permute.xlu2 %v4970_v10  ;;  %v4662_v20 = vld [vmem:[%s7275_s19 + $0x3d0] sm:$0xff] }
 0x8e7   : > { %4853 = vset.pattern.permute.xlu1 %v4972_v53  ;;  %v3639_v37 = vpop.permute.xlu2 %3638  ;;  %3249 = vperm.xlu2 %4860, %v6549_v2  }
 0x8e8   : > { %v3696_v46 = vsel %vm1622_vm6, %v3673_v19, 0.0  ;;  %v3674_v58 = vmul.f32 %v4629_v61, %v3639_v37  ;;  %3380 = vperm.xlu1 %4853, %v6485_v11  }
 0x8e9   : > { %v3697_v57 = vadd.f32 %v3696_v46, %v6704_v23 }
 0x8ea   : > { %v3698_v50 = vsel %vm1622_vm6, %v3674_v58, 0.0 }
 0x8eb   : > { %v3699_v3 = vadd.f32 %v3698_v50, %v3697_v57 }
 0x8ed   : > { %v6813_v36 = vadd.f32 %v3700_v47, %v3699_v3 }
 0x8ee   : > { %v2958_v5 = vpop.permute.xlu1 %2957 }
 0x8ef   : > { %v2999_v16 = vmul.f32 %v2958_v5, %v2903_v6  ;;  %4861 = vset.pattern.permute.xlu2 %v4972_v53  ;;  %v4581_v53 = vld [vmem:[%s7275_s19 + $0x148] sm:$0xff]  ;;  %v4598_v6 = vld [vmem:[%s7275_s19 + $0x1d0] sm:$0xff] }
 0x8f0   : > { %4859 = vset.pattern.permute.xlu1 %v4969_v8  ;;  %v2963_v11 = vpop.permute.xlu2 %2962  ;;  %3384 = vperm.xlu2 %4861, %v6549_v2  }
 0x8f1   : > { %v3023_v23 = vsel %vm1622_vm6, %v2999_v16, 0.0  ;;  %v3000_v34 = vmul.f32 %v2963_v11, %v2904_v49  ;;  %3114 = vperm.xlu1 %4859, %v6549_v2   ;;  %v4599_v49 = vld [vmem:[%s7275_s19 + $0x1d8] sm:$0xff] }
 0x8f2   : > { %v3024_v59 = vadd.f32 %v3023_v23, %v6692_v12 }
 0x8f3   : > { %v3025_v35 = vsel %vm1622_vm6, %v3000_v34, 0.0 }
 0x8f4   : > { %v6825_v62 = vadd.f32 %v3025_v35, %v3024_v59 }
 0x8f7   : > { %v3234_v18 = vpop.permute.xlu1 %3233 }
 0x8f8   : > { %v3269_v9 = vmul.f32 %v4581_v53, %v3234_v18  ;;  %4863 = vset.pattern.permute.xlu2 %v4974_v33  ;;  %v4615_v18 = vld [vmem:[%s7275_s19 + $0x258] sm:$0xff] }
 0x8f9   : > { %4862 = vset.pattern.permute.xlu1 %v4973_v54  ;;  %v3238_v26 = vpop.permute.xlu2 %3237  ;;  %3654 = vperm.xlu2 %4863, %v6549_v2  }
 0x8fa   : > { %v3293_v12 = vsel %vm1622_vm6, %v3269_v9, 0.0  ;;  %v3270_v21 = vmul.f32 %v4582_v1, %v3238_v26  ;;  %3519 = vperm.xlu1 %4862, %v6549_v2  }
 0x8fb   : > { %v3294_v7 = vadd.f32 %v3293_v12, %v3292_v44 }
 0x8fc   : > { %v3295_v31 = vsel %vm1622_vm6, %v3270_v21, 0.0 }
 0x8fd   : > { %v6839_v32 = vadd.f32 %v3295_v31, %v3294_v7 }
 0x900   : > { %v3774_v14 = vpop.permute.xlu1 %3773 }
 0x901   : > { %v3809_v40 = vmul.f32 %v4645_v24, %v3774_v14  ;;  %4864 = vset.pattern.permute.xlu2 %v4976_v56 }
 0x902   : > { %4865 = vset.pattern.permute.xlu1 %v4975_v55  ;;  %v3778_v28 = vpop.permute.xlu2 %3777  ;;  %3789 = vperm.xlu2 %4864, %v6549_v2  }
 0x903   : > { %v3833_v44 = vsel %vm1622_vm6, %v3809_v40, 0.0  ;;  %v3810_v41 = vmul.f32 %v4646_v38, %v3778_v28  ;;  %3924 = vperm.xlu1 %4865, %v6549_v2  }
 0x904   : > { %v3834_v48 = vadd.f32 %v3833_v44, %v6726_v39  ;;  %v2968_v44 = vpop.permute.xlu0 %2967 }
 0x905   : > { %v3835_v27 = vsel %vm1622_vm6, %v3810_v41, 0.0 }
 0x906   : > { %v6854_v51 = vadd.f32 %v3835_v27, %v3834_v48 }
 0x909   : > { %v3909_v29 = vpop.permute.xlu1 %3908 }
 0x90a   : > { %v3944_v15 = vmul.f32 %v4661_v25, %v3909_v29  ;;  %4867 = vset.pattern.permute.xlu2 %v4969_v8  ;;  %v4566_v8 = vld [vmem:[%s7275_s19 + $0xd0] sm:$0xff]  ;;  %v4663_v25 = vld [vmem:[%s7275_s19 + $0x3d8] sm:$0xff] }
 0x90b   : > { %4868 = vset.pattern.permute.xlu1 %v4970_v10  ;;  %v3913_v2 = vpop.permute.xlu2 %3912  ;;  %3118 = vperm.xlu2 %4867, %v6572_v22  }
 0x90c   : > { %v3968_v39 = vsel %vm1622_vm6, %v3944_v15, 0.0  ;;  %v3945_v60 = vmul.f32 %v4662_v20, %v3913_v2  ;;  %3253 = vperm.xlu1 %4868, %v6572_v22   ;;  %v3242_v29 = vpop.permute.xlu0 %3241 }
 0x90d   : > { %v3969_v52 = vadd.f32 %v3968_v39, %v6776_v30 }
 0x90e   : > { %v3970_v61 = vsel %vm1622_vm6, %v3945_v60, 0.0 }
 0x90f   : > { %v6869_v19 = vadd.f32 %v3970_v61, %v3969_v52 }
 0x912   : > { %v3103_v37 = vpop.permute.xlu1 %3102 }
 0x913   : > { %v3135_v46 = vmul.f32 %v4566_v8, %v3103_v37  ;;  %4872 = vset.pattern.permute.xlu2 %v4976_v56 }
 0x914   : > { %4870 = vset.pattern.permute.xlu1 %v4973_v54  ;;  %v3107_v58 = vpop.permute.xlu2 %3106  ;;  %3793 = vperm.xlu2 %4872, %v6572_v22   ;;  %v3111_v8 = vpop.permute.xlu0 %3110 }
 0x915   : > { %v3160_v30 = vsel %vm1622_vm6, %v3135_v46, 0.0  ;;  %v3136_v57 = vmul.f32 %v4567_v63, %v3107_v58  ;;  %3523 = vperm.xlu1 %4870, %v6572_v22   ;;  %v4583_v46 = vld [vmem:[%s7275_s19 + $0x158] sm:$0xff] }
 0x916   : > { %v3161_v50 = vadd.f32 %v3160_v30, %v6745_v4 }
 0x917   : > { %v3162_v3 = vsel %vm1622_vm6, %v3136_v57, 0.0  ;;  %v3271_v57 = vmul.f32 %v4583_v46, %v3242_v29 }
 0x918   : > { %v6884_v47 = vadd.f32 %v3162_v3, %v3161_v50  ;;  %v4584_v50 = vld [vmem:[%s7275_s19 + $0x160] sm:$0xff] }
 0x91b   : > { %v3373_v5 = vpop.permute.xlu1 %3372 }
 0x91c   : > { %v3405_v16 = vmul.f32 %v4598_v6, %v3373_v5  ;;  %4875 = vset.pattern.permute.xlu2 %v4970_v10  ;;  %v4614_v10 = vld [vmem:[%s7275_s19 + $0x250] sm:$0xff]  ;;  %v3297_v6 = vsel %vm1622_vm6, %v3271_v57, 0.0 }
 0x91d   : > { %4871 = vset.pattern.permute.xlu1 %v4974_v33  ;;  %v3377_v11 = vpop.permute.xlu2 %3376  ;;  %3257 = vperm.xlu2 %4875, %v6608_v45  }
 0x91e   : > { %v3430_v4 = vsel %vm1622_vm6, %v3405_v16, 0.0  ;;  %v3406_v23 = vmul.f32 %v4599_v49, %v3377_v11  ;;  %3658 = vperm.xlu1 %4871, %v6572_v22   ;;  %v3516_v49 = vpop.permute.xlu0 %3515 }
 0x91f   : > { %v3431_v34 = vadd.f32 %v3430_v4, %v6764_v43 }
 0x920   : > { %v3432_v59 = vsel %vm1622_vm6, %v3406_v23, 0.0  ;;  %v3993_v23 = vld [vmem:[%s7278_s22 + $0x18] sm:$0xff] }
 0x921   : > { %v6899_v35 = vadd.f32 %v3432_v59, %v3431_v34  ;;  %4009 = vmatpush.msra.mxu3 %v3993_v23 }
 0x924   : > { %v3508_v53 = vpop.permute.xlu1 %3507 }
 0x925   : > { %v3540_v1 = vmul.f32 %v4614_v10, %v3508_v53  ;;  %4877 = vset.pattern.permute.xlu2 %v4973_v54  ;;  %v4631_v54 = vld [vmem:[%s7275_s19 + $0x2d8] sm:$0xff] }
 0x926   : > { %4873 = vset.pattern.permute.xlu1 %v4968_v0  ;;  %v3512_v22 = vpop.permute.xlu2 %3511  ;;  %3527 = vperm.xlu2 %4877, %v6608_v45   ;;  %v4632_v0 = vld [vmem:[%s7275_s19 + $0x2e0] sm:$0xff]  ;;  %v6974_v59 = vpop.permute.xlu0 %3785 }
 0x927   : > { %v3565_v43 = vsel %vm1622_vm6, %v3540_v1, 0.0  ;;  %v3541_v9 = vmul.f32 %v4615_v18, %v3512_v22  ;;  %2987 = vperm.xlu1 %4873, %v6608_v45  }
 0x928   : > { %v3566_v26 = vadd.f32 %v3565_v43, %v6791_v42 }
 0x929   : > { %v3567_v12 = vsel %vm1622_vm6, %v3541_v9, 0.0 }
 0x92a   : > { %v6914_v21 = vadd.f32 %v3567_v12, %v3566_v26  ;;  %v3992_v26 = vld [vmem:[%s7278_s22 + $0x10] sm:$0xff] }
 0x92b   : > { %4010 = vmatpush.msra.mxu3 %v3992_v26 }
 0x92d   : > { %v3647_v7 = vpop.permute.xlu1 %3646 }
 0x92e   : > { %v3676_v31 = vmul.f32 %v4631_v54, %v3647_v7  ;;  %4879 = vset.pattern.permute.xlu2 %v4976_v56  ;;  %v4647_v56 = vld [vmem:[%s7275_s19 + $0x358] sm:$0xff]  ;;  %v6978_v18 = vpop.permute.xlu0 %3920 }
 0x92f   : > { %4878 = vset.pattern.permute.xlu1 %v4974_v33  ;;  %v3651_v24 = vpop.permute.xlu2 %3650  ;;  %3797 = vperm.xlu2 %4879, %v6608_v45  }
 0x930   : > { %v3702_v42 = vsel %vm1622_vm6, %v3676_v31, 0.0  ;;  %v3677_v14 = vmul.f32 %v4632_v0, %v3651_v24  ;;  %3662 = vperm.xlu1 %4878, %v6608_v45   ;;  %v4568_v0 = vld [vmem:[%s7275_s19 + $0xe0] sm:$0xff]  ;;  %v4569_v24 = vld [vmem:[%s7275_s19 + $0xe8] sm:$0xff] }
 0x931   : > { %v3703_v38 = vadd.f32 %v3702_v42, %v6813_v36  ;;  %v4600_v31 = vld [vmem:[%s7275_s19 + $0x1e0] sm:$0xff]  ;;  %v3137_v42 = vmul.f32 %v4568_v0, %v3111_v8  ;;  %v4602_v8 = vld [vmem:[%s7275_s19 + $0x1f0] sm:$0xff] }
 0x932   : > { %v3704_v40 = vsel %vm1622_vm6, %v3677_v14, 0.0 }
 0x933   : > { %v6929_v28 = vadd.f32 %v3704_v40, %v3703_v38 }
 0x936   : > { %v3782_v33 = vpop.permute.xlu1 %3781  ;;  %v6980_v22 = vpop.permute.xlu0 %2982 }
 0x937   : > { %v3811_v41 = vmul.f32 %v4647_v56, %v3782_v33  ;;  %v4570_v56 = vld [vmem:[%s7275_s19 + $0xf0] sm:$0xff] }
 0x938   : > { %4881 = vset.pattern.permute.xlu1 %v4975_v55  ;;  %v6936_v27 = vpop.permute.xlu2 %2977  ;;  %v2905_v55 = vld [vmem:[%s7275_s19 + $0x58] sm:$0xff]  ;;  %v4586_v33 = vld [vmem:[%s7275_s19 + $0x170] sm:$0xff] }
 0x939   : > { %v3837_v48 = vsel %vm1622_vm6, %v3811_v41, 0.0  ;;  %3932 = vperm.xlu1 %4881, %v6608_v45   ;;  %v3001_v60 = vmul.f32 %v2968_v44, %v2905_v55  ;;  %v4585_v44 = vld [vmem:[%s7275_s19 + $0x168] sm:$0xff]  ;;  %v4616_v55 = vld [vmem:[%s7275_s19 + $0x260] sm:$0xff] }
 0x93a   : > { %v6940_v36 = vadd.f32 %v3837_v48, %v6854_v51  ;;  %v2906_v51 = vld [vmem:[%s7275_s19 + $0x60] sm:$0xff]  ;;  %v4601_v41 = vld [vmem:[%s7275_s19 + $0x1e8] sm:$0xff] }
 0x93b   : > { %v3027_v61 = vsel %vm1622_vm6, %v3001_v60, 0.0 }
 0x93c   : > { %v3028_v63 = vadd.f32 %v3027_v61, %v6825_v62  ;;  %v3298_v62 = vadd.f32 %v3297_v6, %v6839_v32 }
 0x93e   : > { %v3389_v12 = vpop.permute.xlu0 %3388 }
 0x93f   : > { %v3917_v20 = vpop.permute.xlu1 %3916 }
 0x940   : > { %v3946_v15 = vmul.f32 %v4663_v25, %v3917_v20  ;;  %v3164_v25 = vsel %vm1622_vm6, %v3137_v42, 0.0 }
 0x941   : > { %v3250_v45 = vpop.permute.xlu2 %3249  ;;  %v3165_v60 = vadd.f32 %v3164_v25, %v6884_v47  ;;  %v4618_v47 = vld [vmem:[%s7275_s19 + $0x270] sm:$0xff] }
 0x942   : > { %v3972_v2 = vsel %vm1622_vm6, %v3946_v15, 0.0 }
 0x943   : > { %v6950_v39 = vadd.f32 %v3972_v2, %v6869_v19  ;;  %v3273_v2 = vmul.f32 %v4585_v44, %v3250_v45 }
 0x945   : > { %v3301_v6 = vsel %vm1622_vm6, %v3273_v2, 0.0 }
 0x946   : > { %v3123_v40 = vpop.permute.xlu0 %3122 }
 0x948   : > { %v2973_v52 = vpop.permute.xlu1 %2972 }
 0x949   : > { %v3002_v37 = vmul.f32 %v2973_v52, %v2906_v51  ;;  %v4617_v51 = vld [vmem:[%s7275_s19 + $0x268] sm:$0xff] }
 0x94a   : > { %v3385_v30 = vpop.permute.xlu2 %3384 }
 0x94b   : > { %v3029_v19 = vsel %vm1622_vm6, %v3002_v37, 0.0  ;;  %v3408_v37 = vmul.f32 %v4601_v41, %v3385_v30  ;;  %v3409_v30 = vmul.f32 %v4602_v8, %v3389_v12  ;;  %v4649_v12 = vld [vmem:[%s7275_s19 + $0x368] sm:$0xff]  ;;  %v4619_v41 = vld [vmem:[%s7275_s19 + $0x278] sm:$0xff] }
 0x94c   : > { %v6961_v58 = vadd.f32 %v3029_v19, %v3028_v63  ;;  %v4571_v63 = vld [vmem:[%s7275_s19 + $0xf8] sm:$0xff]  ;;  %v3542_v19 = vmul.f32 %v4616_v55, %v3516_v49  ;;  %v4648_v49 = vld [vmem:[%s7275_s19 + $0x360] sm:$0xff] }
 0x94d   : > { %v3436_v23 = vsel %vm1622_vm6, %v3408_v37, 0.0  ;;  %v4023_v37 = vld [vmem:[%s7277_s21 + $0x28] sm:$0xff] }
 0x951   : > { %v3246_v3 = vpop.permute.xlu1 %3245 }
 0x952   : > { %v3272_v5 = vmul.f32 %v4584_v50, %v3246_v3  ;;  %v4587_v3 = vld [vmem:[%s7275_s19 + $0x178] sm:$0xff] }
 0x953   : > { %v6969_v4 = vpop.permute.xlu2 %3654 }
 0x954   : > { %v3299_v16 = vsel %vm1622_vm6, %v3272_v5, 0.0 }
 0x955   : > { %v3300_v11 = vadd.f32 %v3299_v16, %v3298_v62  ;;  %v3140_v62 = vmul.f32 %v4571_v63, %v3123_v40  ;;  %v2907_v16 = vld [vmem:[%s7275_s19 + $0x68] sm:$0xff]  ;;  %v3812_v40 = vmul.f32 %v4648_v49, %v6974_v59 }
 0x957   : > { %v3170_v59 = vsel %vm1622_vm6, %v3140_v62, 0.0  ;;  %v3839_v63 = vsel %vm1622_vm6, %v3812_v40, 0.0  ;;  %v4021_v62 = vld [vmem:[%s7277_s21 + $0x18] sm:$0xff]  ;;  %v4664_v40 = vld [vmem:[%s7275_s19 + $0x3e0] sm:$0xff] }
 0x95a   : > { %v3381_v34 = vpop.permute.xlu1 %3380 }
 0x95b   : > { %v3407_v14 = vmul.f32 %v4600_v31, %v3381_v34  ;;  %v3302_v34 = vadd.f32 %v3301_v6, %v3300_v11  ;;  %v3990_v31 = vld [vmem:[%s7278_s22] sm:$0xff]  ;;  %v3569_v11 = vsel %vm1622_vm6, %v3542_v19, 0.0 }
 0x95c   : > { %v6976_v10 = vpop.permute.xlu2 %3789  ;;  %v3570_v44 = vadd.f32 %v3569_v11, %v6914_v21 }
 0x95d   : > { %v3434_v29 = vsel %vm1622_vm6, %v3407_v14, 0.0 }
 0x95e   : > { %v3435_v46 = vadd.f32 %v3434_v29, %v6899_v35  ;;  %v3991_v35 = vld [vmem:[%s7278_s22 + $0x8] sm:$0xff]  ;;  %v4024_v29 = vld [vmem:[%s7277_s21 + $0x30] sm:$0xff] }
 0x95f   : > { %4011 = vmatpush.msra.mxu3 %v3991_v35 }
 0x960   : > { %v3437_v26 = vadd.f32 %v3436_v23, %v3435_v46 }
 0x961   : > { %4012 = vmatpush.msra.mxu3 %v3990_v31 }
 0x963   : > { %v3115_v53 = vpop.permute.xlu1 %3114 }
 0x964   : > { %v3138_v38 = vmul.f32 %v4569_v24, %v3115_v53 }
 0x965   : > { %v3119_v1 = vpop.permute.xlu2 %3118 }
 0x966   : > { %v3166_v20 = vsel %vm1622_vm6, %v3138_v38, 0.0  ;;  %v3139_v15 = vmul.f32 %v4570_v56, %v3119_v1  ;;  %v4603_v1 = vld [vmem:[%s7275_s19 + $0x1f8] sm:$0xff]  ;;  %v3003_v56 = vmul.f32 %v6936_v27, %v2907_v16  ;;  %v3813_v27 = vmul.f32 %v4649_v12, %v6976_v10  ;;  %v4020_v12 = vld [vmem:[%s7277_s21 + $0x10] sm:$0xff] }
 0x967   : > { %v3167_v45 = vadd.f32 %v3166_v20, %v3165_v60  ;;  %v4025_v38 = vld [vmem:[%s7277_s21 + $0x38] sm:$0xff] }
 0x968   : > { %v3168_v57 = vsel %vm1622_vm6, %v3139_v15, 0.0  ;;  %4037 = vmatpush.msrb.mxu3 %v4025_v38  ;;  %v4651_v60 = vld [vmem:[%s7275_s19 + $0x378] sm:$0xff]  ;;  %v4019_v38 = vld [vmem:[%s7277_s21 + $0x8] sm:$0xff] }
 0x96a   : > { %4038 = vmatpush.msrb.mxu3 %v4024_v29 }
 0x96c   : > { %v3520_v32 = vpop.permute.xlu1 %3519  ;;  %4039 = vmatpush.msrb.mxu3 %v4023_v37 }
 0x96d   : > { %v3543_v50 = vmul.f32 %v4617_v51, %v3520_v32  ;;  %v3393_v32 = vpop.permute.xlu0 %3392 }
 0x96e   : > { %v6982_v43 = vpop.permute.xlu2 %3793  ;;  %v3410_v25 = vmul.f32 %v4603_v1, %v3393_v32  ;;  %v4634_v1 = vld [vmem:[%s7275_s19 + $0x2f0] sm:$0xff] }
 0x96f   : > { %v3571_v24 = vsel %vm1622_vm6, %v3543_v50, 0.0 }
 0x970   : > { %v3572_v55 = vadd.f32 %v3571_v24, %v3570_v44  ;;  %v3440_v19 = vsel %vm1622_vm6, %v3410_v25, 0.0 }
 0x975   : > { %v6984_v9 = vpop.permute.xlu1 %3924 }
 0x977   : > { %v3258_v7 = vpop.permute.xlu2 %3257 }
 0x978   : > { %v3275_v0 = vmul.f32 %v4587_v3, %v3258_v7  ;;  %v3438_v7 = vsel %vm1622_vm6, %v3409_v30, 0.0  ;;  %v3840_v30 = vadd.f32 %v3839_v63, %v6940_v36 }
 0x979   : > { %v3439_v20 = vadd.f32 %v3438_v7, %v3437_v26  ;;  %v4665_v7 = vld [vmem:[%s7275_s19 + $0x3e8] sm:$0xff] }
 0x97a   : > { %v3305_v2 = vsel %vm1622_vm6, %v3275_v0, 0.0  ;;  %v3948_v29 = vmul.f32 %v4665_v7, %v6984_v9  ;;  %v4666_v9 = vld [vmem:[%s7275_s19 + $0x3f0] sm:$0xff] }
 0x97b   : > { %v3441_v3 = vadd.f32 %v3440_v19, %v3439_v20 }
 0x97d   : > { %v3442_v0 = vrot.slane %v3441_v3, 4 }
 0x97e   : > { %v3254_v54 = vpop.permute.xlu1 %3253 }
 0x97f   : > { %v3274_v52 = vmul.f32 %v4586_v33, %v3254_v54  ;;  %v3169_v54 = vadd.f32 %v3168_v57, %v3167_v45  ;;  %v4650_v33 = vld [vmem:[%s7275_s19 + $0x370] sm:$0xff]  ;;  %v3031_v45 = vsel %vm1622_vm6, %v3003_v56, 0.0 }
 0x980   : > { %v3528_v61 = vpop.permute.xlu2 %3527  ;;  %v3032_v57 = vadd.f32 %v3031_v45, %v6961_v58  ;;  %v4633_v58 = vld [vmem:[%s7275_s19 + $0x2e8] sm:$0xff]  ;;  %v3976_v45 = vsel %vm1622_vm6, %v3948_v29, 0.0 }
 0x981   : > { %v3303_v5 = vsel %vm1622_vm6, %v3274_v52, 0.0  ;;  %v3171_v15 = vadd.f32 %v3170_v59, %v3169_v54  ;;  %v3814_v52 = vmul.f32 %v4650_v33, %v6982_v43  ;;  %v3545_v8 = vmul.f32 %v4619_v41, %v3528_v61  ;;  %v4022_v61 = vld [vmem:[%s7277_s21 + $0x20] sm:$0xff] }
 0x982   : > { %v3304_v42 = vadd.f32 %v3303_v5, %v3302_v34  ;;  %v3841_v43 = vsel %vm1622_vm6, %v3813_v27, 0.0  ;;  %4040 = vmatpush.msrb.mxu3 %v4022_v61  ;;  %v3678_v54 = vmul.f32 %v4633_v58, %v6969_v4  ;;  %v4018_v41 = vld [vmem:[%s7277_s21] sm:$0xff]  ;;  %v3443_v59 = vadd.f32 %v3442_v0, %v3441_v3 }
 0x983   : > { %v3172_v6 = vrot.slane %v3171_v15, 4  ;;  %v3843_v5 = vsel %vm1622_vm6, %v3814_v52, 0.0  ;;  %v3575_v49 = vsel %vm1622_vm6, %v3545_v8, 0.0  ;;  %v3842_v16 = vadd.f32 %v3841_v43, %v3840_v30 }
 0x984   : > { %v3306_v10 = vadd.f32 %v3305_v2, %v3304_v42  ;;  %4041 = vmatpush.msrb.mxu3 %v4021_v62 }
 0x985   : > { %v3173_v31 = vadd.f32 %v3172_v6, %v3171_v15  ;;  %v3844_v11 = vadd.f32 %v3843_v5, %v3842_v16 }
 0x986   : > { %v3307_v35 = vrot.slane %v3306_v10, 4  ;;  %4042 = vmatpush.msrb.mxu3 %v4020_v12 }
 0x987   : > { %v3524_v48 = vpop.permute.xlu1 %3523  ;;  %v3174_v25 = vrot.slane %v3173_v31, 2 }
 0x988   : > { %v3544_v53 = vmul.f32 %v4618_v47, %v3524_v48  ;;  %v2908_v48 = vld [vmem:[%s7275_s19 + $0x70] sm:$0xff]  ;;  %v3308_v24 = vadd.f32 %v3307_v35, %v3306_v10  ;;  %4043 = vmatpush.msrb.mxu3 %v4019_v38  ;;  %v3444_v10 = vrot.slane %v3443_v59, 2  ;;  %v2893_v35 = vld [vmem:[%s7276_s20] sm:$0x1] }
 0x989   : > { %v3798_v51 = vpop.permute.xlu2 %3797  ;;  %v3004_v46 = vmul.f32 %v6980_v22, %v2908_v48  ;;  %v2909_v22 = vld [vmem:[%s7275_s19 + $0x78] sm:$0xff]  ;;  %v3706_v48 = vsel %vm1622_vm6, %v3678_v54, 0.0  ;;  %v3175_v8 = vadd.f32 %v3174_v25, %v3173_v31 }
 0x98a   : > { %v3573_v21 = vsel %vm1622_vm6, %v3544_v53, 0.0  ;;  %v3815_v50 = vmul.f32 %v4651_v60, %v3798_v51  ;;  %4044 = vmatpush.msrb.mxu3 %v4018_v41  ;;  %v3309_v20 = vrot.slane %v3308_v24, 2  ;;  %v3707_v51 = vadd.f32 %v3706_v48, %v6929_v28 }
 0x98b   : > { %v3574_v47 = vadd.f32 %v3573_v21, %v3572_v55  ;;  %v3033_v36 = vsel %vm1622_vm6, %v3004_v46, 0.0  ;;  %v3947_v21 = vmul.f32 %v4664_v40, %v6978_v18  ;;  %v3929_v46 = vpop.permute.xlu0 %3928  ;;  %v3445_v6 = vadd.f32 %v3444_v10, %v3443_v59  ;;  %v4677_v10 = vld [vmem:[%s7277_s21 + $0x78] sm:$0xff] }
 0x98c   : > { %v3845_v53 = vsel %vm1622_vm6, %v3815_v50, 0.0  ;;  %v3034_v26 = vadd.f32 %v3033_v36, %v3032_v57  ;;  %v3949_v30 = vmul.f32 %v4666_v9, %v3929_v46  ;;  %v4672_v9 = vld [vmem:[%s7277_s21 + $0x50] sm:$0xff]  ;;  %v4671_v46 = vld [vmem:[%s7277_s21 + $0x48] sm:$0xff] }
 0x98d   : > { %v3576_v23 = vadd.f32 %v3575_v49, %v3574_v47  ;;  %v3846_v56 = vadd.f32 %v3845_v53, %v3844_v11  ;;  %v3974_v18 = vsel %vm1622_vm6, %v3947_v21, 0.0  ;;  %v3310_v47 = vadd.f32 %v3309_v20, %v3308_v24 }
 0x98e   : > { %v3975_v61 = vadd.f32 %v3974_v18, %v6950_v39  ;;  %v3978_v53 = vsel %vm1622_vm6, %v3949_v30, 0.0  ;;  %v4673_v18 = vld [vmem:[%s7277_s21 + $0x58] sm:$0xff] }
 0x98f   : > { %v3577_v4 = vrot.slane %v3576_v23, 4  ;;  %v3847_v55 = vrot.slane %v3846_v56, 4  ;;  %v3311_v62 = vrot.slane %v3310_v47, 1 }
 0x990   : > { %v7057_v14 = vpop.permute.xlu1 %3658  ;;  %v3977_v5 = vadd.f32 %v3976_v45, %v3975_v61  ;;  %v4670_v45 = vld [vmem:[%s7277_s21 + $0x40] sm:$0xff]  ;;  %v4110_v61 = vpop.f32.mrf.mxu1 }
 0x991   : > { %v3679_v44 = vmul.f32 %v4634_v1, %v7057_v14  ;;  %v4635_v14 = vld [vmem:[%s7275_s19 + $0x2f8] sm:$0xff]  ;;  %v3578_v15 = vadd.f32 %v3577_v4, %v3576_v23  ;;  %v3848_v43 = vadd.f32 %v3847_v55, %v3846_v56  ;;  %v3446_v1 = vrot.slane %v3445_v6, 1 }
 0x992   : > { %v3979_v31 = vadd.f32 %v3978_v53, %v3977_v5  ;;  %v3312_v11 = vadd.f32 %v3311_v62, %v3310_v47 }
 0x993   : > { %v3708_v2 = vsel %vm1622_vm6, %v3679_v44, 0.0  ;;  %v3579_v57 = vrot.slane %v3578_v15, 2  ;;  %v3849_v16 = vrot.slane %v3848_v43, 2  ;;  %v3447_v4 = vadd.f32 %v3446_v1, %v3445_v6 }
 0x994   : > { %v3709_v19 = vadd.f32 %v3708_v2, %v3707_v51  ;;  %v4977_v6 = vmov 64.0  }
 0x995   : > { %v3580_v36 = vadd.f32 %v3579_v57, %v3578_v15  ;;  %4896 = vrcp.f32 %v4977_v6 }
 0x997   : > { %v3581_v24 = vrot.slane %v3580_v36, 1 }
 0x999   : > { %v2988_v34 = vpop.permute.xlu1 %2987  ;;  %v3582_v41 = vadd.f32 %v3581_v24, %v3580_v36 }
 0x99a   : > { %v3005_v32 = vmul.f32 %v2988_v34, %v2909_v22  ;;  %v3176_v22 = vrot.slane %v3175_v8, 1  ;;  %v4667_v34 = vld [vmem:[%s7275_s19 + $0x3f8] sm:$0xff] }
 0x99c   : > { %v3035_v42 = vsel %vm1622_vm6, %v3005_v32, 0.0  ;;  %v3177_v32 = vadd.f32 %v3176_v22, %v3175_v8  ;;  %v4676_v8 = vld [vmem:[%s7277_s21 + $0x70] sm:$0xff]  ;;  %v4897_v22 = vpop.eup %4896 }
 0x99d   : > { %v3036_v33 = vadd.f32 %v3035_v42, %v3034_v26  ;;  %v3850_v42 = vadd.f32 %v3849_v16, %v3848_v43  ;;  %vm4125_vm5 = vweird.f32 %v4897_v22 }
 0x99f   : > { %v3037_v27 = vrot.slane %v3036_v33, 4  ;;  %v3851_v48 = vrot.slane %v3850_v42, 1 }
 0x9a1   : > { %v3038_v60 = vadd.f32 %v3037_v27, %v3036_v33  ;;  %v3852_v20 = vadd.f32 %v3851_v48, %v3850_v42 }
 0x9a2   : > { %v3663_v52 = vpop.permute.xlu1 %3662 }
 0x9a3   : > { %v3039_v37 = vrot.slane %v3038_v60, 2  ;;  %v3680_v63 = vmul.f32 %v4635_v14, %v3663_v52 }
 0x9a5   : > { %v3040_v50 = vadd.f32 %v3039_v37, %v3038_v60  ;;  %v3710_v28 = vsel %vm1622_vm6, %v3680_v63, 0.0  ;;  %v4675_v37 = vld [vmem:[%s7277_s21 + $0x68] sm:$0xff]  ;;  %v4674_v63 = vld [vmem:[%s7277_s21 + $0x60] sm:$0xff] }
 0x9a6   : > { %v3711_v3 = vadd.f32 %v3710_v28, %v3709_v19  ;;  %v3989_v19 = vld [vmem:[%s7279_s23] sm:$0x1] }
 0x9a7   : > { %v3041_v58 = vrot.slane %v3040_v50, 1 }
 0x9a8   : > { %v3712_v49 = vrot.slane %v3711_v3, 4 }
 0x9a9   : > { %v3042_v23 = vadd.f32 %v3041_v58, %v3040_v50 }
 0x9aa   : > { %v3713_v39 = vadd.f32 %v3712_v49, %v3711_v3 }
 0x9ab   : > { %v3043_v26 = vadd.f32 %v3042_v23, %v2893_v35  ;;  %v3933_v12 = vpop.permute.xlu1 %3932 }
 0x9ac   : > { %v3714_v54 = vrot.slane %v3713_v39, 2  ;;  %v3950_v0 = vmul.f32 %v4667_v34, %v3933_v12 }
 0x9ad   : > { %v3178_v38 = vadd.f32 %v3177_v32, %v3043_v26 }
 0x9ae   : > { %v3715_v40 = vadd.f32 %v3714_v54, %v3713_v39  ;;  %v3980_v7 = vsel %vm1622_vm6, %v3950_v0, 0.0 }
 0x9af   : > { %v3313_v56 = vadd.f32 %v3312_v11, %v3178_v38  ;;  %v3981_v44 = vadd.f32 %v3980_v7, %v3979_v31  ;;  %v4114_v11 = vld [vmem:[%s7280_s24] sm:$0x1] }
 0x9b0   : > { %v3716_v33 = vrot.slane %v3715_v40, 1  ;;  %v4115_v38 = vld [vmem:[%s7281_s25] sm:$0x1] }
 0x9b1   : > { %v3448_v59 = vadd.f32 %v3447_v4, %v3313_v56  ;;  %v3982_v25 = vrot.slane %v3981_v44, 4  ;;  %v4180_v4 = vld [vmem:[%s7282_s26 + $0x30] sm:$0xff] }
 0x9b2   : > { %v3717_v27 = vadd.f32 %v3716_v33, %v3715_v40  ;;  %v4181_v40 = vld [vmem:[%s7282_s26 + $0x38] sm:$0xff] }
 0x9b3   : > { %v3583_v21 = vadd.f32 %v3582_v41, %v3448_v59  ;;  %v3983_v29 = vadd.f32 %v3982_v25, %v3981_v44  ;;  %v4179_v44 = vld [vmem:[%s7282_s26 + $0x28] sm:$0xff]  ;;  %v4178_v41 = vld [vmem:[%s7282_s26 + $0x20] sm:$0xff]  ;;  %v4177_v59 = vld [vmem:[%s7282_s26 + $0x18] sm:$0xff] }
 0x9b5   : > { %v3718_v14 = vadd.f32 %v3717_v27, %v3583_v21  ;;  %v3984_v15 = vrot.slane %v3983_v29, 2  ;;  %v4176_v27 = vld [vmem:[%s7282_s26 + $0x10] sm:$0xff]  ;;  %v4175_v21 = vld [vmem:[%s7282_s26 + $0x8] sm:$0xff] }
 0x9b7   : > { %v3853_v55 = vadd.f32 %v3852_v20, %v3718_v14  ;;  %v3985_v2 = vadd.f32 %v3984_v15, %v3983_v29  ;;  %v4174_v20 = vld [vmem:[%s7282_s26] sm:$0xff] }
 0x9b9   : > { %v3986_v60 = vrot.slane %v3985_v2, 1 }
 0x9bb   : > { %v3987_v51 = vadd.f32 %v3986_v60, %v3985_v2 }
 0x9bd   : > { %v3988_v52 = vadd.f32 %v3987_v51, %v3853_v55 }
 0x9bf   : > { %4668 = vmatmul.msk.f32.vlgmr.msra.gmra.mxu3 %vm1622_vm6, %v3988_v52  ;;  %vm4116_vm6 = vcmask 516096  }
 0x9c0   : > { %4069 = vmatpush.msra.mxu3 %v4677_v10 }
 0x9c2   : > { %4070 = vmatpush.msra.mxu3 %v4676_v8 }
 0x9c4   : > { %4071 = vmatpush.msra.mxu3 %v4675_v37 }
 0x9c6   : > { %4072 = vmatpush.msra.mxu3 %v4674_v63 }
 0x9c7   : > { %4669 = vmatmul.msk.f32.vlgmr.msrb.gmra.mxu3 %vm1336_vm2, %v5599_v17 }
 0x9c8   : > { %4073 = vmatpush.msra.mxu3 %v4673_v18 }
 0x9ca   : > { %4074 = vmatpush.msra.mxu3 %v4672_v9 }
 0x9cc   : > { %4075 = vmatpush.msra.mxu3 %v4671_v46 }
 0x9ce   : > { %4076 = vmatpush.msra.mxu3 %v4670_v45 }
 0x9cf   : > { %4678 = vmatmul.msk.f32.vlgmr.msra.gmra.mxu3 %vm1336_vm2, %v5594_v13  ;;  %v4121_v13 = vmul.f32 64.0, %v4897_v22 }
 0x9d0   : > { %4194 = vmatpush.msrb.mxu3 %v4181_v40 }
 0x9d1   : > { %v4122_v58 = vsub.f32 1.0, %v4121_v13 }
 0x9d2   : > { %4195 = vmatpush.msrb.mxu3 %v4180_v4 }
 0x9d3   : > { %v4123_v5 = vmul.f32 %v4897_v22, %v4122_v58 }
 0x9d4   : > { %4196 = vmatpush.msrb.mxu3 %v4179_v44 }
 0x9d5   : > { %v4124_v35 = vadd.f32 %v4897_v22, %v4123_v5 }
 0x9d6   : > { %4197 = vmatpush.msrb.mxu3 %v4178_v41 }
 0x9d7   : > { %v4126_v49 = vsel %vm4125_vm5, %v4897_v22, %v4124_v35 }
 0x9d8   : > { %4198 = vmatpush.msrb.mxu3 %v4177_v59 }
 0x9da   : > { %4199 = vmatpush.msrb.mxu3 %v4176_v27 }
 0x9dc   : > { %4200 = vmatpush.msrb.mxu3 %v4175_v21 }
 0x9de   : > { %4201 = vmatpush.msrb.mxu3 %v4174_v20 }
 0xa42   : > { %v4014_v17 = vpop.f32.mrf.mxu3 }
 0xa43   : > { %v4017_v57 = vadd.f32 %v4014_v17, %v3989_v19 }
 0xa4a   : > { %v4046_v47 = vpop.f32.mrf.mxu3 }
 0xa4b   : > { %v4049_v43 = vadd.f32 %v4046_v47, %v4017_v57  ;;  %v4978_v47 = vmov -1.0  }
 0xa52   : > { %v4078_v50 = vpop.f32.mrf.mxu3 }
 0xa53   : > { %v4081_v28 = vadd.f32 %v4078_v50, %v4049_v43 }
 0xa55   : > { %v4113_v3 = vadd.f32 %v4110_v61, %v4081_v28  ;;  %v4182_v61 = vld [vmem:[%s7283_s27] sm:$0x1] }
 0xa57   : > { %v4117_v30 = vsel %vm4116_vm6, %v4113_v3, 0.0 }
 0xa58   : > { %4118 = vadd.xlane.f32.xlu2 %v4117_v30 }
 0xacb   : > { %v4119_v62 = vpop.xlane.xlu2 %4118 }
 0xacc   : > { %v4127_v36 = vmul.f32 %v4126_v49, %v4119_v62 }
 0xace   : > { %v4128_v16 = vsub.f32 %v4113_v3, %v4127_v36 }
 0xad0   : > { %v4129_v23 = vmul.f32 %v4128_v16, %v4128_v16 }
 0xad2   : > { %v4130_v34 = vsel %vm4116_vm6, %v4129_v23, 0.0 }
 0xad3   : > { %4131 = vadd.xlane.f32.xlu0 %v4130_v34 }
 0xb46   : > { %v4132_v39 = vpop.xlane.xlu0 %4131 }
 0xb47   : > { %v4133_v53 = vmul.f32 %v4132_v39, %v4126_v49 }
 0xb49   : > { %v4134_v1 = vadd.f32 1e-05, %v4133_v53 }
 0xb4b   : > { %4898 = vrsqrt.f32 %v4134_v1  ;;  %vm4141_vm10 = vweird.f32 %v4134_v1 }
 0xb51   : > { %v4899_v32 = vpop.eup %4898 }
 0xb52   : > { %v4136_v26 = vmul.f32 %v4899_v32, %v4134_v1  ;;  %vm4142_vm9 = vweird.f32 %v4899_v32 }
 0xb53   : > { %vm4143_vm11 = vmor %vm4141_vm10, %vm4142_vm9 }
 0xb54   : > { %v4137_v12 = vmul.f32 %v4899_v32, %v4136_v26 }
 0xb56   : > { %v4138_v54 = vmul.f32 0.5, %v4137_v12 }
 0xb58   : > { %v4139_v0 = vsub.f32 1.5, %v4138_v54 }
 0xb5a   : > { %v4140_v31 = vmul.f32 %v4899_v32, %v4139_v0 }
 0xb5c   : > { %v4144_v24 = vsel %vm4143_vm11, %v4899_v32, %v4140_v31 }
 0xb5d   : > { %v4145_v42 = vmul.f32 %v4144_v24, %v4128_v16 }
 0xb5f   : > { %v4146_v7 = vmul.f32 %v4145_v42, %v4114_v11 }
 0xb61   : > { %v4147_v56 = vadd.f32 %v4146_v7, %v4115_v38 }
 0xb63   : > { %v4149_v33 = vmul.f32 0.70710677, %v4147_v56  ;;  %v4148_v43 = vmul.f32 0.5, %v4147_v56 }
 0xb65   : > { %v4152_v48 = vand.u32 2147483647, %v4149_v33  ;;  %vm4150_vm12 = vcmp.ge.f32.partialorder %v4149_v33, 0.0 }
 0xb66   : > { %v4151_v19 = vsel %vm4150_vm12, 1.0, %v4978_v47 }
 0xb67   : > { %v4153_v25 = vmul.f32 0.3275911, %v4152_v48  ;;  %v4165_v15 = vsub.f32 0.0, %v4152_v48 }
 0xb69   : > { %v4154_v29 = vadd.f32 1.0, %v4153_v25  ;;  %v4166_v60 = vmul.f32 %v4165_v15, %v4152_v48 }
 0xb6b   : > { %4900 = vrcp.f32 %v4154_v29  ;;  %v4167_v10 = vmul.f32 1.442695, %v4166_v60 }
 0xb6d   : > { %4902 = vpow2.f32 %v4167_v10 }
 0xb71   : > { %v4901_v14 = vpop.eup %4900 }
 0xb72   : > { %v4156_v55 = vmul.f32 1.0614054, %v4901_v14 }
 0xb73   : > { %v4903_v46 = vpop.eup %4902 }
 0xb74   : > { %v4157_v2 = vadd.f32 -1.4531521, %v4156_v55 }
 0xb76   : > { %v4158_v51 = vmul.f32 %v4901_v14, %v4157_v2 }
 0xb78   : > { %v4159_v52 = vadd.f32 1.4214138, %v4158_v51 }
 0xb7a   : > { %v4160_v8 = vmul.f32 %v4901_v14, %v4159_v52 }
 0xb7c   : > { %v4161_v37 = vadd.f32 -0.28449672, %v4160_v8 }
 0xb7e   : > { %v4162_v63 = vmul.f32 %v4901_v14, %v4161_v37 }
 0xb80   : > { %v4163_v18 = vadd.f32 0.2548296, %v4162_v63 }
 0xb82   : > { %v4164_v9 = vmul.f32 %v4901_v14, %v4163_v18 }
 0xb84   : > { %v4169_v45 = vmul.f32 %v4903_v46, %v4164_v9 }
 0xb86   : > { %v4170_v17 = vsub.f32 1.0, %v4169_v45 }
 0xb88   : > { %v4171_v57 = vmul.f32 %v4170_v17, %v4151_v19 }
 0xb8a   : > { %v4172_v50 = vadd.f32 1.0, %v4171_v57 }
 0xb8c   : > { %v4173_v28 = vmul.f32 %v4172_v50, %v4148_v43 }
 0xb8e   : > { %4688 = vmatmul.msk.f32.vlgmr.msrb.gmra.mxu3 %vm1336_vm2, %v4173_v28 }
 0xc11   : > { %v4203_v3 = vpop.f32.mrf.mxu3 }
 0xc12   : > { %v4204_v30 = vadd.f32 %v4203_v3, %v4182_v61 }
 0xc14   : > { %4207 = vst.msk [vmem:[%s852_s0] sm:$0x1] %vm4206_vm13, %v4204_v30 }
 0xc15   : > { %4931 = shalt.err (!%p4928_p3)
}
 0xc16   : > { %4693 = dma.vmem_to_hbm [thread:$0]  (%p5162_p5), %s4220_s9, 16, %s4222_s8, %s4209_s1  }
 0xc17 PF: > { %s7349_s30 = sld [smem:[#allocation7_spill]] }
 0xc18   : > { %s7350_s4 = sld [smem:[#allocation5_spill]] }
 0xc1d   : > { %p4699_p4 = scmp.ge.s32.totalorder %s7349_s30, 2 }
 0xc1e   : > { %s4233_s14 = sand.u32 1, %s7350_s4  }
 0xc1f   : > { %p4696_p7 = pnand %p4699_p4, %p5166_p6  ;;  %s4234_s3 = scalar_lea.sflag [#allocation3], %s4233_s14 }
 0xc21   : > { %p4697_p8 = pneg %p4696_p7 }
 0xc23   : > { %4949 = dma.done.wait (%p4697_p8), %s4234_s3, 16  }
 0xc24   : > { %4951 = vsyncadd (%p4697_p8), %s4234_s3, 4294967280  ;;  %s7352_s30 = sld [smem:[#allocation8_spill]]  ;;  %s7355_s8 = smov %s4958_s5 }
 0xc25   : > { %s7353_s13 = sld [smem:[#allocation6_spill]] }
 0xc26   : > { %s7354_s9 = sld [smem:[#allocation9_spill]] }
 0xc2a   : > { %p38_p9 = scmp.ge.s32.totalorder %s7352_s30, 4  }
 0xc2b   : > { %s7356_s5 = smov %s7353_s13 }
 0xc2c   :  { %40 = sbr.rel (!%p38_p9) target bundleno = 19 (0x13), region = 195 }
 0xc31   :  { %4239 = vsyncpa [#allocation3], 1 }
 0xc32   :  { %4241 = vsyncpa [#allocation3 + $0x1], 1 }

</bundles_post_ra>
